<compile_context>
chip_gen: v6e
topology: v6e:2x2x1
jax: 0.10.0
libtpu: 0.0.40
codegen_flags: <defaults>
</compile_context>

<pallas_src>
import functools
import math

import jax
import jax.numpy as jnp
from jax import lax
from jax.experimental import pallas as pl
from jax.experimental.pallas import tpu as pltpu


# ----------------------------------------------------------------------------
# helpers
# ----------------------------------------------------------------------------
def _zero_index_map(ndim):
    zeros = (0,) * ndim
    return lambda *args: zeros


def _full_spec(shape):
    return pl.BlockSpec(shape, _zero_index_map(len(shape)))


def _layer_norm(x, gamma, beta, eps=1e-5):
    mu = jnp.mean(x, axis=-1, keepdims=True)
    var = jnp.mean((x - mu) ** 2, axis=-1, keepdims=True)
    return (x - mu) * lax.rsqrt(var + eps) * gamma + beta


# ----------------------------------------------------------------------------
# 1. GRUCell memory update kernel (sequential over timestamp-sorted edges)
#    Gate matmuls are fused: w_i is (F, 3H), w_h is (H, 3H) with gate order
#    [r | z | n] (consistent with torch.nn.GRUCell math).
# ----------------------------------------------------------------------------
def _gru_kernel(src_ref, dst_ref, feats_ref, w_i_ref, b_i_ref, w_h_ref, b_h_ref,
                mem_ref, gx_ref):
    H = mem_ref.shape[1]

    # memory buffer starts at zeros (matches register_buffer('memory', zeros))
    mem_ref[...] = jnp.zeros_like(mem_ref)

    # fused precompute of all input gates for every node: (N, 3H)
    gx_ref[...] = (
        jnp.dot(feats_ref[...], w_i_ref[...], preferred_element_type=jnp.float32)
        + b_i_ref[...]
    )

    # hoist recurrent weights/biases out of the serial loop (no per-iter loads)
    w_h = w_h_ref[...]
    b_h = b_h_ref[...]

    num_edges = src_ref.shape[0]

    def body(e, carry):
        s = src_ref[e]
        d = dst_ref[e]
        h_prev = mem_ref[pl.ds(d, 1), :]                      # (1, H)
        gx = gx_ref[pl.ds(s, 1), :]                           # (1, 3H)
        gh = jnp.dot(h_prev, w_h, preferred_element_type=jnp.float32) + b_h
        r = jax.nn.sigmoid(gx[:, 0:H] + gh[:, 0:H])
        z = jax.nn.sigmoid(gx[:, H:2 * H] + gh[:, H:2 * H])
        n = jnp.tanh(gx[:, 2 * H:3 * H] + r * gh[:, 2 * H:3 * H])
        mem_ref[pl.ds(d, 1), :] = (1.0 - z) * n + z * h_prev
        return carry

    lax.fori_loop(0, num_edges, body, 0)


def gru_memory_update(node_feats, src_ids, dst_ids, p):
    N, F = node_feats.shape
    H = p["w_h"].shape[0]
    grid_spec = pltpu.PrefetchScalarGridSpec(
        num_scalar_prefetch=2,
        grid=(1,),
        in_specs=[
            _full_spec((N, F)),
            _full_spec((F, 3 * H)), _full_spec((1, 3 * H)),
            _full_spec((H, 3 * H)), _full_spec((1, 3 * H)),
        ],
        out_specs=_full_spec((N, H)),
        scratch_shapes=[pltpu.VMEM((N, 3 * H), jnp.float32)],
    )
    return pl.pallas_call(
        _gru_kernel,
        grid_spec=grid_spec,
        out_shape=jax.ShapeDtypeStruct((N, H), jnp.float32),
        compiler_params=pltpu.CompilerParams(dimension_semantics=("arbitrary",)),
    )(src_ids, dst_ids, node_feats, p["w_i"], p["b_i"], p["w_h"], p["b_h"])


# ----------------------------------------------------------------------------
# 2. GraphTransformer layer kernel (MHA + LN + FFN + LN), row-tiled over the
#    query dimension; optionally fuses the SCN MLP on the final layer.
# ----------------------------------------------------------------------------
def _gt_layer_kernel(xq_ref, xkv_ref,
                     wq_ref, bq_ref, wk_ref, bk_ref, wv_ref, bv_ref,
                     wo_ref, bo_ref,
                     g1_ref, be1_ref, w1_ref, bf1_ref, w2_ref, bf2_ref,
                     g2_ref, be2_ref,
                     sw1_ref, sb1_ref, sw2_ref, sb2_ref,
                     out_ref, *, heads, apply_scn):
    xq = xq_ref[...]                                   # (bm, D) query rows
    xkv = xkv_ref[...]                                 # (N, D) full key/value rows
    D = xq.shape[-1]
    hd = D // heads
    scale = 1.0 / math.sqrt(hd)

    # fused full-width projections: one (·,D)x(D,D) matmul + one bias add each
    q = jnp.dot(xq, wq_ref[...], preferred_element_type=jnp.float32) + bq_ref[...]
    k = jnp.dot(xkv, wk_ref[...], preferred_element_type=jnp.float32) + bk_ref[...]
    v = jnp.dot(xkv, wv_ref[...], preferred_element_type=jnp.float32) + bv_ref[...]

    wo = wo_ref[...]
    attn = jnp.zeros(xq.shape, jnp.float32)
    for h in range(heads):                             # static head loop (slices only)
        lo, hi = h * hd, (h + 1) * hd
        qh = q[:, lo:hi]
        kh = k[:, lo:hi]
        vh = v[:, lo:hi]
        s = lax.dot_general(qh, kh, (((1,), (1,)), ((), ())),
                            preferred_element_type=jnp.float32) * scale
        s = s - jnp.max(s, axis=-1, keepdims=True)
        p = jnp.exp(s)
        p = p * pl.reciprocal(jnp.sum(p, axis=-1, keepdims=True), approx=True)
        oh = jnp.dot(p, vh, preferred_element_type=jnp.float32)
        attn = attn + jnp.dot(oh, wo[lo:hi, :], preferred_element_type=jnp.float32)
    attn = attn + bo_ref[...]

    x1 = _layer_norm(xq + attn, g1_ref[...], be1_ref[...])
    hid = jnp.maximum(
        jnp.dot(x1, w1_ref[...], preferred_element_type=jnp.float32) + bf1_ref[...],
        0.0)
    ffn = jnp.dot(hid, w2_ref[...], preferred_element_type=jnp.float32) + bf2_ref[...]
    y = _layer_norm(x1 + ffn, g2_ref[...], be2_ref[...])

    if apply_scn:
        # fused SCN: Linear -> ReLU -> Linear (row-wise, so it tiles freely)
        y = jnp.maximum(
            jnp.dot(y, sw1_ref[...], preferred_element_type=jnp.float32) + sb1_ref[...],
            0.0)
        y = jnp.dot(y, sw2_ref[...], preferred_element_type=jnp.float32) + sb2_ref[...]

    out_ref[...] = y


def gt_layer(x, lp, scn_p, *, heads, apply_scn, block_rows=128):
    N, D = x.shape
    F4 = lp["w1"].shape[1]
    bm = N if N <= block_rows else block_rows
    assert N % bm == 0, "row tile must divide num_nodes"
    grid = (N // bm,)

    kernel = functools.partial(_gt_layer_kernel, heads=heads, apply_scn=apply_scn)

    in_specs = [
        pl.BlockSpec((bm, D), lambda i: (i, 0)),       # query rows (tiled)
        _full_spec((N, D)),                            # full rows for K/V
        _full_spec((D, D)), _full_spec((1, D)),        # wq, bq
        _full_spec((D, D)), _full_spec((1, D)),        # wk, bk
        _full_spec((D, D)), _full_spec((1, D)),        # wv, bv
        _full_spec((D, D)), _full_spec((1, D)),        # wo, bo
        _full_spec((1, D)), _full_spec((1, D)),        # g1, be1
        _full_spec((D, F4)), _full_spec((1, F4)),      # w1, bf1
        _full_spec((F4, D)), _full_spec((1, D)),       # w2, bf2
        _full_spec((1, D)), _full_spec((1, D)),        # g2, be2
        _full_spec((D, D)), _full_spec((1, D)),        # scn w1, b1
        _full_spec((D, D)), _full_spec((1, D)),        # scn w2, b2
    ]
    out_specs = pl.BlockSpec((bm, D), lambda i: (i, 0))

    return pl.pallas_call(
        kernel,
        grid=grid,
        in_specs=in_specs,
        out_specs=out_specs,
        out_shape=jax.ShapeDtypeStruct((N, D), jnp.float32),
        compiler_params=pltpu.CompilerParams(dimension_semantics=("parallel",)),
    )(x, x,
      lp["wq"], lp["bq"], lp["wk"], lp["bk"], lp["wv"], lp["bv"],
      lp["wo"], lp["bo"], lp["g1"], lp["be1"], lp["w1"], lp["bf1"],
      lp["w2"], lp["bf2"], lp["g2"], lp["be2"],
      scn_p["w1"], scn_p["b1"], scn_p["w2"], scn_p["b2"])


# ----------------------------------------------------------------------------
# 3. EdgePredictor kernel: sigmoid(Linear(relu(Linear(cat[src,dst]))))
#    Candidate rows are gathered host-side into dense (C, D) operands; the
#    (2D -> D) linear is split into src/dst halves so no lane concat is needed.
# ----------------------------------------------------------------------------
def _edge_pred_kernel(es_ref, ed_ref, w1s_ref, w1d_ref, b1_ref, w2_ref, b2_ref,
                      out_ref):
    h = jnp.maximum(
        jnp.dot(es_ref[...], w1s_ref[...], preferred_element_type=jnp.float32)
        + jnp.dot(ed_ref[...], w1d_ref[...], preferred_element_type=jnp.float32)
        + b1_ref[...],
        0.0)
    logit = jnp.dot(h, w2_ref[...], preferred_element_type=jnp.float32) + b2_ref[...]
    out_ref[...] = jax.nn.sigmoid(logit)


def edge_predictor(src_emb, dst_emb, p):
    C, D = src_emb.shape
    return pl.pallas_call(
        _edge_pred_kernel,
        grid=(1,),
        in_specs=[
            _full_spec((C, D)), _full_spec((C, D)),
            _full_spec((D, D)), _full_spec((D, D)), _full_spec((1, D)),
            _full_spec((D, 1)), _full_spec((1, 1)),
        ],
        out_specs=_full_spec((C, 1)),
        out_shape=jax.ShapeDtypeStruct((C, 1), jnp.float32),
        compiler_params=pltpu.CompilerParams(dimension_semantics=("arbitrary",)),
    )(src_emb, dst_emb, p["w1_src"], p["w1_dst"], p["b1"], p["w2"], p["b2"])


# ----------------------------------------------------------------------------
# parameter init (deterministic, synthetic)
# ----------------------------------------------------------------------------
def init_params(key, input_dim, hidden_dim, heads, layers=2):
    keys = iter(jax.random.split(key, 128))

    def nrm(shape):
        return jax.random.normal(next(keys), shape, jnp.float32) * 0.1

    D = hidden_dim

    gru = dict(
        w_i=nrm((input_dim, 3 * D)), b_i=nrm((1, 3 * D)),
        w_h=nrm((D, 3 * D)), b_h=nrm((1, 3 * D)),
    )

    def make_layer():
        return dict(
            wq=nrm((D, D)), bq=nrm((1, D)),
            wk=nrm((D, D)), bk=nrm((1, D)),
            wv=nrm((D, D)), bv=nrm((1, D)),
            wo=nrm((D, D)), bo=nrm((1, D)),
            g1=jnp.ones((1, D), jnp.float32), be1=jnp.zeros((1, D), jnp.float32),
            w1=nrm((D, 4 * D)), bf1=nrm((1, 4 * D)),
            w2=nrm((4 * D, D)), bf2=nrm((1, D)),
            g2=jnp.ones((1, D), jnp.float32), be2=jnp.zeros((1, D), jnp.float32),
        )

    gt_layers = [make_layer() for _ in range(layers)]

    scn_p = dict(w1=nrm((D, D)), b1=nrm((1, D)), w2=nrm((D, D)), b2=nrm((1, D)))

    ep = dict(w1_src=nrm((D, D)), w1_dst=nrm((D, D)), b1=nrm((1, D)),
              w2=nrm((D, 1)), b2=nrm((1, 1)))

    return dict(gru=gru, gt_layers=gt_layers, scn=scn_p, edge_pred=ep)


# ----------------------------------------------------------------------------
# full GT_TGN forward (edge list is assumed already sorted by timestamp)
# ----------------------------------------------------------------------------
def gt_tgn_forward(params, node_features, edge_src, edge_dst, cand_src, cand_dst,
                   *, heads):
    memory = gru_memory_update(node_features, edge_src, edge_dst, params["gru"])
    x = memory
    layers = params["gt_layers"]
    for li, lp in enumerate(layers):
        # SCN is fused into the final GT-layer kernel (saves one HBM round trip)
        x = gt_layer(x, lp, params["scn"], heads=heads,
                     apply_scn=(li == len(layers) - 1))
    src_emb = jnp.take(x, cand_src, axis=0)
    dst_emb = jnp.take(x, cand_dst, axis=0)
    preds = edge_predictor(src_emb, dst_emb, params["edge_pred"])
    return preds[:, 0]        # matches torch.stack(preds).squeeze() -> (C,)


if __name__ == "__main__":
    NUM_NODES = 16
    FEATURE_DIM = 3
    HIDDEN = 32
    HEADS = 4
    NUM_EDGES = 8

    key = jax.random.PRNGKey(0)
    k_feat, k_src, k_dst, k_params = jax.random.split(key, 4)

    node_feats = jax.random.normal(k_feat, (NUM_NODES, FEATURE_DIM), jnp.float32)
    edge_src = jax.random.randint(k_src, (NUM_EDGES,), 0, NUM_NODES, dtype=jnp.int32)
    edge_dst = jax.random.randint(k_dst, (NUM_EDGES,), 0, NUM_NODES, dtype=jnp.int32)

    edge_candidates = [(1, 2), (3, 4), (5, 10)]
    cand_src = jnp.array([c[0] for c in edge_candidates], jnp.int32)
    cand_dst = jnp.array([c[1] for c in edge_candidates], jnp.int32)

    params = init_params(k_params, FEATURE_DIM, HIDDEN, HEADS, layers=2)

    forward = jax.jit(gt_tgn_forward, static_argnames=("heads",))
    preds = forward(params, node_feats, edge_src, edge_dst, cand_src, cand_dst,
                    heads=HEADS)
    preds = jax.block_until_ready(preds)
    assert preds.shape == (len(edge_candidates),)
    print("KERNEL_OK")
</pallas_src>

<mosaic_0001>
module attributes {stable_mosaic.version = 11 : i64} {
  func.func @_gru_kernel(%arg0: i32, %arg1: memref<8xi32, #tpu.memory_space<smem>>, %arg2: memref<8xi32, #tpu.memory_space<smem>>, %arg3: memref<16x3xf32, #tpu.memory_space<vmem>>, %arg4: memref<3x96xf32, #tpu.memory_space<vmem>>, %arg5: memref<1x96xf32, #tpu.memory_space<vmem>>, %arg6: memref<32x96xf32, #tpu.memory_space<vmem>>, %arg7: memref<1x96xf32, #tpu.memory_space<vmem>>, %arg8: memref<16x32xf32, #tpu.memory_space<vmem>>, %arg9: memref<16x96xf32, #tpu.memory_space<vmem>>) attributes {dimension_semantics = [#tpu.dimension_semantics<arbitrary>], iteration_bounds = array<i64: 1>, scalar_prefetch = 2 : i64, scratch_operands = 1 : i64, tpu.core_type = #tpu.core_type<tc>, window_params = [{pipeline_mode = #tpu.pipeline_mode<synchronous>, transform_indices = @transform_0, window_bounds = array<i64: 16, 3>}, {pipeline_mode = #tpu.pipeline_mode<synchronous>, transform_indices = @transform_1, window_bounds = array<i64: 3, 96>}, {pipeline_mode = #tpu.pipeline_mode<synchronous>, transform_indices = @transform_2, window_bounds = array<i64: 1, 96>}, {pipeline_mode = #tpu.pipeline_mode<synchronous>, transform_indices = @transform_3, window_bounds = array<i64: 32, 96>}, {pipeline_mode = #tpu.pipeline_mode<synchronous>, transform_indices = @transform_4, window_bounds = array<i64: 1, 96>}, {pipeline_mode = #tpu.pipeline_mode<synchronous>, transform_indices = @transform_5, window_bounds = array<i64: 16, 32>}]} {
    %cst = arith.constant 0.000000e+00 : f32
    %0 = vector.broadcast %cst : f32 to vector<16x32xf32>
    %c0 = arith.constant 0 : index
    %c0_0 = arith.constant 0 : index
    %1 = vector.load %arg8[%c0, %c0_0] : memref<16x32xf32, #tpu.memory_space<vmem>>, vector<16x32xf32>
    tpu.vector_store %arg8[%c0, %c0_0], %0 {strides = array<i32>} : memref<16x32xf32, #tpu.memory_space<vmem>>, vector<16x32xf32>,
    %c0_1 = arith.constant 0 : index
    %c0_2 = arith.constant 0 : index
    %2 = vector.load %arg3[%c0_1, %c0_2] : memref<16x3xf32, #tpu.memory_space<vmem>>, vector<16x3xf32>
    %c0_3 = arith.constant 0 : index
    %c0_4 = arith.constant 0 : index
    %3 = vector.load %arg4[%c0_3, %c0_4] : memref<3x96xf32, #tpu.memory_space<vmem>>, vector<3x96xf32>
    %cst_5 = arith.constant dense<0.000000e+00> : vector<16x96xf32>
    %4 = tpu.matmul %2, %3, %cst_5 {dimension_numbers = #tpu.dot_dimension_numbers<[1], [0], [0], [1], [0, 0, 1, 1], [], []>} : vector<16x3xf32>, vector<3x96xf32>, vector<16x96xf32> -> vector<16x96xf32>
    %c0_6 = arith.constant 0 : index
    %c0_7 = arith.constant 0 : index
    %5 = vector.load %arg5[%c0_6, %c0_7] : memref<1x96xf32, #tpu.memory_space<vmem>>, vector<1x96xf32>
    %6 = vector.broadcast %5 : vector<1x96xf32> to vector<16x96xf32>
    %7 = arith.addf %4, %6 : vector<16x96xf32>
    %c0_8 = arith.constant 0 : index
    %c0_9 = arith.constant 0 : index
    %8 = vector.load %arg9[%c0_8, %c0_9] : memref<16x96xf32, #tpu.memory_space<vmem>>, vector<16x96xf32>
    tpu.vector_store %arg9[%c0_8, %c0_9], %7 {strides = array<i32>} : memref<16x96xf32, #tpu.memory_space<vmem>>, vector<16x96xf32>,
    %c0_10 = arith.constant 0 : index
    %c0_11 = arith.constant 0 : index
    %9 = vector.load %arg6[%c0_10, %c0_11] : memref<32x96xf32, #tpu.memory_space<vmem>>, vector<32x96xf32>
    %c0_12 = arith.constant 0 : index
    %c0_13 = arith.constant 0 : index
    %10 = vector.load %arg7[%c0_12, %c0_13] : memref<1x96xf32, #tpu.memory_space<vmem>>, vector<1x96xf32>
    %c0_i32 = arith.constant 0 : i32
    %c8_i32 = arith.constant 8 : i32
    %11 = arith.addi %c0_i32, %c8_i32 : i32
    %c1_i32 = arith.constant 1 : i32
    scf.for %arg10 = %c0_i32 to %11 step %c1_i32  : i32 {
      %12 = arith.index_cast %arg10 : i32 to index
      %13 = memref.load %arg1[%12] : memref<8xi32, #tpu.memory_space<smem>>
      %14 = arith.index_cast %arg10 : i32 to index
      %15 = memref.load %arg2[%14] : memref<8xi32, #tpu.memory_space<smem>>
      %16 = arith.index_cast %15 : i32 to index
      %c0_15 = arith.constant 0 : index
      %17 = vector.load %arg8[%16, %c0_15] : memref<16x32xf32, #tpu.memory_space<vmem>>, vector<1x32xf32>
      %18 = arith.index_cast %13 : i32 to index
      %c0_16 = arith.constant 0 : index
      %19 = vector.load %arg9[%18, %c0_16] : memref<16x96xf32, #tpu.memory_space<vmem>>, vector<1x96xf32>
      %cst_17 = arith.constant dense<0.000000e+00> : vector<1x96xf32>
      %20 = tpu.matmul %17, %9, %cst_17 {dimension_numbers = #tpu.dot_dimension_numbers<[1], [0], [0], [1], [0, 0, 1, 1], [], []>} : vector<1x32xf32>, vector<32x96xf32>, vector<1x96xf32> -> vector<1x96xf32>
      %21 = arith.addf %20, %10 : vector<1x96xf32>
      %22 = vector.extract_strided_slice %19 {offsets = [0, 0], sizes = [1, 32], strides = [1, 1]} : vector<1x96xf32> to vector<1x32xf32>
      %23 = vector.extract_strided_slice %21 {offsets = [0, 0], sizes = [1, 32], strides = [1, 1]} : vector<1x96xf32> to vector<1x32xf32>
      %24 = arith.addf %22, %23 : vector<1x32xf32>
      %25 = arith.negf %24 : vector<1x32xf32>
      %26 = math.exp %25 : vector<1x32xf32>
      %cst_18 = arith.constant 1.000000e+00 : f32
      %27 = vector.broadcast %cst_18 : f32 to vector<1x32xf32>
      %28 = arith.addf %27, %26 : vector<1x32xf32>
      %29 = arith.divf %27, %28 : vector<1x32xf32>
      %30 = vector.extract_strided_slice %19 {offsets = [0, 32], sizes = [1, 32], strides = [1, 1]} : vector<1x96xf32> to vector<1x32xf32>
      %31 = vector.extract_strided_slice %21 {offsets = [0, 32], sizes = [1, 32], strides = [1, 1]} : vector<1x96xf32> to vector<1x32xf32>
      %32 = arith.addf %30, %31 : vector<1x32xf32>
      %33 = arith.negf %32 : vector<1x32xf32>
      %34 = math.exp %33 : vector<1x32xf32>
      %cst_19 = arith.constant 1.000000e+00 : f32
      %35 = vector.broadcast %cst_19 : f32 to vector<1x32xf32>
      %36 = arith.addf %35, %34 : vector<1x32xf32>
      %37 = arith.divf %35, %36 : vector<1x32xf32>
      %38 = vector.extract_strided_slice %19 {offsets = [0, 64], sizes = [1, 32], strides = [1, 1]} : vector<1x96xf32> to vector<1x32xf32>
      %39 = vector.extract_strided_slice %21 {offsets = [0, 64], sizes = [1, 32], strides = [1, 1]} : vector<1x96xf32> to vector<1x32xf32>
      %40 = arith.mulf %29, %39 : vector<1x32xf32>
      %41 = arith.addf %38, %40 : vector<1x32xf32>
      %42 = math.tanh %41 : vector<1x32xf32>
      %cst_20 = arith.constant 1.000000e+00 : f32
      %43 = vector.broadcast %cst_20 : f32 to vector<1x32xf32>
      %44 = arith.subf %43, %37 : vector<1x32xf32>
      %45 = arith.mulf %44, %42 : vector<1x32xf32>
      %46 = arith.mulf %37, %17 : vector<1x32xf32>
      %47 = arith.addf %45, %46 : vector<1x32xf32>
      %48 = arith.index_cast %15 : i32 to index
      %c0_21 = arith.constant 0 : index
      %49 = vector.load %arg8[%48, %c0_21] : memref<16x32xf32, #tpu.memory_space<vmem>>, vector<1x32xf32>
      tpu.vector_store %arg8[%48, %c0_21], %47 {strides = array<i32>} : memref<16x32xf32, #tpu.memory_space<vmem>>, vector<1x32xf32>,
    }
    %c8_i32_14 = arith.constant 8 : i32
    return
  }
  func.func @transform_0(%arg0: i32, %arg1: memref<8xi32, #tpu.memory_space<smem>>, %arg2: memref<8xi32, #tpu.memory_space<smem>>) -> (i32, i32) {
    %c0_i32 = arith.constant 0 : i32
    %c0_i32_0 = arith.constant 0 : i32
    %c0_i32_1 = arith.constant 0 : i32
    return %c0_i32, %c0_i32_0 : i32, i32
  }
  func.func @transform_1(%arg0: i32, %arg1: memref<8xi32, #tpu.memory_space<smem>>, %arg2: memref<8xi32, #tpu.memory_space<smem>>) -> (i32, i32) {
    %c0_i32 = arith.constant 0 : i32
    %c0_i32_0 = arith.constant 0 : i32
    %c0_i32_1 = arith.constant 0 : i32
    return %c0_i32, %c0_i32_0 : i32, i32
  }
  func.func @transform_2(%arg0: i32, %arg1: memref<8xi32, #tpu.memory_space<smem>>, %arg2: memref<8xi32, #tpu.memory_space<smem>>) -> (i32, i32) {
    %c0_i32 = arith.constant 0 : i32
    %c0_i32_0 = arith.constant 0 : i32
    %c0_i32_1 = arith.constant 0 : i32
    return %c0_i32, %c0_i32_0 : i32, i32
  }
  func.func @transform_3(%arg0: i32, %arg1: memref<8xi32, #tpu.memory_space<smem>>, %arg2: memref<8xi32, #tpu.memory_space<smem>>) -> (i32, i32) {
    %c0_i32 = arith.constant 0 : i32
    %c0_i32_0 = arith.constant 0 : i32
    %c0_i32_1 = arith.constant 0 : i32
    return %c0_i32, %c0_i32_0 : i32, i32
  }
  func.func @transform_4(%arg0: i32, %arg1: memref<8xi32, #tpu.memory_space<smem>>, %arg2: memref<8xi32, #tpu.memory_space<smem>>) -> (i32, i32) {
    %c0_i32 = arith.constant 0 : i32
    %c0_i32_0 = arith.constant 0 : i32
    %c0_i32_1 = arith.constant 0 : i32
    return %c0_i32, %c0_i32_0 : i32, i32
  }
  func.func @transform_5(%arg0: i32, %arg1: memref<8xi32, #tpu.memory_space<smem>>, %arg2: memref<8xi32, #tpu.memory_space<smem>>) -> (i32, i32) {
    %c0_i32 = arith.constant 0 : i32
    %c0_i32_0 = arith.constant 0 : i32
    %c0_i32_1 = arith.constant 0 : i32
    return %c0_i32, %c0_i32_0 : i32, i32
  }
}

module attributes {stable_mosaic.version = 11 : i64} {
  func.func @_gt_layer_kernel(%arg0: i32, %arg1: memref<16x32xf32, #tpu.memory_space<vmem>>, %arg2: memref<16x32xf32, #tpu.memory_space<vmem>>, %arg3: memref<32x32xf32, #tpu.memory_space<vmem>>, %arg4: memref<1x32xf32, #tpu.memory_space<vmem>>, %arg5: memref<32x32xf32, #tpu.memory_space<vmem>>, %arg6: memref<1x32xf32, #tpu.memory_space<vmem>>, %arg7: memref<32x32xf32, #tpu.memory_space<vmem>>, %arg8: memref<1x32xf32, #tpu.memory_space<vmem>>, %arg9: memref<32x32xf32, #tpu.memory_space<vmem>>, %arg10: memref<1x32xf32, #tpu.memory_space<vmem>>, %arg11: memref<1x32xf32, #tpu.memory_space<vmem>>, %arg12: memref<1x32xf32, #tpu.memory_space<vmem>>, %arg13: memref<32x128xf32, #tpu.memory_space<vmem>>, %arg14: memref<1x128xf32, #tpu.memory_space<vmem>>, %arg15: memref<128x32xf32, #tpu.memory_space<vmem>>, %arg16: memref<1x32xf32, #tpu.memory_space<vmem>>, %arg17: memref<1x32xf32, #tpu.memory_space<vmem>>, %arg18: memref<1x32xf32, #tpu.memory_space<vmem>>, %arg19: memref<32x32xf32, #tpu.memory_space<vmem>>, %arg20: memref<1x32xf32, #tpu.memory_space<vmem>>, %arg21: memref<32x32xf32, #tpu.memory_space<vmem>>, %arg22: memref<1x32xf32, #tpu.memory_space<vmem>>, %arg23: memref<16x32xf32, #tpu.memory_space<vmem>>) attributes {dimension_semantics = [#tpu.dimension_semantics<parallel>], iteration_bounds = array<i64: 1>, scalar_prefetch = 0 : i64, scratch_operands = 0 : i64, tpu.core_type = #tpu.core_type<tc>, window_params = [{transform_indices = @transform_0, window_bounds = array<i64: 16, 32>}, {pipeline_mode = #tpu.pipeline_mode<synchronous>, transform_indices = @transform_1, window_bounds = array<i64: 16, 32>}, {pipeline_mode = #tpu.pipeline_mode<synchronous>, transform_indices = @transform_2, window_bounds = array<i64: 32, 32>}, {pipeline_mode = #tpu.pipeline_mode<synchronous>, transform_indices = @transform_3, window_bounds = array<i64: 1, 32>}, {pipeline_mode = #tpu.pipeline_mode<synchronous>, transform_indices = @transform_4, window_bounds = array<i64: 32, 32>}, {pipeline_mode = #tpu.pipeline_mode<synchronous>, transform_indices = @transform_5, window_bounds = array<i64: 1, 32>}, {pipeline_mode = #tpu.pipeline_mode<synchronous>, transform_indices = @transform_6, window_bounds = array<i64: 32, 32>}, {pipeline_mode = #tpu.pipeline_mode<synchronous>, transform_indices = @transform_7, window_bounds = array<i64: 1, 32>}, {pipeline_mode = #tpu.pipeline_mode<synchronous>, transform_indices = @transform_8, window_bounds = array<i64: 32, 32>}, {pipeline_mode = #tpu.pipeline_mode<synchronous>, transform_indices = @transform_9, window_bounds = array<i64: 1, 32>}, {pipeline_mode = #tpu.pipeline_mode<synchronous>, transform_indices = @transform_10, window_bounds = array<i64: 1, 32>}, {pipeline_mode = #tpu.pipeline_mode<synchronous>, transform_indices = @transform_11, window_bounds = array<i64: 1, 32>}, {pipeline_mode = #tpu.pipeline_mode<synchronous>, transform_indices = @transform_12, window_bounds = array<i64: 32, 128>}, {pipeline_mode = #tpu.pipeline_mode<synchronous>, transform_indices = @transform_13, window_bounds = array<i64: 1, 128>}, {pipeline_mode = #tpu.pipeline_mode<synchronous>, transform_indices = @transform_14, window_bounds = array<i64: 128, 32>}, {pipeline_mode = #tpu.pipeline_mode<synchronous>, transform_indices = @transform_15, window_bounds = array<i64: 1, 32>}, {pipeline_mode = #tpu.pipeline_mode<synchronous>, transform_indices = @transform_16, window_bounds = array<i64: 1, 32>}, {pipeline_mode = #tpu.pipeline_mode<synchronous>, transform_indices = @transform_17, window_bounds = array<i64: 1, 32>}, {pipeline_mode = #tpu.pipeline_mode<synchronous>, transform_indices = @transform_18, window_bounds = array<i64: 32, 32>}, {pipeline_mode = #tpu.pipeline_mode<synchronous>, transform_indices = @transform_19, window_bounds = array<i64: 1, 32>}, {pipeline_mode = #tpu.pipeline_mode<synchronous>, transform_indices = @transform_20, window_bounds = array<i64: 32, 32>}, {pipeline_mode = #tpu.pipeline_mode<synchronous>, transform_indices = @transform_21, window_bounds = array<i64: 1, 32>}, {transform_indices = @transform_22, window_bounds = array<i64: 16, 32>}]} {
    %c0 = arith.constant 0 : index
    %c0_0 = arith.constant 0 : index
    %0 = vector.load %arg1[%c0, %c0_0] : memref<16x32xf32, #tpu.memory_space<vmem>>, vector<16x32xf32>
    %c0_1 = arith.constant 0 : index
    %c0_2 = arith.constant 0 : index
    %1 = vector.load %arg2[%c0_1, %c0_2] : memref<16x32xf32, #tpu.memory_space<vmem>>, vector<16x32xf32>
    %c0_3 = arith.constant 0 : index
    %c0_4 = arith.constant 0 : index
    %2 = vector.load %arg3[%c0_3, %c0_4] : memref<32x32xf32, #tpu.memory_space<vmem>>, vector<32x32xf32>
    %cst = arith.constant dense<0.000000e+00> : vector<16x32xf32>
    %3 = tpu.matmul %0, %2, %cst {dimension_numbers = #tpu.dot_dimension_numbers<[1], [0], [0], [1], [0, 0, 1, 1], [], []>} : vector<16x32xf32>, vector<32x32xf32>, vector<16x32xf32> -> vector<16x32xf32>
    %c0_5 = arith.constant 0 : index
    %c0_6 = arith.constant 0 : index
    %4 = vector.load %arg4[%c0_5, %c0_6] : memref<1x32xf32, #tpu.memory_space<vmem>>, vector<1x32xf32>
    %5 = vector.broadcast %4 : vector<1x32xf32> to vector<16x32xf32>
    %6 = arith.addf %3, %5 : vector<16x32xf32>
    %c0_7 = arith.constant 0 : index
    %c0_8 = arith.constant 0 : index
    %7 = vector.load %arg5[%c0_7, %c0_8] : memref<32x32xf32, #tpu.memory_space<vmem>>, vector<32x32xf32>
    %cst_9 = arith.constant dense<0.000000e+00> : vector<16x32xf32>
    %8 = tpu.matmul %1, %7, %cst_9 {dimension_numbers = #tpu.dot_dimension_numbers<[1], [0], [0], [1], [0, 0, 1, 1], [], []>} : vector<16x32xf32>, vector<32x32xf32>, vector<16x32xf32> -> vector<16x32xf32>
    %c0_10 = arith.constant 0 : index
    %c0_11 = arith.constant 0 : index
    %9 = vector.load %arg6[%c0_10, %c0_11] : memref<1x32xf32, #tpu.memory_space<vmem>>, vector<1x32xf32>
    %10 = vector.broadcast %9 : vector<1x32xf32> to vector<16x32xf32>
    %11 = arith.addf %8, %10 : vector<16x32xf32>
    %c0_12 = arith.constant 0 : index
    %c0_13 = arith.constant 0 : index
    %12 = vector.load %arg7[%c0_12, %c0_13] : memref<32x32xf32, #tpu.memory_space<vmem>>, vector<32x32xf32>
    %cst_14 = arith.constant dense<0.000000e+00> : vector<16x32xf32>
    %13 = tpu.matmul %1, %12, %cst_14 {dimension_numbers = #tpu.dot_dimension_numbers<[1], [0], [0], [1], [0, 0, 1, 1], [], []>} : vector<16x32xf32>, vector<32x32xf32>, vector<16x32xf32> -> vector<16x32xf32>
    %c0_15 = arith.constant 0 : index
    %c0_16 = arith.constant 0 : index
    %14 = vector.load %arg8[%c0_15, %c0_16] : memref<1x32xf32, #tpu.memory_space<vmem>>, vector<1x32xf32>
    %15 = vector.broadcast %14 : vector<1x32xf32> to vector<16x32xf32>
    %16 = arith.addf %13, %15 : vector<16x32xf32>
    %c0_17 = arith.constant 0 : index
    %c0_18 = arith.constant 0 : index
    %17 = vector.load %arg9[%c0_17, %c0_18] : memref<32x32xf32, #tpu.memory_space<vmem>>, vector<32x32xf32>
    %cst_19 = arith.constant 0.000000e+00 : f32
    %18 = vector.broadcast %cst_19 : f32 to vector<16x32xf32>
    %19 = vector.extract_strided_slice %6 {offsets = [0, 0], sizes = [16, 8], strides = [1, 1]} : vector<16x32xf32> to vector<16x8xf32>
    %20 = vector.extract_strided_slice %11 {offsets = [0, 0], sizes = [16, 8], strides = [1, 1]} : vector<16x32xf32> to vector<16x8xf32>
    %21 = vector.extract_strided_slice %16 {offsets = [0, 0], sizes = [16, 8], strides = [1, 1]} : vector<16x32xf32> to vector<16x8xf32>
    %cst_20 = arith.constant dense<0.000000e+00> : vector<16x16xf32>
    %22 = tpu.matmul %19, %20, %cst_20 {dimension_numbers = #tpu.dot_dimension_numbers<[1], [1], [0], [0], [0, 0, 1, 0], [], []>} : vector<16x8xf32>, vector<16x8xf32>, vector<16x16xf32> -> vector<16x16xf32>
    %cst_21 = arith.constant 0.353553385 : f32
    %23 = vector.broadcast %cst_21 : f32 to vector<16x16xf32>
    %24 = arith.mulf %22, %23 : vector<16x16xf32>
    %cst_22 = arith.constant dense<0xFF800000> : vector<16xf32>
    %25 = vector.multi_reduction <maximumf>, %24, %cst_22 [1] : vector<16x16xf32> to vector<16xf32>
    %26 = vector.shape_cast %25 : vector<16xf32> to vector<16x1xf32>
    %27 = vector.broadcast %26 : vector<16x1xf32> to vector<16x16xf32>
    %28 = arith.subf %24, %27 : vector<16x16xf32>
    %29 = math.exp %28 : vector<16x16xf32>
    %cst_23 = arith.constant dense<0.000000e+00> : vector<16xf32>
    %30 = vector.multi_reduction <add>, %29, %cst_23 [1] : vector<16x16xf32> to vector<16xf32>
    %31 = vector.shape_cast %30 : vector<16xf32> to vector<16x1xf32>
    %32 = tpu.reciprocal %31 {approx = true} : vector<16x1xf32> -> vector<16x1xf32>
    %33 = vector.broadcast %32 : vector<16x1xf32> to vector<16x16xf32>
    %34 = arith.mulf %29, %33 : vector<16x16xf32>
    %cst_24 = arith.constant dense<0.000000e+00> : vector<16x8xf32>
    %35 = tpu.matmul %34, %21, %cst_24 {dimension_numbers = #tpu.dot_dimension_numbers<[1], [0], [0], [1], [0, 0, 1, 1], [], []>} : vector<16x16xf32>, vector<16x8xf32>, vector<16x8xf32> -> vector<16x8xf32>
    %36 = vector.extract_strided_slice %17 {offsets = [0, 0], sizes = [8, 32], strides = [1, 1]} : vector<32x32xf32> to vector<8x32xf32>
    %cst_25 = arith.constant dense<0.000000e+00> : vector<16x32xf32>
    %37 = tpu.matmul %35, %36, %cst_25 {dimension_numbers = #tpu.dot_dimension_numbers<[1], [0], [0], [1], [0, 0, 1, 1], [], []>} : vector<16x8xf32>, vector<8x32xf32>, vector<16x32xf32> -> vector<16x32xf32>
    %38 = arith.addf %18, %37 : vector<16x32xf32>
    %39 = vector.extract_strided_slice %6 {offsets = [0, 8], sizes = [16, 8], strides = [1, 1]} : vector<16x32xf32> to vector<16x8xf32>
    %40 = vector.extract_strided_slice %11 {offsets = [0, 8], sizes = [16, 8], strides = [1, 1]} : vector<16x32xf32> to vector<16x8xf32>
    %41 = vector.extract_strided_slice %16 {offsets = [0, 8], sizes = [16, 8], strides = [1, 1]} : vector<16x32xf32> to vector<16x8xf32>
    %cst_26 = arith.constant dense<0.000000e+00> : vector<16x16xf32>
    %42 = tpu.matmul %39, %40, %cst_26 {dimension_numbers = #tpu.dot_dimension_numbers<[1], [1], [0], [0], [0, 0, 1, 0], [], []>} : vector<16x8xf32>, vector<16x8xf32>, vector<16x16xf32> -> vector<16x16xf32>
    %cst_27 = arith.constant 0.353553385 : f32
    %43 = vector.broadcast %cst_27 : f32 to vector<16x16xf32>
    %44 = arith.mulf %42, %43 : vector<16x16xf32>
    %cst_28 = arith.constant dense<0xFF800000> : vector<16xf32>
    %45 = vector.multi_reduction <maximumf>, %44, %cst_28 [1] : vector<16x16xf32> to vector<16xf32>
    %46 = vector.shape_cast %45 : vector<16xf32> to vector<16x1xf32>
    %47 = vector.broadcast %46 : vector<16x1xf32> to vector<16x16xf32>
    %48 = arith.subf %44, %47 : vector<16x16xf32>
    %49 = math.exp %48 : vector<16x16xf32>
    %cst_29 = arith.constant dense<0.000000e+00> : vector<16xf32>
    %50 = vector.multi_reduction <add>, %49, %cst_29 [1] : vector<16x16xf32> to vector<16xf32>
    %51 = vector.shape_cast %50 : vector<16xf32> to vector<16x1xf32>
    %52 = tpu.reciprocal %51 {approx = true} : vector<16x1xf32> -> vector<16x1xf32>
    %53 = vector.broadcast %52 : vector<16x1xf32> to vector<16x16xf32>
    %54 = arith.mulf %49, %53 : vector<16x16xf32>
    %cst_30 = arith.constant dense<0.000000e+00> : vector<16x8xf32>
    %55 = tpu.matmul %54, %41, %cst_30 {dimension_numbers = #tpu.dot_dimension_numbers<[1], [0], [0], [1], [0, 0, 1, 1], [], []>} : vector<16x16xf32>, vector<16x8xf32>, vector<16x8xf32> -> vector<16x8xf32>
    %56 = vector.extract_strided_slice %17 {offsets = [8, 0], sizes = [8, 32], strides = [1, 1]} : vector<32x32xf32> to vector<8x32xf32>
    %cst_31 = arith.constant dense<0.000000e+00> : vector<16x32xf32>
    %57 = tpu.matmul %55, %56, %cst_31 {dimension_numbers = #tpu.dot_dimension_numbers<[1], [0], [0], [1], [0, 0, 1, 1], [], []>} : vector<16x8xf32>, vector<8x32xf32>, vector<16x32xf32> -> vector<16x32xf32>
    %58 = arith.addf %38, %57 : vector<16x32xf32>
    %59 = vector.extract_strided_slice %6 {offsets = [0, 16], sizes = [16, 8], strides = [1, 1]} : vector<16x32xf32> to vector<16x8xf32>
    %60 = vector.extract_strided_slice %11 {offsets = [0, 16], sizes = [16, 8], strides = [1, 1]} : vector<16x32xf32> to vector<16x8xf32>
    %61 = vector.extract_strided_slice %16 {offsets = [0, 16], sizes = [16, 8], strides = [1, 1]} : vector<16x32xf32> to vector<16x8xf32>
    %cst_32 = arith.constant dense<0.000000e+00> : vector<16x16xf32>
    %62 = tpu.matmul %59, %60, %cst_32 {dimension_numbers = #tpu.dot_dimension_numbers<[1], [1], [0], [0], [0, 0, 1, 0], [], []>} : vector<16x8xf32>, vector<16x8xf32>, vector<16x16xf32> -> vector<16x16xf32>
    %cst_33 = arith.constant 0.353553385 : f32
    %63 = vector.broadcast %cst_33 : f32 to vector<16x16xf32>
    %64 = arith.mulf %62, %63 : vector<16x16xf32>
    %cst_34 = arith.constant dense<0xFF800000> : vector<16xf32>
    %65 = vector.multi_reduction <maximumf>, %64, %cst_34 [1] : vector<16x16xf32> to vector<16xf32>
    %66 = vector.shape_cast %65 : vector<16xf32> to vector<16x1xf32>
    %67 = vector.broadcast %66 : vector<16x1xf32> to vector<16x16xf32>
    %68 = arith.subf %64, %67 : vector<16x16xf32>
    %69 = math.exp %68 : vector<16x16xf32>
    %cst_35 = arith.constant dense<0.000000e+00> : vector<16xf32>
    %70 = vector.multi_reduction <add>, %69, %cst_35 [1] : vector<16x16xf32> to vector<16xf32>
    %71 = vector.shape_cast %70 : vector<16xf32> to vector<16x1xf32>
    %72 = tpu.reciprocal %71 {approx = true} : vector<16x1xf32> -> vector<16x1xf32>
    %73 = vector.broadcast %72 : vector<16x1xf32> to vector<16x16xf32>
    %74 = arith.mulf %69, %73 : vector<16x16xf32>
    %cst_36 = arith.constant dense<0.000000e+00> : vector<16x8xf32>
    %75 = tpu.matmul %74, %61, %cst_36 {dimension_numbers = #tpu.dot_dimension_numbers<[1], [0], [0], [1], [0, 0, 1, 1], [], []>} : vector<16x16xf32>, vector<16x8xf32>, vector<16x8xf32> -> vector<16x8xf32>
    %76 = vector.extract_strided_slice %17 {offsets = [16, 0], sizes = [8, 32], strides = [1, 1]} : vector<32x32xf32> to vector<8x32xf32>
    %cst_37 = arith.constant dense<0.000000e+00> : vector<16x32xf32>
    %77 = tpu.matmul %75, %76, %cst_37 {dimension_numbers = #tpu.dot_dimension_numbers<[1], [0], [0], [1], [0, 0, 1, 1], [], []>} : vector<16x8xf32>, vector<8x32xf32>, vector<16x32xf32> -> vector<16x32xf32>
    %78 = arith.addf %58, %77 : vector<16x32xf32>
    %79 = vector.extract_strided_slice %6 {offsets = [0, 24], sizes = [16, 8], strides = [1, 1]} : vector<16x32xf32> to vector<16x8xf32>
    %80 = vector.extract_strided_slice %11 {offsets = [0, 24], sizes = [16, 8], strides = [1, 1]} : vector<16x32xf32> to vector<16x8xf32>
    %81 = vector.extract_strided_slice %16 {offsets = [0, 24], sizes = [16, 8], strides = [1, 1]} : vector<16x32xf32> to vector<16x8xf32>
    %cst_38 = arith.constant dense<0.000000e+00> : vector<16x16xf32>
    %82 = tpu.matmul %79, %80, %cst_38 {dimension_numbers = #tpu.dot_dimension_numbers<[1], [1], [0], [0], [0, 0, 1, 0], [], []>} : vector<16x8xf32>, vector<16x8xf32>, vector<16x16xf32> -> vector<16x16xf32>
    %cst_39 = arith.constant 0.353553385 : f32
    %83 = vector.broadcast %cst_39 : f32 to vector<16x16xf32>
    %84 = arith.mulf %82, %83 : vector<16x16xf32>
    %cst_40 = arith.constant dense<0xFF800000> : vector<16xf32>
    %85 = vector.multi_reduction <maximumf>, %84, %cst_40 [1] : vector<16x16xf32> to vector<16xf32>
    %86 = vector.shape_cast %85 : vector<16xf32> to vector<16x1xf32>
    %87 = vector.broadcast %86 : vector<16x1xf32> to vector<16x16xf32>
    %88 = arith.subf %84, %87 : vector<16x16xf32>
    %89 = math.exp %88 : vector<16x16xf32>
    %cst_41 = arith.constant dense<0.000000e+00> : vector<16xf32>
    %90 = vector.multi_reduction <add>, %89, %cst_41 [1] : vector<16x16xf32> to vector<16xf32>
    %91 = vector.shape_cast %90 : vector<16xf32> to vector<16x1xf32>
    %92 = tpu.reciprocal %91 {approx = true} : vector<16x1xf32> -> vector<16x1xf32>
    %93 = vector.broadcast %92 : vector<16x1xf32> to vector<16x16xf32>
    %94 = arith.mulf %89, %93 : vector<16x16xf32>
    %cst_42 = arith.constant dense<0.000000e+00> : vector<16x8xf32>
    %95 = tpu.matmul %94, %81, %cst_42 {dimension_numbers = #tpu.dot_dimension_numbers<[1], [0], [0], [1], [0, 0, 1, 1], [], []>} : vector<16x16xf32>, vector<16x8xf32>, vector<16x8xf32> -> vector<16x8xf32>
    %96 = vector.extract_strided_slice %17 {offsets = [24, 0], sizes = [8, 32], strides = [1, 1]} : vector<32x32xf32> to vector<8x32xf32>
    %cst_43 = arith.constant dense<0.000000e+00> : vector<16x32xf32>
    %97 = tpu.matmul %95, %96, %cst_43 {dimension_numbers = #tpu.dot_dimension_numbers<[1], [0], [0], [1], [0, 0, 1, 1], [], []>} : vector<16x8xf32>, vector<8x32xf32>, vector<16x32xf32> -> vector<16x32xf32>
    %98 = arith.addf %78, %97 : vector<16x32xf32>
    %c0_44 = arith.constant 0 : index
    %c0_45 = arith.constant 0 : index
    %99 = vector.load %arg10[%c0_44, %c0_45] : memref<1x32xf32, #tpu.memory_space<vmem>>, vector<1x32xf32>
    %100 = vector.broadcast %99 : vector<1x32xf32> to vector<16x32xf32>
    %101 = arith.addf %98, %100 : vector<16x32xf32>
    %102 = arith.addf %0, %101 : vector<16x32xf32>
    %c0_46 = arith.constant 0 : index
    %c0_47 = arith.constant 0 : index
    %103 = vector.load %arg11[%c0_46, %c0_47] : memref<1x32xf32, #tpu.memory_space<vmem>>, vector<1x32xf32>
    %c0_48 = arith.constant 0 : index
    %c0_49 = arith.constant 0 : index
    %104 = vector.load %arg12[%c0_48, %c0_49] : memref<1x32xf32, #tpu.memory_space<vmem>>, vector<1x32xf32>
    %cst_50 = arith.constant dense<0.000000e+00> : vector<16xf32>
    %105 = vector.multi_reduction <add>, %102, %cst_50 [1] : vector<16x32xf32> to vector<16xf32>
    %106 = vector.shape_cast %105 : vector<16xf32> to vector<16x1xf32>
    %cst_51 = arith.constant 3.200000e+01 : f32
    %107 = vector.broadcast %cst_51 : f32 to vector<16x1xf32>
    %108 = arith.divf %106, %107 : vector<16x1xf32>
    %109 = vector.broadcast %108 : vector<16x1xf32> to vector<16x32xf32>
    %110 = arith.subf %102, %109 : vector<16x32xf32>
    %111 = arith.mulf %110, %110 : vector<16x32xf32>
    %cst_52 = arith.constant dense<0.000000e+00> : vector<16xf32>
    %112 = vector.multi_reduction <add>, %111, %cst_52 [1] : vector<16x32xf32> to vector<16xf32>
    %113 = vector.shape_cast %112 : vector<16xf32> to vector<16x1xf32>
    %cst_53 = arith.constant 3.200000e+01 : f32
    %114 = vector.broadcast %cst_53 : f32 to vector<16x1xf32>
    %115 = arith.divf %113, %114 : vector<16x1xf32>
    %116 = vector.broadcast %108 : vector<16x1xf32> to vector<16x32xf32>
    %117 = arith.subf %102, %116 : vector<16x32xf32>
    %cst_54 = arith.constant 9.99999974E-6 : f32
    %118 = vector.broadcast %cst_54 : f32 to vector<16x1xf32>
    %119 = arith.addf %115, %118 : vector<16x1xf32>
    %120 = math.rsqrt %119 : vector<16x1xf32>
    %121 = vector.broadcast %120 : vector<16x1xf32> to vector<16x32xf32>
    %122 = arith.mulf %117, %121 : vector<16x32xf32>
    %123 = vector.broadcast %103 : vector<1x32xf32> to vector<16x32xf32>
    %124 = arith.mulf %122, %123 : vector<16x32xf32>
    %125 = vector.broadcast %104 : vector<1x32xf32> to vector<16x32xf32>
    %126 = arith.addf %124, %125 : vector<16x32xf32>
    %c0_55 = arith.constant 0 : index
    %c0_56 = arith.constant 0 : index
    %127 = vector.load %arg13[%c0_55, %c0_56] : memref<32x128xf32, #tpu.memory_space<vmem>>, vector<32x128xf32>
    %cst_57 = arith.constant dense<0.000000e+00> : vector<16x128xf32>
    %128 = tpu.matmul %126, %127, %cst_57 {dimension_numbers = #tpu.dot_dimension_numbers<[1], [0], [0], [1], [0, 0, 1, 1], [], []>} : vector<16x32xf32>, vector<32x128xf32>, vector<16x128xf32> -> vector<16x128xf32>
    %c0_58 = arith.constant 0 : index
    %c0_59 = arith.constant 0 : index
    %129 = vector.load %arg14[%c0_58, %c0_59] : memref<1x128xf32, #tpu.memory_space<vmem>>, vector<1x128xf32>
    %130 = vector.broadcast %129 : vector<1x128xf32> to vector<16x128xf32>
    %131 = arith.addf %128, %130 : vector<16x128xf32>
    %cst_60 = arith.constant 0.000000e+00 : f32
    %132 = vector.broadcast %cst_60 : f32 to vector<16x128xf32>
    %133 = arith.maximumf %131, %132 : vector<16x128xf32>
    %c0_61 = arith.constant 0 : index
    %c0_62 = arith.constant 0 : index
    %134 = vector.load %arg15[%c0_61, %c0_62] : memref<128x32xf32, #tpu.memory_space<vmem>>, vector<128x32xf32>
    %cst_63 = arith.constant dense<0.000000e+00> : vector<16x32xf32>
    %135 = tpu.matmul %133, %134, %cst_63 {dimension_numbers = #tpu.dot_dimension_numbers<[1], [0], [0], [1], [0, 0, 1, 1], [], []>} : vector<16x128xf32>, vector<128x32xf32>, vector<16x32xf32> -> vector<16x32xf32>
    %c0_64 = arith.constant 0 : index
    %c0_65 = arith.constant 0 : index
    %136 = vector.load %arg16[%c0_64, %c0_65] : memref<1x32xf32, #tpu.memory_space<vmem>>, vector<1x32xf32>
    %137 = vector.broadcast %136 : vector<1x32xf32> to vector<16x32xf32>
    %138 = arith.addf %135, %137 : vector<16x32xf32>
    %139 = arith.addf %126, %138 : vector<16x32xf32>
    %c0_66 = arith.constant 0 : index
    %c0_67 = arith.constant 0 : index
    %140 = vector.load %arg17[%c0_66, %c0_67] : memref<1x32xf32, #tpu.memory_space<vmem>>, vector<1x32xf32>
    %c0_68 = arith.constant 0 : index
    %c0_69 = arith.constant 0 : index
    %141 = vector.load %arg18[%c0_68, %c0_69] : memref<1x32xf32, #tpu.memory_space<vmem>>, vector<1x32xf32>
    %cst_70 = arith.constant dense<0.000000e+00> : vector<16xf32>
    %142 = vector.multi_reduction <add>, %139, %cst_70 [1] : vector<16x32xf32> to vector<16xf32>
    %143 = vector.shape_cast %142 : vector<16xf32> to vector<16x1xf32>
    %cst_71 = arith.constant 3.200000e+01 : f32
    %144 = vector.broadcast %cst_71 : f32 to vector<16x1xf32>
    %145 = arith.divf %143, %144 : vector<16x1xf32>
    %146 = vector.broadcast %145 : vector<16x1xf32> to vector<16x32xf32>
    %147 = arith.subf %139, %146 : vector<16x32xf32>
    %148 = arith.mulf %147, %147 : vector<16x32xf32>
    %cst_72 = arith.constant dense<0.000000e+00> : vector<16xf32>
    %149 = vector.multi_reduction <add>, %148, %cst_72 [1] : vector<16x32xf32> to vector<16xf32>
    %150 = vector.shape_cast %149 : vector<16xf32> to vector<16x1xf32>
    %cst_73 = arith.constant 3.200000e+01 : f32
    %151 = vector.broadcast %cst_73 : f32 to vector<16x1xf32>
    %152 = arith.divf %150, %151 : vector<16x1xf32>
    %153 = vector.broadcast %145 : vector<16x1xf32> to vector<16x32xf32>
    %154 = arith.subf %139, %153 : vector<16x32xf32>
    %cst_74 = arith.constant 9.99999974E-6 : f32
    %155 = vector.broadcast %cst_74 : f32 to vector<16x1xf32>
    %156 = arith.addf %152, %155 : vector<16x1xf32>
    %157 = math.rsqrt %156 : vector<16x1xf32>
    %158 = vector.broadcast %157 : vector<16x1xf32> to vector<16x32xf32>
    %159 = arith.mulf %154, %158 : vector<16x32xf32>
    %160 = vector.broadcast %140 : vector<1x32xf32> to vector<16x32xf32>
    %161 = arith.mulf %159, %160 : vector<16x32xf32>
    %162 = vector.broadcast %141 : vector<1x32xf32> to vector<16x32xf32>
    %163 = arith.addf %161, %162 : vector<16x32xf32>
    %c0_75 = arith.constant 0 : index
    %c0_76 = arith.constant 0 : index
    %164 = vector.load %arg23[%c0_75, %c0_76] : memref<16x32xf32, #tpu.memory_space<vmem>>, vector<16x32xf32>
    tpu.vector_store %arg23[%c0_75, %c0_76], %163 {strides = array<i32>} : memref<16x32xf32, #tpu.memory_space<vmem>>, vector<16x32xf32>,
    return
  }
  func.func @transform_0(%arg0: i32) -> (i32, i32) {
    %c0_i32 = arith.constant 0 : i32
    %c0_i32_0 = arith.constant 0 : i32
    return %arg0, %c0_i32 : i32, i32
  }
  func.func @transform_1(%arg0: i32) -> (i32, i32) {
    %c0_i32 = arith.constant 0 : i32
    %c0_i32_0 = arith.constant 0 : i32
    %c0_i32_1 = arith.constant 0 : i32
    return %c0_i32, %c0_i32_0 : i32, i32
  }
  func.func @transform_2(%arg0: i32) -> (i32, i32) {
    %c0_i32 = arith.constant 0 : i32
    %c0_i32_0 = arith.constant 0 : i32
    %c0_i32_1 = arith.constant 0 : i32
    return %c0_i32, %c0_i32_0 : i32, i32
  }
  func.func @transform_3(%arg0: i32) -> (i32, i32) {
    %c0_i32 = arith.constant 0 : i32
    %c0_i32_0 = arith.constant 0 : i32
    %c0_i32_1 = arith.constant 0 : i32
    return %c0_i32, %c0_i32_0 : i32, i32
  }
  func.func @transform_4(%arg0: i32) -> (i32, i32) {
    %c0_i32 = arith.constant 0 : i32
    %c0_i32_0 = arith.constant 0 : i32
    %c0_i32_1 = arith.constant 0 : i32
    return %c0_i32, %c0_i32_0 : i32, i32
  }
  func.func @transform_5(%arg0: i32) -> (i32, i32) {
    %c0_i32 = arith.constant 0 : i32
    %c0_i32_0 = arith.constant 0 : i32
    %c0_i32_1 = arith.constant 0 : i32
    return %c0_i32, %c0_i32_0 : i32, i32
  }
  func.func @transform_6(%arg0: i32) -> (i32, i32) {
    %c0_i32 = arith.constant 0 : i32
    %c0_i32_0 = arith.constant 0 : i32
    %c0_i32_1 = arith.constant 0 : i32
    return %c0_i32, %c0_i32_0 : i32, i32
  }
  func.func @transform_7(%arg0: i32) -> (i32, i32) {
    %c0_i32 = arith.constant 0 : i32
    %c0_i32_0 = arith.constant 0 : i32
    %c0_i32_1 = arith.constant 0 : i32
    return %c0_i32, %c0_i32_0 : i32, i32
  }
  func.func @transform_8(%arg0: i32) -> (i32, i32) {
    %c0_i32 = arith.constant 0 : i32
    %c0_i32_0 = arith.constant 0 : i32
    %c0_i32_1 = arith.constant 0 : i32
    return %c0_i32, %c0_i32_0 : i32, i32
  }
  func.func @transform_9(%arg0: i32) -> (i32, i32) {
    %c0_i32 = arith.constant 0 : i32
    %c0_i32_0 = arith.constant 0 : i32
    %c0_i32_1 = arith.constant 0 : i32
    return %c0_i32, %c0_i32_0 : i32, i32
  }
  func.func @transform_10(%arg0: i32) -> (i32, i32) {
    %c0_i32 = arith.constant 0 : i32
    %c0_i32_0 = arith.constant 0 : i32
    %c0_i32_1 = arith.constant 0 : i32
    return %c0_i32, %c0_i32_0 : i32, i32
  }
  func.func @transform_11(%arg0: i32) -> (i32, i32) {
    %c0_i32 = arith.constant 0 : i32
    %c0_i32_0 = arith.constant 0 : i32
    %c0_i32_1 = arith.constant 0 : i32
    return %c0_i32, %c0_i32_0 : i32, i32
  }
  func.func @transform_12(%arg0: i32) -> (i32, i32) {
    %c0_i32 = arith.constant 0 : i32
    %c0_i32_0 = arith.constant 0 : i32
    %c0_i32_1 = arith.constant 0 : i32
    return %c0_i32, %c0_i32_0 : i32, i32
  }
  func.func @transform_13(%arg0: i32) -> (i32, i32) {
    %c0_i32 = arith.constant 0 : i32
    %c0_i32_0 = arith.constant 0 : i32
    %c0_i32_1 = arith.constant 0 : i32
    return %c0_i32, %c0_i32_0 : i32, i32
  }
  func.func @transform_14(%arg0: i32) -> (i32, i32) {
    %c0_i32 = arith.constant 0 : i32
    %c0_i32_0 = arith.constant 0 : i32
    %c0_i32_1 = arith.constant 0 : i32
    return %c0_i32, %c0_i32_0 : i32, i32
  }
  func.func @transform_15(%arg0: i32) -> (i32, i32) {
    %c0_i32 = arith.constant 0 : i32
    %c0_i32_0 = arith.constant 0 : i32
    %c0_i32_1 = arith.constant 0 : i32
    return %c0_i32, %c0_i32_0 : i32, i32
  }
  func.func @transform_16(%arg0: i32) -> (i32, i32) {
    %c0_i32 = arith.constant 0 : i32
    %c0_i32_0 = arith.constant 0 : i32
    %c0_i32_1 = arith.constant 0 : i32
    return %c0_i32, %c0_i32_0 : i32, i32
  }
  func.func @transform_17(%arg0: i32) -> (i32, i32) {
    %c0_i32 = arith.constant 0 : i32
    %c0_i32_0 = arith.constant 0 : i32
    %c0_i32_1 = arith.constant 0 : i32
    return %c0_i32, %c0_i32_0 : i32, i32
  }
  func.func @transform_18(%arg0: i32) -> (i32, i32) {
    %c0_i32 = arith.constant 0 : i32
    %c0_i32_0 = arith.constant 0 : i32
    %c0_i32_1 = arith.constant 0 : i32
    return %c0_i32, %c0_i32_0 : i32, i32
  }
  func.func @transform_19(%arg0: i32) -> (i32, i32) {
    %c0_i32 = arith.constant 0 : i32
    %c0_i32_0 = arith.constant 0 : i32
    %c0_i32_1 = arith.constant 0 : i32
    return %c0_i32, %c0_i32_0 : i32, i32
  }
  func.func @transform_20(%arg0: i32) -> (i32, i32) {
    %c0_i32 = arith.constant 0 : i32
    %c0_i32_0 = arith.constant 0 : i32
    %c0_i32_1 = arith.constant 0 : i32
    return %c0_i32, %c0_i32_0 : i32, i32
  }
  func.func @transform_21(%arg0: i32) -> (i32, i32) {
    %c0_i32 = arith.constant 0 : i32
    %c0_i32_0 = arith.constant 0 : i32
    %c0_i32_1 = arith.constant 0 : i32
    return %c0_i32, %c0_i32_0 : i32, i32
  }
  func.func @transform_22(%arg0: i32) -> (i32, i32) {
    %c0_i32 = arith.constant 0 : i32
    %c0_i32_0 = arith.constant 0 : i32
    return %arg0, %c0_i32 : i32, i32
  }
}

module attributes {stable_mosaic.version = 11 : i64} {
  func.func @_gt_layer_kernel(%arg0: i32, %arg1: memref<16x32xf32, #tpu.memory_space<vmem>>, %arg2: memref<16x32xf32, #tpu.memory_space<vmem>>, %arg3: memref<32x32xf32, #tpu.memory_space<vmem>>, %arg4: memref<1x32xf32, #tpu.memory_space<vmem>>, %arg5: memref<32x32xf32, #tpu.memory_space<vmem>>, %arg6: memref<1x32xf32, #tpu.memory_space<vmem>>, %arg7: memref<32x32xf32, #tpu.memory_space<vmem>>, %arg8: memref<1x32xf32, #tpu.memory_space<vmem>>, %arg9: memref<32x32xf32, #tpu.memory_space<vmem>>, %arg10: memref<1x32xf32, #tpu.memory_space<vmem>>, %arg11: memref<1x32xf32, #tpu.memory_space<vmem>>, %arg12: memref<1x32xf32, #tpu.memory_space<vmem>>, %arg13: memref<32x128xf32, #tpu.memory_space<vmem>>, %arg14: memref<1x128xf32, #tpu.memory_space<vmem>>, %arg15: memref<128x32xf32, #tpu.memory_space<vmem>>, %arg16: memref<1x32xf32, #tpu.memory_space<vmem>>, %arg17: memref<1x32xf32, #tpu.memory_space<vmem>>, %arg18: memref<1x32xf32, #tpu.memory_space<vmem>>, %arg19: memref<32x32xf32, #tpu.memory_space<vmem>>, %arg20: memref<1x32xf32, #tpu.memory_space<vmem>>, %arg21: memref<32x32xf32, #tpu.memory_space<vmem>>, %arg22: memref<1x32xf32, #tpu.memory_space<vmem>>, %arg23: memref<16x32xf32, #tpu.memory_space<vmem>>) attributes {dimension_semantics = [#tpu.dimension_semantics<parallel>], iteration_bounds = array<i64: 1>, scalar_prefetch = 0 : i64, scratch_operands = 0 : i64, tpu.core_type = #tpu.core_type<tc>, window_params = [{transform_indices = @transform_0, window_bounds = array<i64: 16, 32>}, {pipeline_mode = #tpu.pipeline_mode<synchronous>, transform_indices = @transform_1, window_bounds = array<i64: 16, 32>}, {pipeline_mode = #tpu.pipeline_mode<synchronous>, transform_indices = @transform_2, window_bounds = array<i64: 32, 32>}, {pipeline_mode = #tpu.pipeline_mode<synchronous>, transform_indices = @transform_3, window_bounds = array<i64: 1, 32>}, {pipeline_mode = #tpu.pipeline_mode<synchronous>, transform_indices = @transform_4, window_bounds = array<i64: 32, 32>}, {pipeline_mode = #tpu.pipeline_mode<synchronous>, transform_indices = @transform_5, window_bounds = array<i64: 1, 32>}, {pipeline_mode = #tpu.pipeline_mode<synchronous>, transform_indices = @transform_6, window_bounds = array<i64: 32, 32>}, {pipeline_mode = #tpu.pipeline_mode<synchronous>, transform_indices = @transform_7, window_bounds = array<i64: 1, 32>}, {pipeline_mode = #tpu.pipeline_mode<synchronous>, transform_indices = @transform_8, window_bounds = array<i64: 32, 32>}, {pipeline_mode = #tpu.pipeline_mode<synchronous>, transform_indices = @transform_9, window_bounds = array<i64: 1, 32>}, {pipeline_mode = #tpu.pipeline_mode<synchronous>, transform_indices = @transform_10, window_bounds = array<i64: 1, 32>}, {pipeline_mode = #tpu.pipeline_mode<synchronous>, transform_indices = @transform_11, window_bounds = array<i64: 1, 32>}, {pipeline_mode = #tpu.pipeline_mode<synchronous>, transform_indices = @transform_12, window_bounds = array<i64: 32, 128>}, {pipeline_mode = #tpu.pipeline_mode<synchronous>, transform_indices = @transform_13, window_bounds = array<i64: 1, 128>}, {pipeline_mode = #tpu.pipeline_mode<synchronous>, transform_indices = @transform_14, window_bounds = array<i64: 128, 32>}, {pipeline_mode = #tpu.pipeline_mode<synchronous>, transform_indices = @transform_15, window_bounds = array<i64: 1, 32>}, {pipeline_mode = #tpu.pipeline_mode<synchronous>, transform_indices = @transform_16, window_bounds = array<i64: 1, 32>}, {pipeline_mode = #tpu.pipeline_mode<synchronous>, transform_indices = @transform_17, window_bounds = array<i64: 1, 32>}, {pipeline_mode = #tpu.pipeline_mode<synchronous>, transform_indices = @transform_18, window_bounds = array<i64: 32, 32>}, {pipeline_mode = #tpu.pipeline_mode<synchronous>, transform_indices = @transform_19, window_bounds = array<i64: 1, 32>}, {pipeline_mode = #tpu.pipeline_mode<synchronous>, transform_indices = @transform_20, window_bounds = array<i64: 32, 32>}, {pipeline_mode = #tpu.pipeline_mode<synchronous>, transform_indices = @transform_21, window_bounds = array<i64: 1, 32>}, {transform_indices = @transform_22, window_bounds = array<i64: 16, 32>}]} {
    %c0 = arith.constant 0 : index
    %c0_0 = arith.constant 0 : index
    %0 = vector.load %arg1[%c0, %c0_0] : memref<16x32xf32, #tpu.memory_space<vmem>>, vector<16x32xf32>
    %c0_1 = arith.constant 0 : index
    %c0_2 = arith.constant 0 : index
    %1 = vector.load %arg2[%c0_1, %c0_2] : memref<16x32xf32, #tpu.memory_space<vmem>>, vector<16x32xf32>
    %c0_3 = arith.constant 0 : index
    %c0_4 = arith.constant 0 : index
    %2 = vector.load %arg3[%c0_3, %c0_4] : memref<32x32xf32, #tpu.memory_space<vmem>>, vector<32x32xf32>
    %cst = arith.constant dense<0.000000e+00> : vector<16x32xf32>
    %3 = tpu.matmul %0, %2, %cst {dimension_numbers = #tpu.dot_dimension_numbers<[1], [0], [0], [1], [0, 0, 1, 1], [], []>} : vector<16x32xf32>, vector<32x32xf32>, vector<16x32xf32> -> vector<16x32xf32>
    %c0_5 = arith.constant 0 : index
    %c0_6 = arith.constant 0 : index
    %4 = vector.load %arg4[%c0_5, %c0_6] : memref<1x32xf32, #tpu.memory_space<vmem>>, vector<1x32xf32>
    %5 = vector.broadcast %4 : vector<1x32xf32> to vector<16x32xf32>
    %6 = arith.addf %3, %5 : vector<16x32xf32>
    %c0_7 = arith.constant 0 : index
    %c0_8 = arith.constant 0 : index
    %7 = vector.load %arg5[%c0_7, %c0_8] : memref<32x32xf32, #tpu.memory_space<vmem>>, vector<32x32xf32>
    %cst_9 = arith.constant dense<0.000000e+00> : vector<16x32xf32>
    %8 = tpu.matmul %1, %7, %cst_9 {dimension_numbers = #tpu.dot_dimension_numbers<[1], [0], [0], [1], [0, 0, 1, 1], [], []>} : vector<16x32xf32>, vector<32x32xf32>, vector<16x32xf32> -> vector<16x32xf32>
    %c0_10 = arith.constant 0 : index
    %c0_11 = arith.constant 0 : index
    %9 = vector.load %arg6[%c0_10, %c0_11] : memref<1x32xf32, #tpu.memory_space<vmem>>, vector<1x32xf32>
    %10 = vector.broadcast %9 : vector<1x32xf32> to vector<16x32xf32>
    %11 = arith.addf %8, %10 : vector<16x32xf32>
    %c0_12 = arith.constant 0 : index
    %c0_13 = arith.constant 0 : index
    %12 = vector.load %arg7[%c0_12, %c0_13] : memref<32x32xf32, #tpu.memory_space<vmem>>, vector<32x32xf32>
    %cst_14 = arith.constant dense<0.000000e+00> : vector<16x32xf32>
    %13 = tpu.matmul %1, %12, %cst_14 {dimension_numbers = #tpu.dot_dimension_numbers<[1], [0], [0], [1], [0, 0, 1, 1], [], []>} : vector<16x32xf32>, vector<32x32xf32>, vector<16x32xf32> -> vector<16x32xf32>
    %c0_15 = arith.constant 0 : index
    %c0_16 = arith.constant 0 : index
    %14 = vector.load %arg8[%c0_15, %c0_16] : memref<1x32xf32, #tpu.memory_space<vmem>>, vector<1x32xf32>
    %15 = vector.broadcast %14 : vector<1x32xf32> to vector<16x32xf32>
    %16 = arith.addf %13, %15 : vector<16x32xf32>
    %c0_17 = arith.constant 0 : index
    %c0_18 = arith.constant 0 : index
    %17 = vector.load %arg9[%c0_17, %c0_18] : memref<32x32xf32, #tpu.memory_space<vmem>>, vector<32x32xf32>
    %cst_19 = arith.constant 0.000000e+00 : f32
    %18 = vector.broadcast %cst_19 : f32 to vector<16x32xf32>
    %19 = vector.extract_strided_slice %6 {offsets = [0, 0], sizes = [16, 8], strides = [1, 1]} : vector<16x32xf32> to vector<16x8xf32>
    %20 = vector.extract_strided_slice %11 {offsets = [0, 0], sizes = [16, 8], strides = [1, 1]} : vector<16x32xf32> to vector<16x8xf32>
    %21 = vector.extract_strided_slice %16 {offsets = [0, 0], sizes = [16, 8], strides = [1, 1]} : vector<16x32xf32> to vector<16x8xf32>
    %cst_20 = arith.constant dense<0.000000e+00> : vector<16x16xf32>
    %22 = tpu.matmul %19, %20, %cst_20 {dimension_numbers = #tpu.dot_dimension_numbers<[1], [1], [0], [0], [0, 0, 1, 0], [], []>} : vector<16x8xf32>, vector<16x8xf32>, vector<16x16xf32> -> vector<16x16xf32>
    %cst_21 = arith.constant 0.353553385 : f32
    %23 = vector.broadcast %cst_21 : f32 to vector<16x16xf32>
    %24 = arith.mulf %22, %23 : vector<16x16xf32>
    %cst_22 = arith.constant dense<0xFF800000> : vector<16xf32>
    %25 = vector.multi_reduction <maximumf>, %24, %cst_22 [1] : vector<16x16xf32> to vector<16xf32>
    %26 = vector.shape_cast %25 : vector<16xf32> to vector<16x1xf32>
    %27 = vector.broadcast %26 : vector<16x1xf32> to vector<16x16xf32>
    %28 = arith.subf %24, %27 : vector<16x16xf32>
    %29 = math.exp %28 : vector<16x16xf32>
    %cst_23 = arith.constant dense<0.000000e+00> : vector<16xf32>
    %30 = vector.multi_reduction <add>, %29, %cst_23 [1] : vector<16x16xf32> to vector<16xf32>
    %31 = vector.shape_cast %30 : vector<16xf32> to vector<16x1xf32>
    %32 = tpu.reciprocal %31 {approx = true} : vector<16x1xf32> -> vector<16x1xf32>
    %33 = vector.broadcast %32 : vector<16x1xf32> to vector<16x16xf32>
    %34 = arith.mulf %29, %33 : vector<16x16xf32>
    %cst_24 = arith.constant dense<0.000000e+00> : vector<16x8xf32>
    %35 = tpu.matmul %34, %21, %cst_24 {dimension_numbers = #tpu.dot_dimension_numbers<[1], [0], [0], [1], [0, 0, 1, 1], [], []>} : vector<16x16xf32>, vector<16x8xf32>, vector<16x8xf32> -> vector<16x8xf32>
    %36 = vector.extract_strided_slice %17 {offsets = [0, 0], sizes = [8, 32], strides = [1, 1]} : vector<32x32xf32> to vector<8x32xf32>
    %cst_25 = arith.constant dense<0.000000e+00> : vector<16x32xf32>
    %37 = tpu.matmul %35, %36, %cst_25 {dimension_numbers = #tpu.dot_dimension_numbers<[1], [0], [0], [1], [0, 0, 1, 1], [], []>} : vector<16x8xf32>, vector<8x32xf32>, vector<16x32xf32> -> vector<16x32xf32>
    %38 = arith.addf %18, %37 : vector<16x32xf32>
    %39 = vector.extract_strided_slice %6 {offsets = [0, 8], sizes = [16, 8], strides = [1, 1]} : vector<16x32xf32> to vector<16x8xf32>
    %40 = vector.extract_strided_slice %11 {offsets = [0, 8], sizes = [16, 8], strides = [1, 1]} : vector<16x32xf32> to vector<16x8xf32>
    %41 = vector.extract_strided_slice %16 {offsets = [0, 8], sizes = [16, 8], strides = [1, 1]} : vector<16x32xf32> to vector<16x8xf32>
    %cst_26 = arith.constant dense<0.000000e+00> : vector<16x16xf32>
    %42 = tpu.matmul %39, %40, %cst_26 {dimension_numbers = #tpu.dot_dimension_numbers<[1], [1], [0], [0], [0, 0, 1, 0], [], []>} : vector<16x8xf32>, vector<16x8xf32>, vector<16x16xf32> -> vector<16x16xf32>
    %cst_27 = arith.constant 0.353553385 : f32
    %43 = vector.broadcast %cst_27 : f32 to vector<16x16xf32>
    %44 = arith.mulf %42, %43 : vector<16x16xf32>
    %cst_28 = arith.constant dense<0xFF800000> : vector<16xf32>
    %45 = vector.multi_reduction <maximumf>, %44, %cst_28 [1] : vector<16x16xf32> to vector<16xf32>
    %46 = vector.shape_cast %45 : vector<16xf32> to vector<16x1xf32>
    %47 = vector.broadcast %46 : vector<16x1xf32> to vector<16x16xf32>
    %48 = arith.subf %44, %47 : vector<16x16xf32>
    %49 = math.exp %48 : vector<16x16xf32>
    %cst_29 = arith.constant dense<0.000000e+00> : vector<16xf32>
    %50 = vector.multi_reduction <add>, %49, %cst_29 [1] : vector<16x16xf32> to vector<16xf32>
    %51 = vector.shape_cast %50 : vector<16xf32> to vector<16x1xf32>
    %52 = tpu.reciprocal %51 {approx = true} : vector<16x1xf32> -> vector<16x1xf32>
    %53 = vector.broadcast %52 : vector<16x1xf32> to vector<16x16xf32>
    %54 = arith.mulf %49, %53 : vector<16x16xf32>
    %cst_30 = arith.constant dense<0.000000e+00> : vector<16x8xf32>
    %55 = tpu.matmul %54, %41, %cst_30 {dimension_numbers = #tpu.dot_dimension_numbers<[1], [0], [0], [1], [0, 0, 1, 1], [], []>} : vector<16x16xf32>, vector<16x8xf32>, vector<16x8xf32> -> vector<16x8xf32>
    %56 = vector.extract_strided_slice %17 {offsets = [8, 0], sizes = [8, 32], strides = [1, 1]} : vector<32x32xf32> to vector<8x32xf32>
    %cst_31 = arith.constant dense<0.000000e+00> : vector<16x32xf32>
    %57 = tpu.matmul %55, %56, %cst_31 {dimension_numbers = #tpu.dot_dimension_numbers<[1], [0], [0], [1], [0, 0, 1, 1], [], []>} : vector<16x8xf32>, vector<8x32xf32>, vector<16x32xf32> -> vector<16x32xf32>
    %58 = arith.addf %38, %57 : vector<16x32xf32>
    %59 = vector.extract_strided_slice %6 {offsets = [0, 16], sizes = [16, 8], strides = [1, 1]} : vector<16x32xf32> to vector<16x8xf32>
    %60 = vector.extract_strided_slice %11 {offsets = [0, 16], sizes = [16, 8], strides = [1, 1]} : vector<16x32xf32> to vector<16x8xf32>
    %61 = vector.extract_strided_slice %16 {offsets = [0, 16], sizes = [16, 8], strides = [1, 1]} : vector<16x32xf32> to vector<16x8xf32>
    %cst_32 = arith.constant dense<0.000000e+00> : vector<16x16xf32>
    %62 = tpu.matmul %59, %60, %cst_32 {dimension_numbers = #tpu.dot_dimension_numbers<[1], [1], [0], [0], [0, 0, 1, 0], [], []>} : vector<16x8xf32>, vector<16x8xf32>, vector<16x16xf32> -> vector<16x16xf32>
    %cst_33 = arith.constant 0.353553385 : f32
    %63 = vector.broadcast %cst_33 : f32 to vector<16x16xf32>
    %64 = arith.mulf %62, %63 : vector<16x16xf32>
    %cst_34 = arith.constant dense<0xFF800000> : vector<16xf32>
    %65 = vector.multi_reduction <maximumf>, %64, %cst_34 [1] : vector<16x16xf32> to vector<16xf32>
    %66 = vector.shape_cast %65 : vector<16xf32> to vector<16x1xf32>
    %67 = vector.broadcast %66 : vector<16x1xf32> to vector<16x16xf32>
    %68 = arith.subf %64, %67 : vector<16x16xf32>
    %69 = math.exp %68 : vector<16x16xf32>
    %cst_35 = arith.constant dense<0.000000e+00> : vector<16xf32>
    %70 = vector.multi_reduction <add>, %69, %cst_35 [1] : vector<16x16xf32> to vector<16xf32>
    %71 = vector.shape_cast %70 : vector<16xf32> to vector<16x1xf32>
    %72 = tpu.reciprocal %71 {approx = true} : vector<16x1xf32> -> vector<16x1xf32>
    %73 = vector.broadcast %72 : vector<16x1xf32> to vector<16x16xf32>
    %74 = arith.mulf %69, %73 : vector<16x16xf32>
    %cst_36 = arith.constant dense<0.000000e+00> : vector<16x8xf32>
    %75 = tpu.matmul %74, %61, %cst_36 {dimension_numbers = #tpu.dot_dimension_numbers<[1], [0], [0], [1], [0, 0, 1, 1], [], []>} : vector<16x16xf32>, vector<16x8xf32>, vector<16x8xf32> -> vector<16x8xf32>
    %76 = vector.extract_strided_slice %17 {offsets = [16, 0], sizes = [8, 32], strides = [1, 1]} : vector<32x32xf32> to vector<8x32xf32>
    %cst_37 = arith.constant dense<0.000000e+00> : vector<16x32xf32>
    %77 = tpu.matmul %75, %76, %cst_37 {dimension_numbers = #tpu.dot_dimension_numbers<[1], [0], [0], [1], [0, 0, 1, 1], [], []>} : vector<16x8xf32>, vector<8x32xf32>, vector<16x32xf32> -> vector<16x32xf32>
    %78 = arith.addf %58, %77 : vector<16x32xf32>
    %79 = vector.extract_strided_slice %6 {offsets = [0, 24], sizes = [16, 8], strides = [1, 1]} : vector<16x32xf32> to vector<16x8xf32>
    %80 = vector.extract_strided_slice %11 {offsets = [0, 24], sizes = [16, 8], strides = [1, 1]} : vector<16x32xf32> to vector<16x8xf32>
    %81 = vector.extract_strided_slice %16 {offsets = [0, 24], sizes = [16, 8], strides = [1, 1]} : vector<16x32xf32> to vector<16x8xf32>
    %cst_38 = arith.constant dense<0.000000e+00> : vector<16x16xf32>
    %82 = tpu.matmul %79, %80, %cst_38 {dimension_numbers = #tpu.dot_dimension_numbers<[1], [1], [0], [0], [0, 0, 1, 0], [], []>} : vector<16x8xf32>, vector<16x8xf32>, vector<16x16xf32> -> vector<16x16xf32>
    %cst_39 = arith.constant 0.353553385 : f32
    %83 = vector.broadcast %cst_39 : f32 to vector<16x16xf32>
    %84 = arith.mulf %82, %83 : vector<16x16xf32>
    %cst_40 = arith.constant dense<0xFF800000> : vector<16xf32>
    %85 = vector.multi_reduction <maximumf>, %84, %cst_40 [1] : vector<16x16xf32> to vector<16xf32>
    %86 = vector.shape_cast %85 : vector<16xf32> to vector<16x1xf32>
    %87 = vector.broadcast %86 : vector<16x1xf32> to vector<16x16xf32>
    %88 = arith.subf %84, %87 : vector<16x16xf32>
    %89 = math.exp %88 : vector<16x16xf32>
    %cst_41 = arith.constant dense<0.000000e+00> : vector<16xf32>
    %90 = vector.multi_reduction <add>, %89, %cst_41 [1] : vector<16x16xf32> to vector<16xf32>
    %91 = vector.shape_cast %90 : vector<16xf32> to vector<16x1xf32>
    %92 = tpu.reciprocal %91 {approx = true} : vector<16x1xf32> -> vector<16x1xf32>
    %93 = vector.broadcast %92 : vector<16x1xf32> to vector<16x16xf32>
    %94 = arith.mulf %89, %93 : vector<16x16xf32>
    %cst_42 = arith.constant dense<0.000000e+00> : vector<16x8xf32>
    %95 = tpu.matmul %94, %81, %cst_42 {dimension_numbers = #tpu.dot_dimension_numbers<[1], [0], [0], [1], [0, 0, 1, 1], [], []>} : vector<16x16xf32>, vector<16x8xf32>, vector<16x8xf32> -> vector<16x8xf32>
    %96 = vector.extract_strided_slice %17 {offsets = [24, 0], sizes = [8, 32], strides = [1, 1]} : vector<32x32xf32> to vector<8x32xf32>
    %cst_43 = arith.constant dense<0.000000e+00> : vector<16x32xf32>
    %97 = tpu.matmul %95, %96, %cst_43 {dimension_numbers = #tpu.dot_dimension_numbers<[1], [0], [0], [1], [0, 0, 1, 1], [], []>} : vector<16x8xf32>, vector<8x32xf32>, vector<16x32xf32> -> vector<16x32xf32>
    %98 = arith.addf %78, %97 : vector<16x32xf32>
    %c0_44 = arith.constant 0 : index
    %c0_45 = arith.constant 0 : index
    %99 = vector.load %arg10[%c0_44, %c0_45] : memref<1x32xf32, #tpu.memory_space<vmem>>, vector<1x32xf32>
    %100 = vector.broadcast %99 : vector<1x32xf32> to vector<16x32xf32>
    %101 = arith.addf %98, %100 : vector<16x32xf32>
    %102 = arith.addf %0, %101 : vector<16x32xf32>
    %c0_46 = arith.constant 0 : index
    %c0_47 = arith.constant 0 : index
    %103 = vector.load %arg11[%c0_46, %c0_47] : memref<1x32xf32, #tpu.memory_space<vmem>>, vector<1x32xf32>
    %c0_48 = arith.constant 0 : index
    %c0_49 = arith.constant 0 : index
    %104 = vector.load %arg12[%c0_48, %c0_49] : memref<1x32xf32, #tpu.memory_space<vmem>>, vector<1x32xf32>
    %cst_50 = arith.constant dense<0.000000e+00> : vector<16xf32>
    %105 = vector.multi_reduction <add>, %102, %cst_50 [1] : vector<16x32xf32> to vector<16xf32>
    %106 = vector.shape_cast %105 : vector<16xf32> to vector<16x1xf32>
    %cst_51 = arith.constant 3.200000e+01 : f32
    %107 = vector.broadcast %cst_51 : f32 to vector<16x1xf32>
    %108 = arith.divf %106, %107 : vector<16x1xf32>
    %109 = vector.broadcast %108 : vector<16x1xf32> to vector<16x32xf32>
    %110 = arith.subf %102, %109 : vector<16x32xf32>
    %111 = arith.mulf %110, %110 : vector<16x32xf32>
    %cst_52 = arith.constant dense<0.000000e+00> : vector<16xf32>
    %112 = vector.multi_reduction <add>, %111, %cst_52 [1] : vector<16x32xf32> to vector<16xf32>
    %113 = vector.shape_cast %112 : vector<16xf32> to vector<16x1xf32>
    %cst_53 = arith.constant 3.200000e+01 : f32
    %114 = vector.broadcast %cst_53 : f32 to vector<16x1xf32>
    %115 = arith.divf %113, %114 : vector<16x1xf32>
    %116 = vector.broadcast %108 : vector<16x1xf32> to vector<16x32xf32>
    %117 = arith.subf %102, %116 : vector<16x32xf32>
    %cst_54 = arith.constant 9.99999974E-6 : f32
    %118 = vector.broadcast %cst_54 : f32 to vector<16x1xf32>
    %119 = arith.addf %115, %118 : vector<16x1xf32>
    %120 = math.rsqrt %119 : vector<16x1xf32>
    %121 = vector.broadcast %120 : vector<16x1xf32> to vector<16x32xf32>
    %122 = arith.mulf %117, %121 : vector<16x32xf32>
    %123 = vector.broadcast %103 : vector<1x32xf32> to vector<16x32xf32>
    %124 = arith.mulf %122, %123 : vector<16x32xf32>
    %125 = vector.broadcast %104 : vector<1x32xf32> to vector<16x32xf32>
    %126 = arith.addf %124, %125 : vector<16x32xf32>
    %c0_55 = arith.constant 0 : index
    %c0_56 = arith.constant 0 : index
    %127 = vector.load %arg13[%c0_55, %c0_56] : memref<32x128xf32, #tpu.memory_space<vmem>>, vector<32x128xf32>
    %cst_57 = arith.constant dense<0.000000e+00> : vector<16x128xf32>
    %128 = tpu.matmul %126, %127, %cst_57 {dimension_numbers = #tpu.dot_dimension_numbers<[1], [0], [0], [1], [0, 0, 1, 1], [], []>} : vector<16x32xf32>, vector<32x128xf32>, vector<16x128xf32> -> vector<16x128xf32>
    %c0_58 = arith.constant 0 : index
    %c0_59 = arith.constant 0 : index
    %129 = vector.load %arg14[%c0_58, %c0_59] : memref<1x128xf32, #tpu.memory_space<vmem>>, vector<1x128xf32>
    %130 = vector.broadcast %129 : vector<1x128xf32> to vector<16x128xf32>
    %131 = arith.addf %128, %130 : vector<16x128xf32>
    %cst_60 = arith.constant 0.000000e+00 : f32
    %132 = vector.broadcast %cst_60 : f32 to vector<16x128xf32>
    %133 = arith.maximumf %131, %132 : vector<16x128xf32>
    %c0_61 = arith.constant 0 : index
    %c0_62 = arith.constant 0 : index
    %134 = vector.load %arg15[%c0_61, %c0_62] : memref<128x32xf32, #tpu.memory_space<vmem>>, vector<128x32xf32>
    %cst_63 = arith.constant dense<0.000000e+00> : vector<16x32xf32>
    %135 = tpu.matmul %133, %134, %cst_63 {dimension_numbers = #tpu.dot_dimension_numbers<[1], [0], [0], [1], [0, 0, 1, 1], [], []>} : vector<16x128xf32>, vector<128x32xf32>, vector<16x32xf32> -> vector<16x32xf32>
    %c0_64 = arith.constant 0 : index
    %c0_65 = arith.constant 0 : index
    %136 = vector.load %arg16[%c0_64, %c0_65] : memref<1x32xf32, #tpu.memory_space<vmem>>, vector<1x32xf32>
    %137 = vector.broadcast %136 : vector<1x32xf32> to vector<16x32xf32>
    %138 = arith.addf %135, %137 : vector<16x32xf32>
    %139 = arith.addf %126, %138 : vector<16x32xf32>
    %c0_66 = arith.constant 0 : index
    %c0_67 = arith.constant 0 : index
    %140 = vector.load %arg17[%c0_66, %c0_67] : memref<1x32xf32, #tpu.memory_space<vmem>>, vector<1x32xf32>
    %c0_68 = arith.constant 0 : index
    %c0_69 = arith.constant 0 : index
    %141 = vector.load %arg18[%c0_68, %c0_69] : memref<1x32xf32, #tpu.memory_space<vmem>>, vector<1x32xf32>
    %cst_70 = arith.constant dense<0.000000e+00> : vector<16xf32>
    %142 = vector.multi_reduction <add>, %139, %cst_70 [1] : vector<16x32xf32> to vector<16xf32>
    %143 = vector.shape_cast %142 : vector<16xf32> to vector<16x1xf32>
    %cst_71 = arith.constant 3.200000e+01 : f32
    %144 = vector.broadcast %cst_71 : f32 to vector<16x1xf32>
    %145 = arith.divf %143, %144 : vector<16x1xf32>
    %146 = vector.broadcast %145 : vector<16x1xf32> to vector<16x32xf32>
    %147 = arith.subf %139, %146 : vector<16x32xf32>
    %148 = arith.mulf %147, %147 : vector<16x32xf32>
    %cst_72 = arith.constant dense<0.000000e+00> : vector<16xf32>
    %149 = vector.multi_reduction <add>, %148, %cst_72 [1] : vector<16x32xf32> to vector<16xf32>
    %150 = vector.shape_cast %149 : vector<16xf32> to vector<16x1xf32>
    %cst_73 = arith.constant 3.200000e+01 : f32
    %151 = vector.broadcast %cst_73 : f32 to vector<16x1xf32>
    %152 = arith.divf %150, %151 : vector<16x1xf32>
    %153 = vector.broadcast %145 : vector<16x1xf32> to vector<16x32xf32>
    %154 = arith.subf %139, %153 : vector<16x32xf32>
    %cst_74 = arith.constant 9.99999974E-6 : f32
    %155 = vector.broadcast %cst_74 : f32 to vector<16x1xf32>
    %156 = arith.addf %152, %155 : vector<16x1xf32>
    %157 = math.rsqrt %156 : vector<16x1xf32>
    %158 = vector.broadcast %157 : vector<16x1xf32> to vector<16x32xf32>
    %159 = arith.mulf %154, %158 : vector<16x32xf32>
    %160 = vector.broadcast %140 : vector<1x32xf32> to vector<16x32xf32>
    %161 = arith.mulf %159, %160 : vector<16x32xf32>
    %162 = vector.broadcast %141 : vector<1x32xf32> to vector<16x32xf32>
    %163 = arith.addf %161, %162 : vector<16x32xf32>
    %c0_75 = arith.constant 0 : index
    %c0_76 = arith.constant 0 : index
    %164 = vector.load %arg19[%c0_75, %c0_76] : memref<32x32xf32, #tpu.memory_space<vmem>>, vector<32x32xf32>
    %cst_77 = arith.constant dense<0.000000e+00> : vector<16x32xf32>
    %165 = tpu.matmul %163, %164, %cst_77 {dimension_numbers = #tpu.dot_dimension_numbers<[1], [0], [0], [1], [0, 0, 1, 1], [], []>} : vector<16x32xf32>, vector<32x32xf32>, vector<16x32xf32> -> vector<16x32xf32>
    %c0_78 = arith.constant 0 : index
    %c0_79 = arith.constant 0 : index
    %166 = vector.load %arg20[%c0_78, %c0_79] : memref<1x32xf32, #tpu.memory_space<vmem>>, vector<1x32xf32>
    %167 = vector.broadcast %166 : vector<1x32xf32> to vector<16x32xf32>
    %168 = arith.addf %165, %167 : vector<16x32xf32>
    %cst_80 = arith.constant 0.000000e+00 : f32
    %169 = vector.broadcast %cst_80 : f32 to vector<16x32xf32>
    %170 = arith.maximumf %168, %169 : vector<16x32xf32>
    %c0_81 = arith.constant 0 : index
    %c0_82 = arith.constant 0 : index
    %171 = vector.load %arg21[%c0_81, %c0_82] : memref<32x32xf32, #tpu.memory_space<vmem>>, vector<32x32xf32>
    %cst_83 = arith.constant dense<0.000000e+00> : vector<16x32xf32>
    %172 = tpu.matmul %170, %171, %cst_83 {dimension_numbers = #tpu.dot_dimension_numbers<[1], [0], [0], [1], [0, 0, 1, 1], [], []>} : vector<16x32xf32>, vector<32x32xf32>, vector<16x32xf32> -> vector<16x32xf32>
    %c0_84 = arith.constant 0 : index
    %c0_85 = arith.constant 0 : index
    %173 = vector.load %arg22[%c0_84, %c0_85] : memref<1x32xf32, #tpu.memory_space<vmem>>, vector<1x32xf32>
    %174 = vector.broadcast %173 : vector<1x32xf32> to vector<16x32xf32>
    %175 = arith.addf %172, %174 : vector<16x32xf32>
    %c0_86 = arith.constant 0 : index
    %c0_87 = arith.constant 0 : index
    %176 = vector.load %arg23[%c0_86, %c0_87] : memref<16x32xf32, #tpu.memory_space<vmem>>, vector<16x32xf32>
    tpu.vector_store %arg23[%c0_86, %c0_87], %175 {strides = array<i32>} : memref<16x32xf32, #tpu.memory_space<vmem>>, vector<16x32xf32>,
    return
  }
  func.func @transform_0(%arg0: i32) -> (i32, i32) {
    %c0_i32 = arith.constant 0 : i32
    %c0_i32_0 = arith.constant 0 : i32
    return %arg0, %c0_i32 : i32, i32
  }
  func.func @transform_1(%arg0: i32) -> (i32, i32) {
    %c0_i32 = arith.constant 0 : i32
    %c0_i32_0 = arith.constant 0 : i32
    %c0_i32_1 = arith.constant 0 : i32
    return %c0_i32, %c0_i32_0 : i32, i32
  }
  func.func @transform_2(%arg0: i32) -> (i32, i32) {
    %c0_i32 = arith.constant 0 : i32
    %c0_i32_0 = arith.constant 0 : i32
    %c0_i32_1 = arith.constant 0 : i32
    return %c0_i32, %c0_i32_0 : i32, i32
  }
  func.func @transform_3(%arg0: i32) -> (i32, i32) {
    %c0_i32 = arith.constant 0 : i32
    %c0_i32_0 = arith.constant 0 : i32
    %c0_i32_1 = arith.constant 0 : i32
    return %c0_i32, %c0_i32_0 : i32, i32
  }
  func.func @transform_4(%arg0: i32) -> (i32, i32) {
    %c0_i32 = arith.constant 0 : i32
    %c0_i32_0 = arith.constant 0 : i32
    %c0_i32_1 = arith.constant 0 : i32
    return %c0_i32, %c0_i32_0 : i32, i32
  }
  func.func @transform_5(%arg0: i32) -> (i32, i32) {
    %c0_i32 = arith.constant 0 : i32
    %c0_i32_0 = arith.constant 0 : i32
    %c0_i32_1 = arith.constant 0 : i32
    return %c0_i32, %c0_i32_0 : i32, i32
  }
  func.func @transform_6(%arg0: i32) -> (i32, i32) {
    %c0_i32 = arith.constant 0 : i32
    %c0_i32_0 = arith.constant 0 : i32
    %c0_i32_1 = arith.constant 0 : i32
    return %c0_i32, %c0_i32_0 : i32, i32
  }
  func.func @transform_7(%arg0: i32) -> (i32, i32) {
    %c0_i32 = arith.constant 0 : i32
    %c0_i32_0 = arith.constant 0 : i32
    %c0_i32_1 = arith.constant 0 : i32
    return %c0_i32, %c0_i32_0 : i32, i32
  }
  func.func @transform_8(%arg0: i32) -> (i32, i32) {
    %c0_i32 = arith.constant 0 : i32
    %c0_i32_0 = arith.constant 0 : i32
    %c0_i32_1 = arith.constant 0 : i32
    return %c0_i32, %c0_i32_0 : i32, i32
  }
  func.func @transform_9(%arg0: i32) -> (i32, i32) {
    %c0_i32 = arith.constant 0 : i32
    %c0_i32_0 = arith.constant 0 : i32
    %c0_i32_1 = arith.constant 0 : i32
    return %c0_i32, %c0_i32_0 : i32, i32
  }
  func.func @transform_10(%arg0: i32) -> (i32, i32) {
    %c0_i32 = arith.constant 0 : i32
    %c0_i32_0 = arith.constant 0 : i32
    %c0_i32_1 = arith.constant 0 : i32
    return %c0_i32, %c0_i32_0 : i32, i32
  }
  func.func @transform_11(%arg0: i32) -> (i32, i32) {
    %c0_i32 = arith.constant 0 : i32
    %c0_i32_0 = arith.constant 0 : i32
    %c0_i32_1 = arith.constant 0 : i32
    return %c0_i32, %c0_i32_0 : i32, i32
  }
  func.func @transform_12(%arg0: i32) -> (i32, i32) {
    %c0_i32 = arith.constant 0 : i32
    %c0_i32_0 = arith.constant 0 : i32
    %c0_i32_1 = arith.constant 0 : i32
    return %c0_i32, %c0_i32_0 : i32, i32
  }
  func.func @transform_13(%arg0: i32) -> (i32, i32) {
    %c0_i32 = arith.constant 0 : i32
    %c0_i32_0 = arith.constant 0 : i32
    %c0_i32_1 = arith.constant 0 : i32
    return %c0_i32, %c0_i32_0 : i32, i32
  }
  func.func @transform_14(%arg0: i32) -> (i32, i32) {
    %c0_i32 = arith.constant 0 : i32
    %c0_i32_0 = arith.constant 0 : i32
    %c0_i32_1 = arith.constant 0 : i32
    return %c0_i32, %c0_i32_0 : i32, i32
  }
  func.func @transform_15(%arg0: i32) -> (i32, i32) {
    %c0_i32 = arith.constant 0 : i32
    %c0_i32_0 = arith.constant 0 : i32
    %c0_i32_1 = arith.constant 0 : i32
    return %c0_i32, %c0_i32_0 : i32, i32
  }
  func.func @transform_16(%arg0: i32) -> (i32, i32) {
    %c0_i32 = arith.constant 0 : i32
    %c0_i32_0 = arith.constant 0 : i32
    %c0_i32_1 = arith.constant 0 : i32
    return %c0_i32, %c0_i32_0 : i32, i32
  }
  func.func @transform_17(%arg0: i32) -> (i32, i32) {
    %c0_i32 = arith.constant 0 : i32
    %c0_i32_0 = arith.constant 0 : i32
    %c0_i32_1 = arith.constant 0 : i32
    return %c0_i32, %c0_i32_0 : i32, i32
  }
  func.func @transform_18(%arg0: i32) -> (i32, i32) {
    %c0_i32 = arith.constant 0 : i32
    %c0_i32_0 = arith.constant 0 : i32
    %c0_i32_1 = arith.constant 0 : i32
    return %c0_i32, %c0_i32_0 : i32, i32
  }
  func.func @transform_19(%arg0: i32) -> (i32, i32) {
    %c0_i32 = arith.constant 0 : i32
    %c0_i32_0 = arith.constant 0 : i32
    %c0_i32_1 = arith.constant 0 : i32
    return %c0_i32, %c0_i32_0 : i32, i32
  }
  func.func @transform_20(%arg0: i32) -> (i32, i32) {
    %c0_i32 = arith.constant 0 : i32
    %c0_i32_0 = arith.constant 0 : i32
    %c0_i32_1 = arith.constant 0 : i32
    return %c0_i32, %c0_i32_0 : i32, i32
  }
  func.func @transform_21(%arg0: i32) -> (i32, i32) {
    %c0_i32 = arith.constant 0 : i32
    %c0_i32_0 = arith.constant 0 : i32
    %c0_i32_1 = arith.constant 0 : i32
    return %c0_i32, %c0_i32_0 : i32, i32
  }
  func.func @transform_22(%arg0: i32) -> (i32, i32) {
    %c0_i32 = arith.constant 0 : i32
    %c0_i32_0 = arith.constant 0 : i32
    return %arg0, %c0_i32 : i32, i32
  }
}

module attributes {stable_mosaic.version = 11 : i64} {
  func.func @_edge_pred_kernel(%arg0: i32, %arg1: memref<3x32xf32, #tpu.memory_space<vmem>>, %arg2: memref<3x32xf32, #tpu.memory_space<vmem>>, %arg3: memref<32x32xf32, #tpu.memory_space<vmem>>, %arg4: memref<32x32xf32, #tpu.memory_space<vmem>>, %arg5: memref<1x32xf32, #tpu.memory_space<vmem>>, %arg6: memref<32x1xf32, #tpu.memory_space<vmem>>, %arg7: memref<1x1xf32, #tpu.memory_space<vmem>>, %arg8: memref<3x1xf32, #tpu.memory_space<vmem>>) attributes {dimension_semantics = [#tpu.dimension_semantics<arbitrary>], iteration_bounds = array<i64: 1>, scalar_prefetch = 0 : i64, scratch_operands = 0 : i64, tpu.core_type = #tpu.core_type<tc>, window_params = [{pipeline_mode = #tpu.pipeline_mode<synchronous>, transform_indices = @transform_0, window_bounds = array<i64: 3, 32>}, {pipeline_mode = #tpu.pipeline_mode<synchronous>, transform_indices = @transform_1, window_bounds = array<i64: 3, 32>}, {pipeline_mode = #tpu.pipeline_mode<synchronous>, transform_indices = @transform_2, window_bounds = array<i64: 32, 32>}, {pipeline_mode = #tpu.pipeline_mode<synchronous>, transform_indices = @transform_3, window_bounds = array<i64: 32, 32>}, {pipeline_mode = #tpu.pipeline_mode<synchronous>, transform_indices = @transform_4, window_bounds = array<i64: 1, 32>}, {pipeline_mode = #tpu.pipeline_mode<synchronous>, transform_indices = @transform_5, window_bounds = array<i64: 32, 1>}, {pipeline_mode = #tpu.pipeline_mode<synchronous>, transform_indices = @transform_6, window_bounds = array<i64: 1, 1>}, {pipeline_mode = #tpu.pipeline_mode<synchronous>, transform_indices = @transform_7, window_bounds = array<i64: 3, 1>}]} {
    %c0 = arith.constant 0 : index
    %c0_0 = arith.constant 0 : index
    %0 = vector.load %arg1[%c0, %c0_0] : memref<3x32xf32, #tpu.memory_space<vmem>>, vector<3x32xf32>
    %c0_1 = arith.constant 0 : index
    %c0_2 = arith.constant 0 : index
    %1 = vector.load %arg3[%c0_1, %c0_2] : memref<32x32xf32, #tpu.memory_space<vmem>>, vector<32x32xf32>
    %cst = arith.constant dense<0.000000e+00> : vector<3x32xf32>
    %2 = tpu.matmul %0, %1, %cst {dimension_numbers = #tpu.dot_dimension_numbers<[1], [0], [0], [1], [0, 0, 1, 1], [], []>} : vector<3x32xf32>, vector<32x32xf32>, vector<3x32xf32> -> vector<3x32xf32>
    %c0_3 = arith.constant 0 : index
    %c0_4 = arith.constant 0 : index
    %3 = vector.load %arg2[%c0_3, %c0_4] : memref<3x32xf32, #tpu.memory_space<vmem>>, vector<3x32xf32>
    %c0_5 = arith.constant 0 : index
    %c0_6 = arith.constant 0 : index
    %4 = vector.load %arg4[%c0_5, %c0_6] : memref<32x32xf32, #tpu.memory_space<vmem>>, vector<32x32xf32>
    %cst_7 = arith.constant dense<0.000000e+00> : vector<3x32xf32>
    %5 = tpu.matmul %3, %4, %cst_7 {dimension_numbers = #tpu.dot_dimension_numbers<[1], [0], [0], [1], [0, 0, 1, 1], [], []>} : vector<3x32xf32>, vector<32x32xf32>, vector<3x32xf32> -> vector<3x32xf32>
    %6 = arith.addf %2, %5 : vector<3x32xf32>
    %c0_8 = arith.constant 0 : index
    %c0_9 = arith.constant 0 : index
    %7 = vector.load %arg5[%c0_8, %c0_9] : memref<1x32xf32, #tpu.memory_space<vmem>>, vector<1x32xf32>
    %8 = vector.broadcast %7 : vector<1x32xf32> to vector<3x32xf32>
    %9 = arith.addf %6, %8 : vector<3x32xf32>
    %cst_10 = arith.constant 0.000000e+00 : f32
    %10 = vector.broadcast %cst_10 : f32 to vector<3x32xf32>
    %11 = arith.maximumf %9, %10 : vector<3x32xf32>
    %c0_11 = arith.constant 0 : index
    %c0_12 = arith.constant 0 : index
    %12 = vector.load %arg6[%c0_11, %c0_12] : memref<32x1xf32, #tpu.memory_space<vmem>>, vector<32x1xf32>
    %cst_13 = arith.constant dense<0.000000e+00> : vector<3x1xf32>
    %13 = tpu.matmul %11, %12, %cst_13 {dimension_numbers = #tpu.dot_dimension_numbers<[1], [0], [0], [1], [0, 0, 1, 1], [], []>} : vector<3x32xf32>, vector<32x1xf32>, vector<3x1xf32> -> vector<3x1xf32>
    %c0_14 = arith.constant 0 : index
    %c0_15 = arith.constant 0 : index
    %14 = vector.load %arg7[%c0_14, %c0_15] : memref<1x1xf32, #tpu.memory_space<vmem>>, vector<1x1xf32>
    %15 = vector.broadcast %14 : vector<1x1xf32> to vector<3x1xf32>
    %16 = arith.addf %13, %15 : vector<3x1xf32>
    %17 = arith.negf %16 : vector<3x1xf32>
    %18 = math.exp %17 : vector<3x1xf32>
    %cst_16 = arith.constant 1.000000e+00 : f32
    %19 = vector.broadcast %cst_16 : f32 to vector<3x1xf32>
    %20 = arith.addf %19, %18 : vector<3x1xf32>
    %21 = arith.divf %19, %20 : vector<3x1xf32>
    %c0_17 = arith.constant 0 : index
    %c0_18 = arith.constant 0 : index
    %22 = vector.load %arg8[%c0_17, %c0_18] : memref<3x1xf32, #tpu.memory_space<vmem>>, vector<3x1xf32>
    tpu.vector_store %arg8[%c0_17, %c0_18], %21 {strides = array<i32>} : memref<3x1xf32, #tpu.memory_space<vmem>>, vector<3x1xf32>,
    return
  }
  func.func @transform_0(%arg0: i32) -> (i32, i32) {
    %c0_i32 = arith.constant 0 : i32
    %c0_i32_0 = arith.constant 0 : i32
    %c0_i32_1 = arith.constant 0 : i32
    return %c0_i32, %c0_i32_0 : i32, i32
  }
  func.func @transform_1(%arg0: i32) -> (i32, i32) {
    %c0_i32 = arith.constant 0 : i32
    %c0_i32_0 = arith.constant 0 : i32
    %c0_i32_1 = arith.constant 0 : i32
    return %c0_i32, %c0_i32_0 : i32, i32
  }
  func.func @transform_2(%arg0: i32) -> (i32, i32) {
    %c0_i32 = arith.constant 0 : i32
    %c0_i32_0 = arith.constant 0 : i32
    %c0_i32_1 = arith.constant 0 : i32
    return %c0_i32, %c0_i32_0 : i32, i32
  }
  func.func @transform_3(%arg0: i32) -> (i32, i32) {
    %c0_i32 = arith.constant 0 : i32
    %c0_i32_0 = arith.constant 0 : i32
    %c0_i32_1 = arith.constant 0 : i32
    return %c0_i32, %c0_i32_0 : i32, i32
  }
  func.func @transform_4(%arg0: i32) -> (i32, i32) {
    %c0_i32 = arith.constant 0 : i32
    %c0_i32_0 = arith.constant 0 : i32
    %c0_i32_1 = arith.constant 0 : i32
    return %c0_i32, %c0_i32_0 : i32, i32
  }
  func.func @transform_5(%arg0: i32) -> (i32, i32) {
    %c0_i32 = arith.constant 0 : i32
    %c0_i32_0 = arith.constant 0 : i32
    %c0_i32_1 = arith.constant 0 : i32
    return %c0_i32, %c0_i32_0 : i32, i32
  }
  func.func @transform_6(%arg0: i32) -> (i32, i32) {
    %c0_i32 = arith.constant 0 : i32
    %c0_i32_0 = arith.constant 0 : i32
    %c0_i32_1 = arith.constant 0 : i32
    return %c0_i32, %c0_i32_0 : i32, i32
  }
  func.func @transform_7(%arg0: i32) -> (i32, i32) {
    %c0_i32 = arith.constant 0 : i32
    %c0_i32_0 = arith.constant 0 : i32
    %c0_i32_1 = arith.constant 0 : i32
    return %c0_i32, %c0_i32_0 : i32, i32
  }
}

</mosaic_0001>

<bundles_post_ra>
// kernel: gt_tgn_forward.4
= control target key start
LH: loop header
LB: loop body
LE: loop exit
PB: predicated region body
PF: predicated region fallthrough
CT: control target
= control target key end

     0   :  { %s478_s0 = inlined_call_operand.vmem [shape: s32[8], index: 0, kind: input, shape index: {}]   ;;  %s479_s2 = inlined_call_operand.vmem [shape: f32[16,3], index: 2, kind: input, shape index: {}]   ;;  %s480_s3 = inlined_call_operand.vmem [shape: f32[3,96], index: 3, kind: input, shape index: {}]   ;;  %s481_s4 = inlined_call_operand.vmem [shape: f32[1,96], index: 4, kind: input, shape index: {}]   ;;  %s482_s5 = inlined_call_operand.vmem [shape: f32[32,96], index: 5, kind: input, shape index: {}]   ;;  %s483_s6 = inlined_call_operand.vmem [shape: f32[1,96], index: 6, kind: input, shape index: {}]   ;;  %s484_s7 = inlined_call_operand.vmem [shape: f32[16,32], index: 7, kind: output, shape index: {}]   ;;  %s485_s1 = inlined_call_operand.vmem [shape: s32[8], index: 1, kind: input, shape index: {}]  }
   0x1   :  { %s12_s26 = sshll.u32 %s478_s0, 4  ;;  %s16_s29 = sshll.u32 %s485_s1, 4  ;;  %s13_s26 = int_to_ptr.vmem [resolvable:$true] %s12_s26  ;;  %s17_s29 = int_to_ptr.vmem [resolvable:$true] %s16_s29 }
   0x2   :  { %s322_s30 = scalar_lea.vmem %s13_s26, 16  ;;  %p327_p1 = scmp.lt.s32.totalorder %s13_s26, %s13_s26 }
   0x3   :  { %p323_p0 = scmp.ne.s32.totalorder %s13_s26, %s322_s30  ;;  %p328_p2 = scmp.lt.s32.totalorder %s322_s30, %s322_s30 }
   0x5   :  { %p329_p3 = por %p328_p2, %p327_p1 }
   0x7   :  { %p330_p4 = pnand %p329_p3, %p323_p0 }
   0x9   :  { %333 = shalt.err (!%p330_p4)  }
   0xa   :  { %s356_s8 = smov [#allocation4]   ;;  %s334_s9 = scalar_lea.vmem %s17_s29, 16 }
   0xb   :  { %15 = dma.vmem_to_smem %s13_s26, 16, %s356_s8, [#allocation3] }
   0xc   :  { %p335_p5 = scmp.ne.s32.totalorder %s17_s29, %s334_s9  ;;  %p339_p6 = scmp.lt.s32.totalorder %s17_s29, %s17_s29 }
   0xd   :  { %p340_p7 = scmp.lt.s32.totalorder %s334_s9, %s334_s9 }
   0xf   :  { %p341_p8 = por %p340_p7, %p339_p6 }
  0x11   :  { %p342_p9 = pnand %p341_p8, %p335_p5 }
  0x13   :  { %345 = shalt.err (!%p342_p9)  }
  0x14   :  { %s357_s0 = smov [#allocation5]  }
  0x15   :  { %19 = dma.vmem_to_smem %s17_s29, 16, %s357_s0, [#allocation3] }
  0x16   :  { %350 = dma.done.wait [#allocation3], 32 }
  0x17   :  { %351 = vsyncadd [#allocation3], 4294967264 }
  0x18   :  { %21 = sfence }
  0x19   :  { %vm32_vm0 = vcmask 261120   ;;  %v37_v0 = vld [vmem:[%s480_s3] sm:$0x7]  ;;  %vm52_vm1 = vcmask 1042432   ;;  %v358_v2 = vmov 0.0   ;;  %vm45_vm2 = vcmask 23552  }
  0x1a   :  { %v35_v1 = vld [vmem:[%s479_s2] sm:$0xff]  ;;  %33 = vst.msk [vmem:[%s484_s7] sm:$0xff] %vm32_vm0, %v358_v2  ;;  %34 = vst.msk [vmem:[%s484_s7 + $0x8] sm:$0xff] %vm32_vm0, %v358_v2  ;;  %284 = vmatprep.subr.msk.mxu0 %vm52_vm1, %v37_v0  ;;  %v36_v3 = vld [vmem:[%s479_s2 + $0x8] sm:$0xff]  ;;  %vm131_vm3 = vcmask 785408   ;;  %s455_s29 = smov 0  }
  0x1b   :  { %285 = vmatpush3.msk.msra.mxu0 %vm52_vm1, %v37_v0  ;;  %286 = vmatprep.mubr.msk.f32.mxu0 %vm45_vm2, %v35_v1  ;;  %v430_v4 = vld [vmem:[%s482_s5] sm:$0xff]  ;;  %v435_v5 = vld [vmem:[%s482_s5 + $0x8] sm:$0xff]  ;;  %v440_v6 = vld [vmem:[%s482_s5 + $0x10] sm:$0xff] }
  0x1c   :  { %287 = vmatmul.mubr.msk.f32.vlgmr.msra.gmra.mxu0 %vm45_vm2, %v36_v3  ;;  %v445_v7 = vld [vmem:[%s482_s5 + $0x18] sm:$0xff]  ;;  %v450_v8 = vld [vmem:[%s483_s6] sm:$0x1] }
  0x1d   :  { %v270_v9 = vld [vmem:[%s481_s4] ss:$0 sm:$0xff] }
  0xdc   :  { %v288_v10 = vpop.f32.mrf.mxu0 }
  0xdd   :  { %v128_v11 = vadd.f32 %v288_v10, %v270_v9 }
  0xde   :  { %v122_v12 = vpop.f32.mrf.mxu0 }
  0xdf   :  { %133 = vst.msk [vmem:[#allocation2 + $0x8] sm:$0xff] %vm131_vm3, %v128_v11  ;;  %v123_v13 = vadd.f32 %v270_v9, %v122_v12 }
  0xe1   :  { %132 = vst.msk [vmem:[#allocation2] sm:$0xff] %vm131_vm3, %v123_v13 }
  0xe2 LB: > { %v359_v14 = vmov 0.0   ;;  %vm360_vm4 = vmmov 0   ;;  %s146_s4 = sld [smem:[#allocation5 + %s354_s29]]  ;;  %s361_s8 = smov 64   ;;  %vm257_vm5 = vcmask 253952   ;;  %s354_s29 = sphi %s455_s29, %s144_s29  }
  0xe3   : > { %289 = vmatprep.subr.mxu0 %v359_v14  ;;  %297 = vmatprep.mubr.msk.f32.mxu0 %vm360_vm4, %v359_v14  ;;  %s145_s9 = sld [smem:[#allocation4 + %s354_s29]]  ;;  %s362_s1 = smov 96  }
  0xe4   : > { %290 = vmatpush3.msra.mxu0 %v445_v7  ;;  %s363_s10 = smov 32   ;;  %s144_s29 = sadd.s32 1, %s354_s29  }
  0xe5   : > { %291 = vmatprep.subr.mxu0 %v359_v14  ;;  %p141_p10 = scmp.ge.s32.totalorder %s144_s29, 8  }
  0xe6   : > { %292 = vmatpush3.msra.mxu0 %v440_v6 }
  0xe7   : > { %293 = vmatprep.subr.mxu0 %v359_v14 }
  0xe8   : > { %294 = vmatpush3.msra.mxu0 %v435_v5  ;;  %s468_s30 = scalar_lea.vmem %s484_s7, %s146_s4 }
  0xe9   : > { %295 = vmatprep.subr.mxu0 %v359_v14  ;;  %v148_v15 = vld [vmem:[%s468_s30] sm:$0x1]  ;;  %s149_s0 = scalar_lea.vmem [#allocation2], %s145_s9 }
  0xea   : > { %296 = vmatpush3.msra.mxu0 %v430_v4  ;;  %v150_v19 = vld [vmem:[%s149_s0] sm:$0x1] }
  0xeb   : > { %298 = vmatmul.mubr.msk.f32.vlgmr.msra.gmra.mxu0 %vm32_vm0, %v148_v15 }
 0x1ab   : > { %v220_v16 = vpop.f32.mrf.mxu0 }
 0x1ac   : > { %v221_v17 = vadd.f32 %v220_v16, %v450_v8 }
 0x1ad   : > { %v299_v18 = vpop.f32.mrf.mxu0 }
 0x1ae   : > { %232 = vrot.lane.b32.xlu0 %v221_v17, %s361_s8  ;;  %v224_v20 = vadd.f32 %v221_v17, %v150_v19 }
 0x1b0   : > { %v275_v21 = vmul.f32 -1.442695, %v224_v20 }
 0x1b2   : > { %316 = vpow2.f32 %v275_v21 }
 0x1bf   : > { %v317_v22 = vpop.eup %316 }
 0x1c0   : > { %v228_v23 = vadd.f32 1.0, %v317_v22 }
 0x1c2   : > { %318 = vrcp.f32 %v228_v23 }
 0x1cf   : > { %v319_v24 = vpop.eup %318 }
 0x1d0   : > { %v242_v31 = vsub.f32 1.0, %v319_v24 }
 0x220   : > { %v233_v25 = vpop.permute.xlu0 %232 }
 0x221   : > { %v235_v26 = vmul.f32 %v319_v24, %v233_v25 }
 0x223   : > { %237 = vrot.lane.b32.xlu0 %v235_v26, %s361_s8 }
 0x295   : > { %v238_v27 = vpop.permute.xlu0 %237 }
 0x296   : > { %v240_v28 = vadd.f32 %v238_v27, %v150_v19 }
 0x298   : > { %320 = vtanh.f32 %v240_v28 }
 0x2a5   : > { %v321_v29 = vpop.eup %320 }
 0x2a6   : > { %244 = vrot.lane.b32.xlu1 %v321_v29, %s362_s1 }
 0x2aa   : > { %248 = vrot.lane.b32.xlu1 %v148_v15, %s363_s10 }
 0x318   : > { %v245_v30 = vpop.permute.xlu1 %244 }
 0x319   : > { %v247_v33 = vmul.f32 %v245_v30, %v242_v31 }
 0x31c   : > { %v249_v32 = vpop.permute.xlu1 %248 }
 0x31d   : > { %v251_v34 = vmul.f32 %v319_v24, %v249_v32 }
 0x31f   : > { %v252_v35 = vadd.f32 %v251_v34, %v247_v33 }
 0x321   : > { %254 = vrot.lane.b32.xlu0 %v252_v35, %s362_s1 }
 0x390   :  { %143 = sbr.rel (!%p141_p10) target bundleno = 226 (0xe2), region = 49 }
 0x393   : > { %v255_v36 = vpop.permute.xlu0 %254 }
 0x394   : > { %258 = vst.msk [vmem:[%s468_s30] sm:$0x1] %vm257_vm5, %v255_v36 }

// kernel: gt_tgn_forward.5
= control target key start
LH: loop header
LB: loop body
LE: loop exit
PB: predicated region body
PF: predicated region fallthrough
CT: control target
= control target key end

     0   :  { %vm86_vm0 = vcmask 261120   ;;  %vm350_vm1 = vcmask 64512   ;;  %s2114_s27 = smov 120   ;;  %vm440_vm2 = vcmask 130048   ;;  %s2116_s18 = smov 104   ;;  %s2544_s2 = inlined_call_operand.vmem [shape: f32[32,32], index: 2, kind: input, shape index: {}]   ;;  %s2545_s18 = inlined_call_operand.vmem [shape: f32[32,32], index: 18, kind: input, shape index: {}]   ;;  %s2546_s19 = inlined_call_operand.vmem [shape: f32[1,32], index: 19, kind: input, shape index: {}]   ;;  %s2547_s20 = inlined_call_operand.vmem [shape: f32[32,32], index: 20, kind: input, shape index: {}]   ;;  %s2548_s21 = inlined_call_operand.vmem [shape: f32[1,32], index: 21, kind: input, shape index: {}]   ;;  %s2549_s0 = inlined_call_operand.vmem [shape: f32[16,32], index: 0, kind: input, shape index: {}, may-alias: {0,1}]   ;;  %s2550_s4 = inlined_call_operand.vmem [shape: f32[32,32], index: 4, kind: input, shape index: {}]   ;;  %s2551_s1 = inlined_call_operand.vmem [shape: f32[16,32], index: 1, kind: input, shape index: {}, may-alias: {0,1}]   ;;  %s2552_s3 = inlined_call_operand.vmem [shape: f32[1,32], index: 3, kind: input, shape index: {}]   ;;  %s2553_s5 = inlined_call_operand.vmem [shape: f32[1,32], index: 5, kind: input, shape index: {}]   ;;  %s2554_s6 = inlined_call_operand.vmem [shape: f32[32,32], index: 6, kind: input, shape index: {}]   ;;  %s2555_s7 = inlined_call_operand.vmem [shape: f32[1,32], index: 7, kind: input, shape index: {}]   ;;  %s2556_s8 = inlined_call_operand.vmem [shape: f32[32,32], index: 8, kind: input, shape index: {}]   ;;  %s2557_s9 = inlined_call_operand.vmem [shape: f32[1,32], index: 9, kind: input, shape index: {}]   ;;  %s2558_s12 = inlined_call_operand.vmem [shape: f32[32,128], index: 12, kind: input, shape index: {}]   ;;  %s2559_s14 = inlined_call_operand.vmem [shape: f32[128,32], index: 14, kind: input, shape index: {}]   ;;  %s2560_s10 = inlined_call_operand.vmem [shape: f32[1,32], index: 10, kind: input, shape index: {}]   ;;  %s2561_s11 = inlined_call_operand.vmem [shape: f32[1,32], index: 11, kind: input, shape index: {}]   ;;  %s2562_s13 = inlined_call_operand.vmem [shape: f32[1,128], index: 13, kind: input, shape index: {}]   ;;  %s2563_s15 = inlined_call_operand.vmem [shape: f32[1,32], index: 15, kind: input, shape index: {}]   ;;  %s2564_s16 = inlined_call_operand.vmem [shape: f32[1,32], index: 16, kind: input, shape index: {}]   ;;  %s2565_s17 = inlined_call_operand.vmem [shape: f32[1,32], index: 17, kind: input, shape index: {}]   ;;  %s2566_s22 = inlined_call_operand.vmem [shape: f32[16,32], index: 22, kind: output, shape index: {}]  }
   0x1   :  { %2570 = sst [smem:[#allocation2_spill]] %s2544_s2  ;;  %v73_v7 = vld [vmem:[%s2551_s1] sm:$0xff]  ;;  %v74_v11 = vld [vmem:[%s2551_s1 + $0x8] sm:$0xff]  ;;  %v263_v22 = vld [vmem:[%s2554_s6 + $0x18] sm:$0xff] }
   0x2   :  { %2571 = sst [smem:[#allocation3_spill]] %s2549_s0  ;;  %v1780_v13 = vld [vmem:[%s2552_s3] ss:$0 sm:$0xff]  ;;  %v262_v23 = vld [vmem:[%s2554_s6 + $0x10] sm:$0xff]  ;;  %v261_v24 = vld [vmem:[%s2554_s6 + $0x8] sm:$0xff] }
   0x3   :  { %2572 = sst [smem:[#allocation4_spill]] %s2550_s4  ;;  %v1783_v16 = vld [vmem:[%s2553_s5] ss:$0 sm:$0xff] }
   0x4   :  { %s2573_s29 = sld [smem:[#allocation2_spill]]  ;;  %v260_v25 = vld [vmem:[%s2554_s6] sm:$0xff] }
   0x5   :  { %s2574_s23 = sld [smem:[#allocation3_spill]]  ;;  %v1786_v49 = vld [vmem:[%s2555_s7] ss:$0 sm:$0xff]  ;;  %s2115_s7 = smov 112  }
   0x6   :  { %s2575_s20 = sld [smem:[#allocation4_spill]] }
   0xa   :  { %v78_v0 = vld [vmem:[%s2573_s29 + $0x18] sm:$0xff]  ;;  %v77_v1 = vld [vmem:[%s2573_s29 + $0x10] sm:$0xff]  ;;  %v76_v3 = vld [vmem:[%s2573_s29 + $0x8] sm:$0xff] }
   0xb   :  { %1916 = vmatprep.subr.mxu0 %v78_v0  ;;  %v2241_v2 = vld [vmem:[%s2574_s23] sm:$0xff]  ;;  %v2254_v5 = vld [vmem:[%s2574_s23 + $0x8] sm:$0xff] }
   0xc   :  { %1917 = vmatpush3.msra.mxu0 %v78_v0  ;;  %1924 = vmatprep.mubr.msk.f32.mxu0 %vm86_vm0, %v2241_v2  ;;  %v75_v4 = vld [vmem:[%s2573_s29] sm:$0xff]  ;;  %v171_v6 = vld [vmem:[%s2575_s20 + $0x18] sm:$0xff]  ;;  %v170_v8 = vld [vmem:[%s2575_s20 + $0x10] sm:$0xff] }
   0xd   :  { %1918 = vmatprep.subr.mxu0 %v77_v1  ;;  %v169_v9 = vld [vmem:[%s2575_s20 + $0x8] sm:$0xff]  ;;  %v168_v10 = vld [vmem:[%s2575_s20] sm:$0xff] }
   0xe   :  { %1919 = vmatpush3.msra.mxu0 %v77_v1 }
   0xf   :  { %1920 = vmatprep.subr.mxu0 %v76_v3 }
  0x10   :  { %1921 = vmatpush3.msra.mxu0 %v76_v3 }
  0x11   :  { %1922 = vmatprep.subr.mxu0 %v75_v4 }
  0x12   :  { %1923 = vmatpush3.msra.mxu0 %v75_v4 }
  0x13   :  { %1925 = vmatmul.mubr.msk.f32.vlgmr.msra.gmra.mxu0 %vm86_vm0, %v2254_v5  ;;  %1927 = vmatprep.subr.mxu0 %v171_v6 }
  0x14   :  { %1928 = vmatpush3.msra.mxu0 %v171_v6  ;;  %1935 = vmatprep.mubr.msk.f32.mxu0 %vm86_vm0, %v73_v7 }
  0x15   :  { %1929 = vmatprep.subr.mxu0 %v170_v8 }
  0x16   :  { %1930 = vmatpush3.msra.mxu0 %v170_v8 }
  0x17   :  { %1931 = vmatprep.subr.mxu0 %v169_v9 }
  0x18   :  { %1932 = vmatpush3.msra.mxu0 %v169_v9 }
  0x19   :  { %1933 = vmatprep.subr.mxu0 %v168_v10 }
  0x1a   :  { %1934 = vmatpush3.msra.mxu0 %v168_v10 }
  0x1b   :  { %1936 = vmatmul.mubr.msk.f32.vlgmr.msra.gmra.mxu0 %vm86_vm0, %v74_v11  ;;  %1938 = vmatprep.subr.mxu0 %v263_v22 }
  0x1c   :  { %1946 = vmatprep.mubr.msk.f32.mxu0 %vm86_vm0, %v73_v7  ;;  %1939 = vmatpush3.msra.mxu0 %v263_v22 }
  0x1d   :  { %1940 = vmatprep.subr.mxu0 %v262_v23 }
  0x1e   :  { %1941 = vmatpush3.msra.mxu0 %v262_v23 }
  0x1f   :  { %1942 = vmatprep.subr.mxu0 %v261_v24 }
  0x20   :  { %1943 = vmatpush3.msra.mxu0 %v261_v24 }
  0x21   :  { %1944 = vmatprep.subr.mxu0 %v260_v25 }
  0x22   :  { %1945 = vmatpush3.msra.mxu0 %v260_v25 }
  0x23   :  { %1947 = vmatmul.mubr.msk.f32.vlgmr.msra.gmra.mxu0 %vm86_vm0, %v74_v11 }
  0xd3   :  { %v1926_v12 = vpop.f32.mrf.mxu0 }
  0xd4   :  { %v2291_v17 = vadd.f32 %v1926_v12, %v1780_v13 }
  0xd5   :  { %v159_v14 = vpop.f32.mrf.mxu0 }
  0xd6   :  { %v2282_v15 = vadd.f32 %v1780_v13, %v159_v14 }
  0xd8   :  { %544 = vrot.lane.b32.xlu1 %v2282_v15, %s2114_s27  ;;  %1953 = vmatprep.mubr.msk.f32.mxu1 %vm350_vm1, %v2282_v15 }
  0xdb   :  { %v1937_v18 = vpop.f32.mrf.mxu0 }
  0xdc   :  { %v2293_v19 = vadd.f32 %v1937_v18, %v1783_v16  ;;  %546 = vrot.lane.b32.xlu1 %v2291_v17, %s2114_s27 }
  0xdd   :  { %v251_v20 = vpop.f32.mrf.mxu0 }
  0xde   :  { %v2297_v21 = vadd.f32 %v1783_v16, %v251_v20  ;;  %550 = vrot.lane.b32.xlu0 %v2293_v19, %s2114_s27  ;;  %1949 = vmatprep.subr.msk.mxu1 %vm350_vm1, %v2293_v19  ;;  %v347_v16 = vld [vmem:[%s2556_s8 + $0x8] sm:$0xff]  ;;  %v346_v20 = vld [vmem:[%s2556_s8] sm:$0xff] }
  0xdf   :  { %1950 = vmatpush3.xpose.msk.msra.mxu1 %vm350_vm1, %v2293_v19 }
  0xe0   :  { %1951 = vmatprep.subr.msk.mxu1 %vm350_vm1, %v2297_v21 }
  0xe2   :  { %548 = vrot.lane.b32.xlu0 %v2297_v21, %s2114_s27 }
  0xe3   :  { %1952 = vmatpush3.xpose.msk.msra.mxu1 %vm350_vm1, %v2297_v21  ;;  %v1948_v48 = vpop.f32.mrf.mxu0 }
  0xe4   :  { %v2339_v50 = vadd.f32 %v1948_v48, %v1786_v49 }
  0xe5   :  { %v337_v55 = vpop.f32.mrf.mxu0 }
  0xe6   :  { %1954 = vmatmul.mubr.msk.f32.vlgmr.msra.gmra.mxu1 %vm350_vm1, %v2291_v17  ;;  %1956 = vmatprep.subr.mxu0 %v2339_v50  ;;  %v2345_v56 = vadd.f32 %v1786_v49, %v337_v55 }
  0xe7   :  { %1957 = vmatpush3.msra.mxu0 %v2339_v50 }
  0xe8   :  { %1958 = vmatprep.subr.mxu0 %v2345_v56 }
  0xe9   :  { %1959 = vmatpush3.msra.mxu0 %v2345_v56 }
 0x14a   :  { %v545_v26 = vpop.permute.xlu1 %544 }
 0x14b   :  { %1967 = vmatprep.mubr.msk.f32.mxu1 %vm350_vm1, %v545_v26 }
 0x14e   :  { %v547_v29 = vpop.permute.xlu1 %546 }
 0x150   :  { %v551_v27 = vpop.permute.xlu0 %550 }
 0x151   :  { %1963 = vmatprep.subr.msk.mxu1 %vm350_vm1, %v551_v27 }
 0x152   :  { %1964 = vmatpush3.xpose.msk.msra.mxu1 %vm350_vm1, %v551_v27 }
 0x154   :  { %v549_v28 = vpop.permute.xlu0 %548 }
 0x155   :  { %1965 = vmatprep.subr.msk.mxu1 %vm350_vm1, %v549_v28 }
 0x156   :  { %1966 = vmatpush3.xpose.msk.msra.mxu1 %vm350_vm1, %v549_v28 }
 0x159   :  { %1968 = vmatmul.mubr.msk.f32.vlgmr.msra.gmra.mxu1 %vm350_vm1, %v547_v29 }
 0x1a6   :  { %v1955_v30 = vpop.f32.mrf.mxu1 }
 0x1a7   :  { %v439_v31 = vmul.f32 0.35355338, %v1955_v30 }
 0x1a8   :  { %v429_v32 = vpop.f32.mrf.mxu1 }
 0x1a9   :  { %v438_v33 = vmul.f32 0.35355338, %v429_v32  ;;  %v444_v34 = vsel %vm440_vm2, %v439_v31, -inf }
 0x1aa   :  { %445 = vmax.xlane.f32.xlu1 %v444_v34 }
 0x1ab   :  { %v441_v35 = vsel %vm440_vm2, %v438_v33, -inf }
 0x1ac   :  { %442 = vmax.xlane.f32.xlu0 %v441_v35 }
 0x219   :  { %v1969_v36 = vpop.f32.mrf.mxu1 }
 0x21a   :  { %v636_v39 = vmul.f32 0.35355338, %v1969_v36 }
 0x21b   :  { %v626_v37 = vpop.f32.mrf.mxu1 }
 0x21c   :  { %v635_v38 = vmul.f32 0.35355338, %v626_v37  ;;  %v640_v41 = vsel %vm440_vm2, %v636_v39, -inf }
 0x21e   :  { %v637_v40 = vsel %vm440_vm2, %v635_v38, -inf }
 0x21f   :  { %638 = vmax.xlane.f32.xlu0 %v637_v40 }
 0x223   :  { %641 = vmax.xlane.f32.xlu0 %v640_v41 }
 0x233   :  { %v446_v42 = vpop.xlane.xlu1 %445 }
 0x234   :  { %v448_v43 = vsub.f32 %v439_v31, %v446_v42 }
 0x235   :  { %v443_v44 = vpop.xlane.xlu0 %442 }
 0x236   :  { %v451_v45 = vmul.f32 1.442695, %v448_v43  ;;  %v447_v46 = vsub.f32 %v438_v33, %v443_v44 }
 0x238   :  { %2074 = vpow2.f32 %v451_v45  ;;  %v449_v47 = vmul.f32 1.442695, %v447_v46 }
 0x23a   :  { %2076 = vpow2.f32 %v449_v47 }
 0x245   :  { %v2075_v51 = vpop.eup %2074 }
 0x246   :  { %v456_v52 = vsel %vm440_vm2, %v2075_v51, 0.0 }
 0x247   :  { %v2077_v53 = vpop.eup %2076  ;;  %457 = vadd.xlane.f32.xlu0 %v456_v52 }
 0x248   :  { %v453_v54 = vsel %vm440_vm2, %v2077_v53, 0.0 }
 0x249   :  { %454 = vadd.xlane.f32.xlu1 %v453_v54 }
 0x2a8   :  { %v639_v57 = vpop.xlane.xlu0 %638 }
 0x2a9   :  { %v643_v58 = vsub.f32 %v635_v38, %v639_v57 }
 0x2ab   :  { %v645_v59 = vmul.f32 1.442695, %v643_v58 }
 0x2ac   :  { %v642_v60 = vpop.xlane.xlu0 %641 }
 0x2ad   :  { %2078 = vpow2.f32 %v645_v59  ;;  %v644_v61 = vsub.f32 %v636_v39, %v642_v60 }
 0x2af   :  { %v647_v62 = vmul.f32 1.442695, %v644_v61 }
 0x2b1   :  { %2080 = vpow2.f32 %v647_v62 }
 0x2ba   :  { %v2079_v63 = vpop.eup %2078 }
 0x2bb   :  { %v649_v0 = vsel %vm440_vm2, %v2079_v63, 0.0 }
 0x2bc   :  { %650 = vadd.xlane.f32.xlu1 %v649_v0 }
 0x2be   :  { %v2081_v1 = vpop.eup %2080 }
 0x2bf   :  { %v652_v3 = vsel %vm440_vm2, %v2081_v1, 0.0 }
 0x2c0   :  { %653 = vadd.xlane.f32.xlu0 %v652_v3 }
 0x2cd   :  { %663 = vrot.lane.b32.xlu1 %v2339_v50, %s2114_s27 }
 0x2d0   :  { %v458_v4 = vpop.xlane.xlu0 %457 }
 0x2d1   :  { %916 = vrot.lane.b32.xlu1 %v2293_v19, %s2115_s7  ;;  %2082 = vrcp.f32 %v458_v4 }
 0x2d2   :  { %v455_v6 = vpop.xlane.xlu1 %454 }
 0x2d3   :  { %2084 = vrcp.f32 %v455_v6 }
 0x2d5   :  { %914 = vrot.lane.b32.xlu1 %v2297_v21, %s2115_s7 }
 0x2d6   :  { %661 = vrot.lane.b32.xlu0 %v2345_v56, %s2114_s27 }
 0x2d9   :  { %912 = vrot.lane.b32.xlu1 %v2291_v17, %s2115_s7 }
 0x2da   :  { %910 = vrot.lane.b32.xlu0 %v2282_v15, %s2115_s7 }
 0x2dd   :  { %1199 = vrot.lane.b32.xlu1 %v2297_v21, %s2116_s18 }
 0x2de   :  { %1201 = vrot.lane.b32.xlu0 %v2293_v19, %s2116_s18  ;;  %v2083_v7 = vpop.eup %2082 }
 0x2df   :  { %v462_v10 = vmul.f32 %v2083_v7, %v2075_v51 }
 0x2e0   :  { %v2085_v8 = vpop.eup %2084 }
 0x2e1   :  { %1197 = vrot.lane.b32.xlu1 %v2291_v17, %s2116_s18  ;;  %v461_v9 = vmul.f32 %v2085_v8, %v2077_v53 }
 0x2e2   :  { %1195 = vrot.lane.b32.xlu0 %v2282_v15, %s2116_s18 }
 0x2e3   :  { %1960 = vmatprep.mubr.msk.f32.mxu0 %vm440_vm2, %v461_v9 }
 0x2e4   :  { %1961 = vmatmul.mubr.msk.f32.vlgmr.msra.gmra.mxu0 %vm440_vm2, %v462_v10  ;;  %v348_v10 = vld [vmem:[%s2556_s8 + $0x10] sm:$0xff] }
 0x345   :  { %v651_v11 = vpop.xlane.xlu1 %650 }
 0x346   :  { %2086 = vrcp.f32 %v651_v11 }
 0x349   :  { %v664_v12 = vpop.permute.xlu1 %663  ;;  %v654_v13 = vpop.xlane.xlu0 %653 }
 0x34a   :  { %2088 = vrcp.f32 %v654_v13  ;;  %1970 = vmatprep.subr.mxu0 %v664_v12 }
 0x34b   :  { %1971 = vmatpush3.msra.mxu0 %v664_v12 }
 0x34d   :  { %v662_v14 = vpop.permute.xlu0 %661  ;;  %v917_v23 = vpop.permute.xlu1 %916 }
 0x34e   :  { %1972 = vmatprep.subr.mxu0 %v662_v14 }
 0x34f   :  { %1973 = vmatpush3.msra.mxu0 %v662_v14 }
 0x350   :  { %1977 = vmatprep.subr.mxu0 %v347_v16 }
 0x351   :  { %v911_v26 = vpop.permute.xlu0 %910  ;;  %v915_v27 = vpop.permute.xlu1 %914 }
 0x353   :  { %v2087_v15 = vpop.eup %2086 }
 0x354   :  { %v657_v17 = vmul.f32 %v2087_v15, %v2079_v63 }
 0x355   :  { %v1202_v28 = vpop.permute.xlu0 %1201  ;;  %v913_v29 = vpop.permute.xlu1 %912 }
 0x356   :  { %1974 = vmatprep.mubr.msk.f32.mxu0 %vm440_vm2, %v657_v17 }
 0x357   :  { %v2089_v18 = vpop.eup %2088 }
 0x358   :  { %v658_v19 = vmul.f32 %v2089_v18, %v2081_v1 }
 0x359   :  { %v1196_v30 = vpop.permute.xlu0 %1195  ;;  %v1200_v31 = vpop.permute.xlu1 %1199 }
 0x35a   :  { %1975 = vmatmul.mubr.msk.f32.vlgmr.msra.gmra.mxu0 %vm440_vm2, %v658_v19 }
 0x35b   :  { %1978 = vmatpush3.msra.mxu0 %v347_v16 }
 0x35c   :  { %1982 = vmatprep.subr.mxu0 %v346_v20 }
 0x35d   :  { %v1198_v32 = vpop.permute.xlu1 %1197 }
 0x3a4   :  { %v1962_v21 = vpop.f32.mrf.mxu0 }
 0x3a6   :  { %v535_v22 = vpop.f32.mrf.mxu0 }
 0x41a   :  { %v1976_v24 = vpop.f32.mrf.mxu0 }
 0x41c   :  { %v739_v25 = vpop.f32.mrf.mxu0 }
 0x41d   :  { %1979 = vmatprep.mubr.msk.f32.mxu0 %vm350_vm1, %v739_v25 }
 0x41e   :  { %1980 = vmatmul.mubr.msk.f32.vlgmr.msra.gmra.mxu0 %vm350_vm1, %v1976_v24 }
 0x41f   :  { %1983 = vmatpush3.msra.mxu0 %v346_v20  ;;  %1984 = vmatprep.mubr.msk.f32.mxu0 %vm350_vm1, %v535_v22 }
 0x420   :  { %1987 = vmatprep.subr.msk.mxu0 %vm350_vm1, %v917_v23 }
 0x422   :  { %1985 = vmatmul.mubr.msk.f32.vlgmr.msra.gmra.mxu0 %vm350_vm1, %v1962_v21 }
 0x423   :  { %1988 = vmatpush3.xpose.msk.msra.mxu0 %vm350_vm1, %v917_v23  ;;  %1991 = vmatprep.mubr.msk.f32.mxu0 %vm350_vm1, %v911_v26 }
 0x424   :  { %1989 = vmatprep.subr.msk.mxu0 %vm350_vm1, %v915_v27 }
 0x427   :  { %1990 = vmatpush3.xpose.msk.msra.mxu0 %vm350_vm1, %v915_v27 }
 0x428   :  { %2006 = vmatprep.subr.msk.mxu0 %vm350_vm1, %v1202_v28 }
 0x42a   :  { %1992 = vmatmul.mubr.msk.f32.vlgmr.msra.gmra.mxu0 %vm350_vm1, %v913_v29 }
 0x42b   :  { %2007 = vmatpush3.xpose.msk.msra.mxu0 %vm350_vm1, %v1202_v28  ;;  %2010 = vmatprep.mubr.msk.f32.mxu0 %vm350_vm1, %v1196_v30 }
 0x42c   :  { %2008 = vmatprep.subr.msk.mxu0 %vm350_vm1, %v1200_v31 }
 0x42f   :  { %2009 = vmatpush3.xpose.msk.msra.mxu0 %vm350_vm1, %v1200_v31 }
 0x432   :  { %2011 = vmatmul.mubr.msk.f32.vlgmr.msra.gmra.mxu0 %vm350_vm1, %v1198_v32 }
 0x4de   :  { %v1981_v33 = vpop.f32.mrf.mxu0 }
 0x4e0   :  { %v820_v34 = vpop.f32.mrf.mxu0 }
 0x4e2   :  { %v1986_v35 = vpop.f32.mrf.mxu0 }
 0x4e3   :  { %v2397_v36 = vadd.f32 %v1986_v35, %v1981_v33 }
 0x4e4   :  { %v901_v37 = vpop.f32.mrf.mxu0 }
 0x4e5   :  { %v2399_v38 = vadd.f32 %v901_v37, %v820_v34  ;;  %v1821_v37 = vld [vmem:[%s2557_s9] ss:$0 sm:$0xff] }
 0x4ea   :  { %v1993_v39 = vpop.f32.mrf.mxu0 }
 0x4eb   :  { %v1002_v40 = vmul.f32 0.35355338, %v1993_v39 }
 0x4ec   :  { %v992_v41 = vpop.f32.mrf.mxu0 }
 0x4ed   :  { %v1001_v42 = vmul.f32 0.35355338, %v992_v41  ;;  %v1006_v43 = vsel %vm440_vm2, %v1002_v40, -inf }
 0x4ee   :  { %1007 = vmax.xlane.f32.xlu1 %v1006_v43 }
 0x4ef   :  { %v1003_v44 = vsel %vm440_vm2, %v1001_v42, -inf }
 0x4f0   :  { %1004 = vmax.xlane.f32.xlu0 %v1003_v44 }
 0x4f2   :  { %v2012_v45 = vpop.f32.mrf.mxu0 }
 0x4f3   :  { %v1287_v3 = vmul.f32 0.35355338, %v2012_v45 }
 0x4f4   :  { %v1277_v46 = vpop.f32.mrf.mxu0 }
 0x4f5   :  { %v1286_v47 = vmul.f32 0.35355338, %v1277_v46  ;;  %v1291_v6 = vsel %vm440_vm2, %v1287_v3, -inf }
 0x4f7   :  { %v1288_v48 = vsel %vm440_vm2, %v1286_v47, -inf }
 0x4ff   :  { %1027 = vrot.lane.b32.xlu1 %v2339_v50, %s2115_s7 }
 0x523   :  { %1289 = vmax.xlane.f32.xlu1 %v1288_v48 }
 0x577   :  { %v1008_v49 = vpop.xlane.xlu1 %1007 }
 0x578   :  { %v1010_v51 = vsub.f32 %v1002_v40, %v1008_v49 }
 0x579   :  { %v1005_v52 = vpop.xlane.xlu0 %1004 }
 0x57a   :  { %v1013_v53 = vmul.f32 1.442695, %v1010_v51  ;;  %v1009_v54 = vsub.f32 %v1001_v42, %v1005_v52 }
 0x57b   :  { %v1028_v55 = vpop.permute.xlu1 %1027 }
 0x57c   :  { %2090 = vpow2.f32 %v1013_v53  ;;  %v1011_v57 = vmul.f32 1.442695, %v1009_v54  ;;  %1994 = vmatprep.subr.mxu1 %v1028_v55 }
 0x57d   :  { %1995 = vmatpush3.msra.mxu1 %v1028_v55  ;;  %v1539_v55 = vld [vmem:[%s2558_s12 + $0x18] sm:$0xff] }
 0x57e   :  { %2092 = vpow2.f32 %v1011_v57  ;;  %v1538_v57 = vld [vmem:[%s2558_s12 + $0x10] sm:$0xff]  ;;  %2025 = vmatprep.subr.mxu0 %v1539_v55 }
 0x57f   :  { %2026 = vmatpush3.msra.mxu0 %v1539_v55 }
 0x580   :  { %2027 = vmatprep.subr.mxu0 %v1538_v57 }
 0x581   :  { %2028 = vmatpush3.msra.mxu0 %v1538_v57 }
 0x589   :  { %v2091_v58 = vpop.eup %2090 }
 0x58a   :  { %v1018_v59 = vsel %vm440_vm2, %v2091_v58, 0.0 }
 0x58b   :  { %v2093_v60 = vpop.eup %2092  ;;  %1019 = vadd.xlane.f32.xlu0 %v1018_v59  ;;  %v1536_v59 = vld [vmem:[%s2558_s12] sm:$0xff] }
 0x58c   :  { %v1015_v61 = vsel %vm440_vm2, %v2093_v60, 0.0 }
 0x58f   :  { %1016 = vadd.xlane.f32.xlu0 %v1015_v61  ;;  %v1644_v61 = vld [vmem:[%s2559_s14 + $0x70] sm:$0xff] }
 0x5a5   :  { %1025 = vrot.lane.b32.xlu0 %v2345_v56, %s2115_s7 }
 0x5ac   :  { %v1290_v62 = vpop.xlane.xlu1 %1289 }
 0x5ad   :  { %v1294_v63 = vsub.f32 %v1286_v47, %v1290_v62  ;;  %v1643_v62 = vld [vmem:[%s2559_s14 + $0x68] sm:$0xff] }
 0x5af   :  { %v1296_v0 = vmul.f32 1.442695, %v1294_v63  ;;  %v1642_v63 = vld [vmem:[%s2559_s14 + $0x60] sm:$0xff] }
 0x5b1   :  { %2094 = vpow2.f32 %v1296_v0  ;;  %v1641_v0 = vld [vmem:[%s2559_s14 + $0x58] sm:$0xff] }
 0x5be   :  { %v2095_v1 = vpop.eup %2094 }
 0x5bf   :  { %v1300_v4 = vsel %vm440_vm2, %v2095_v1, 0.0 }
 0x5c0   :  { %1301 = vadd.xlane.f32.xlu1 %v1300_v4  ;;  %v1638_v4 = vld [vmem:[%s2559_s14 + $0x40] sm:$0xff] }
 0x5c4   :  { %1292 = vmax.xlane.f32.xlu0 %v1291_v6  ;;  %v1637_v6 = vld [vmem:[%s2559_s14 + $0x38] sm:$0xff] }
 0x5d1   :  { %1312 = vrot.lane.b32.xlu1 %v2339_v50, %s2116_s18 }
 0x614   :  { %v1020_v7 = vpop.xlane.xlu0 %1019 }
 0x615   :  { %2096 = vrcp.f32 %v1020_v7  ;;  %v1636_v7 = vld [vmem:[%s2559_s14 + $0x30] sm:$0xff] }
 0x618   :  { %v1017_v8 = vpop.xlane.xlu0 %1016 }
 0x619   :  { %2098 = vrcp.f32 %v1017_v8  ;;  %v1635_v8 = vld [vmem:[%s2559_s14 + $0x28] sm:$0xff] }
 0x61c   :  { %v1026_v9 = vpop.permute.xlu0 %1025 }
 0x61d   :  { %1996 = vmatprep.subr.mxu1 %v1026_v9 }
 0x61e   :  { %1997 = vmatpush3.msra.mxu1 %v1026_v9  ;;  %v1634_v9 = vld [vmem:[%s2559_s14 + $0x20] sm:$0xff] }
 0x61f   :  { %2001 = vmatprep.subr.mxu1 %v348_v10 }
 0x622   :  { %v2097_v11 = vpop.eup %2096 }
 0x623   :  { %v1024_v14 = vmul.f32 %v2097_v11, %v2091_v58  ;;  %v1537_v58 = vld [vmem:[%s2558_s12 + $0x8] sm:$0xff] }
 0x624   :  { %2029 = vmatprep.subr.mxu0 %v1537_v58 }
 0x625   :  { %2030 = vmatpush3.msra.mxu0 %v1537_v58 }
 0x626   :  { %v2099_v12 = vpop.eup %2098  ;;  %2031 = vmatprep.subr.mxu0 %v1536_v59 }
 0x627   :  { %v1023_v13 = vmul.f32 %v2099_v12, %v2093_v60  ;;  %2032 = vmatpush3.msra.mxu0 %v1536_v59  ;;  %v1645_v60 = vld [vmem:[%s2559_s14 + $0x78] sm:$0xff] }
 0x629   :  { %1998 = vmatprep.mubr.msk.f32.mxu1 %vm440_vm2, %v1023_v13 }
 0x62a   :  { %1999 = vmatmul.mubr.msk.f32.vlgmr.msra.gmra.mxu1 %vm440_vm2, %v1024_v14 }
 0x62b   :  { %2002 = vmatpush3.msra.mxu1 %v348_v10 }
 0x649   :  { %v1302_v50 = vpop.xlane.xlu1 %1301 }
 0x64d   :  { %v1313_v16 = vpop.permute.xlu1 %1312  ;;  %v1293_v15 = vpop.xlane.xlu0 %1292 }
 0x64e   :  { %v1295_v17 = vsub.f32 %v1287_v3, %v1293_v15  ;;  %2013 = vmatprep.subr.mxu1 %v1313_v16  ;;  %v1639_v3 = vld [vmem:[%s2559_s14 + $0x48] sm:$0xff]  ;;  %v1822_v15 = vld [vmem:[%s2560_s10] ss:$0 sm:$0xff] }
 0x650   :  { %v1298_v18 = vmul.f32 1.442695, %v1295_v17 }
 0x652   :  { %2100 = vpow2.f32 %v1298_v18 }
 0x653   :  { %2102 = vrcp.f32 %v1302_v50 }
 0x65f   :  { %v2101_v19 = vpop.eup %2100 }
 0x660   :  { %v1303_v20 = vsel %vm440_vm2, %v2101_v19, 0.0  ;;  %v2103_v21 = vpop.eup %2102 }
 0x661   :  { %1304 = vadd.xlane.f32.xlu0 %v1303_v20  ;;  %v1308_v25 = vmul.f32 %v2103_v21, %v2095_v1  ;;  %v1640_v1 = vld [vmem:[%s2559_s14 + $0x50] sm:$0xff]  ;;  %v1823_v21 = vld [vmem:[%s2561_s11] ss:$0 sm:$0xff] }
 0x677   :  { %1310 = vrot.lane.b32.xlu0 %v2345_v56, %s2116_s18  ;;  %v349_v56 = vld [vmem:[%s2556_s8 + $0x18] sm:$0xff] }
 0x6ea   :  { %v2000_v22 = vpop.f32.mrf.mxu1  ;;  %v1305_v23 = vpop.xlane.xlu0 %1304 }
 0x6eb   :  { %2104 = vrcp.f32 %v1305_v23 }
 0x6ec   :  { %v1103_v24 = vpop.f32.mrf.mxu1 }
 0x6ed   :  { %2003 = vmatprep.mubr.msk.f32.mxu1 %vm350_vm1, %v1103_v24 }
 0x6ee   :  { %2004 = vmatmul.mubr.msk.f32.vlgmr.msra.gmra.mxu1 %vm350_vm1, %v2000_v22  ;;  %v1311_v26 = vpop.permute.xlu0 %1310 }
 0x6ef   :  { %2014 = vmatpush3.msra.mxu1 %v1313_v16  ;;  %2017 = vmatprep.mubr.msk.f32.mxu1 %vm440_vm2, %v1308_v25  ;;  %v1633_v25 = vld [vmem:[%s2559_s14 + $0x18] sm:$0xff] }
 0x6f0   :  { %2015 = vmatprep.subr.mxu1 %v1311_v26 }
 0x6f1   :  { %2016 = vmatpush3.msra.mxu1 %v1311_v26  ;;  %v1632_v26 = vld [vmem:[%s2559_s14 + $0x10] sm:$0xff] }
 0x6f2   :  { %2020 = vmatprep.subr.mxu1 %v349_v56 }
 0x6f8   :  { %v2105_v27 = vpop.eup %2104 }
 0x6f9   :  { %v1309_v28 = vmul.f32 %v2105_v27, %v2101_v19  ;;  %v1631_v27 = vld [vmem:[%s2559_s14 + $0x8] sm:$0xff] }
 0x6fb   :  { %2018 = vmatmul.mubr.msk.f32.vlgmr.msra.gmra.mxu1 %vm440_vm2, %v1309_v28  ;;  %v1630_v28 = vld [vmem:[%s2559_s14] sm:$0xff] }
 0x6fc   :  { %2021 = vmatpush3.msra.mxu1 %v349_v56  ;;  %v1824_v56 = vld [vmem:[%s2562_s13] ss:$0 sm:$0xff] }
 0x6fd   :  { %2036 = vmatprep.subr.mxu1 %v1645_v60 }
 0x7ae   :  { %v2005_v29 = vpop.f32.mrf.mxu1 }
 0x7af   :  { %v1194_v30 = vadd.f32 %v2005_v29, %v2397_v36 }
 0x7b0   :  { %v1184_v31 = vpop.f32.mrf.mxu1 }
 0x7b1   :  { %v1193_v32 = vadd.f32 %v1184_v31, %v2399_v38 }
 0x7bb   :  { %v2019_v33 = vpop.f32.mrf.mxu1 }
 0x7bd   :  { %v1388_v34 = vpop.f32.mrf.mxu1 }
 0x7be   :  { %2022 = vmatprep.mubr.msk.f32.mxu1 %vm350_vm1, %v1388_v34 }
 0x7bf   :  { %2023 = vmatmul.mubr.msk.f32.vlgmr.msra.gmra.mxu1 %vm350_vm1, %v2019_v33 }
 0x7c0   :  { %2037 = vmatpush3.msra.mxu1 %v1645_v60 }
 0x7c1   :  { %2038 = vmatprep.subr.mxu1 %v1644_v61 }
 0x7c2   :  { %2039 = vmatpush3.msra.mxu1 %v1644_v61  ;;  %v1828_v61 = vld [vmem:[%s2564_s16] ss:$0 sm:$0xff] }
 0x7c3   :  { %2040 = vmatprep.subr.mxu1 %v1643_v62 }
 0x7c4   :  { %2041 = vmatpush3.msra.mxu1 %v1643_v62 }
 0x7c5   :  { %2042 = vmatprep.subr.mxu1 %v1642_v63 }
 0x7c6   :  { %2043 = vmatpush3.msra.mxu1 %v1642_v63 }
 0x7c7   :  { %2044 = vmatprep.subr.mxu1 %v1641_v0 }
 0x7c8   :  { %2045 = vmatpush3.msra.mxu1 %v1641_v0  ;;  %v1829_v0 = vld [vmem:[%s2565_s17] ss:$0 sm:$0xff] }
 0x7c9   :  { %2046 = vmatprep.subr.mxu1 %v1640_v1 }
 0x7ca   :  { %2047 = vmatpush3.msra.mxu1 %v1640_v1 }
 0x7cb   :  { %2048 = vmatprep.subr.mxu1 %v1639_v3 }
 0x7cc   :  { %2049 = vmatpush3.msra.mxu1 %v1639_v3 }
 0x7cd   :  { %2050 = vmatprep.subr.mxu1 %v1638_v4 }
 0x7ce   :  { %2051 = vmatpush3.msra.mxu1 %v1638_v4 }
 0x7cf   :  { %2052 = vmatprep.subr.mxu1 %v1637_v6 }
 0x7d0   :  { %2053 = vmatpush3.msra.mxu1 %v1637_v6 }
 0x7d1   :  { %2054 = vmatprep.subr.mxu1 %v1636_v7 }
 0x7d2   :  { %2055 = vmatpush3.msra.mxu1 %v1636_v7 }
 0x7d3   :  { %2056 = vmatprep.subr.mxu1 %v1635_v8 }
 0x7d4   :  { %2057 = vmatpush3.msra.mxu1 %v1635_v8 }
 0x7d5   :  { %2058 = vmatprep.subr.mxu1 %v1634_v9 }
 0x7d6   :  { %2059 = vmatpush3.msra.mxu1 %v1634_v9 }
 0x7d7   :  { %2060 = vmatprep.subr.mxu1 %v1633_v25 }
 0x7d8   :  { %2061 = vmatpush3.msra.mxu1 %v1633_v25 }
 0x7d9   :  { %2062 = vmatprep.subr.mxu1 %v1632_v26 }
 0x7da   :  { %2063 = vmatpush3.msra.mxu1 %v1632_v26 }
 0x7db   :  { %2064 = vmatprep.subr.mxu1 %v1631_v27 }
 0x7dc   :  { %2065 = vmatpush3.msra.mxu1 %v1631_v27 }
 0x7dd   :  { %2066 = vmatprep.subr.mxu1 %v1630_v28 }
 0x7de   :  { %2067 = vmatpush3.msra.mxu1 %v1630_v28 }
 0x87f   :  { %v2024_v35 = vpop.f32.mrf.mxu1 }
 0x880   :  { %v1479_v39 = vadd.f32 %v2024_v35, %v1194_v30  ;;  %v1827_v35 = vld [vmem:[%s2563_s15] ss:$0 sm:$0xff] }
 0x881   :  { %v1469_v40 = vpop.f32.mrf.mxu1 }
 0x882   :  { %v1488_v41 = vadd.f32 %v1821_v37, %v1479_v39  ;;  %v1478_v42 = vadd.f32 %v1469_v40, %v1193_v32 }
 0x884   :  { %v1487_v43 = vadd.f32 %v1821_v37, %v1478_v42  ;;  %v1490_v36 = vadd.f32 %v1488_v41, %v2254_v5 }
 0x886   :  { %v1496_v38 = vsel %vm86_vm0, %v1490_v36, 0.0  ;;  %v1489_v44 = vadd.f32 %v1487_v43, %v2241_v2 }
 0x887   :  { %1497 = vadd.xlane.f32.xlu0 %v1496_v38 }
 0x888   :  { %v1493_v45 = vsel %vm86_vm0, %v1489_v44, 0.0 }
 0x889   :  { %1494 = vadd.xlane.f32.xlu1 %v1493_v45 }
 0x910   :  { %v1498_v46 = vpop.xlane.xlu0 %1497 }
 0x911   :  { %v1501_v47 = vmul.f32 0.03125, %v1498_v46 }
 0x912   :  { %v1495_v48 = vpop.xlane.xlu1 %1494 }
 0x913   :  { %v2440_v49 = vsub.f32 %v1490_v36, %v1501_v47  ;;  %v1500_v51 = vmul.f32 0.03125, %v1495_v48 }
 0x915   :  { %v2442_v52 = vsub.f32 %v1489_v44, %v1500_v51  ;;  %v1505_v53 = vmul.f32 %v2440_v49, %v2440_v49 }
 0x917   :  { %v1509_v5 = vsel %vm86_vm0, %v1505_v53, 0.0  ;;  %v1504_v2 = vmul.f32 %v2442_v52, %v2442_v52 }
 0x918   :  { %1510 = vadd.xlane.f32.xlu0 %v1509_v5 }
 0x919   :  { %v1506_v54 = vsel %vm86_vm0, %v1504_v2, 0.0 }
 0x91a   :  { %1507 = vadd.xlane.f32.xlu1 %v1506_v54 }
 0x9a1   :  { %v1511_v10 = vpop.xlane.xlu0 %1510 }
 0x9a2   :  { %v1513_v11 = vmul.f32 0.03125, %v1511_v10 }
 0x9a3   :  { %v1508_v12 = vpop.xlane.xlu1 %1507 }
 0x9a4   :  { %v1515_v13 = vadd.f32 1e-05, %v1513_v11  ;;  %v1512_v14 = vmul.f32 0.03125, %v1508_v12 }
 0x9a6   :  { %2106 = vrsqrt.f32 %v1515_v13  ;;  %v1514_v50 = vadd.f32 1e-05, %v1512_v14 }
 0x9a8   :  { %2108 = vrsqrt.f32 %v1514_v50 }
 0x9b3   :  { %v2107_v16 = vpop.eup %2106 }
 0x9b4   :  { %v1519_v17 = vmul.f32 %v2107_v16, %v2440_v49 }
 0x9b5   :  { %v2109_v18 = vpop.eup %2108 }
 0x9b6   :  { %v1518_v19 = vmul.f32 %v2109_v18, %v2442_v52  ;;  %v1527_v20 = vmul.f32 %v1822_v15, %v1519_v17 }
 0x9b8   :  { %v1526_v22 = vmul.f32 %v1822_v15, %v1518_v19  ;;  %v1535_v24 = vadd.f32 %v1823_v21, %v1527_v20 }
 0x9ba   :  { %v1534_v23 = vadd.f32 %v1823_v21, %v1526_v22 }
 0x9bc   :  { %2033 = vmatprep.mubr.msk.f32.mxu0 %vm86_vm0, %v1534_v23 }
 0x9bd   :  { %2034 = vmatmul.mubr.msk.f32.vlgmr.msra.gmra.mxu0 %vm86_vm0, %v1535_v24 }
 0xa7d   :  { %v2035_v29 = vpop.f32.mrf.mxu0 }
 0xa7e   :  { %v1625_v30 = vadd.f32 %v2035_v29, %v1824_v56 }
 0xa7f   :  { %v1619_v31 = vpop.f32.mrf.mxu0 }
 0xa80   :  { %v1620_v32 = vadd.f32 %v1824_v56, %v1619_v31  ;;  %v1629_v34 = vmax.f32 %v1625_v30, 0.0 }
 0xa82   :  { %v1628_v33 = vmax.f32 %v1620_v32, 0.0 }
 0xa84   :  { %2068 = vmatprep.mubr.f32.mxu1 %v1628_v33 }
 0xa85   :  { %2069 = vmatmul.mubr.f32.vlgmr.msra.gmra.mxu1 %v1629_v34 }
 0xb45   :  { %v2070_v37 = vpop.f32.mrf.mxu1 }
 0xb46   :  { %v1725_v39 = vadd.f32 %v2070_v37, %v1827_v35 }
 0xb47   :  { %v1719_v40 = vpop.f32.mrf.mxu1 }
 0xb48   :  { %v1720_v41 = vadd.f32 %v1827_v35, %v1719_v40  ;;  %v1729_v42 = vadd.f32 %v1725_v39, %v1535_v24 }
 0xb4a   :  { %v1735_v43 = vsel %vm86_vm0, %v1729_v42, 0.0  ;;  %v1728_v36 = vadd.f32 %v1720_v41, %v1534_v23 }
 0xb4b   :  { %1736 = vadd.xlane.f32.xlu0 %v1735_v43 }
 0xb4c   :  { %v1732_v38 = vsel %vm86_vm0, %v1728_v36, 0.0 }
 0xb4d   :  { %1733 = vadd.xlane.f32.xlu1 %v1732_v38 }
 0xbd4   :  { %v1737_v44 = vpop.xlane.xlu0 %1736 }
 0xbd5   :  { %v1739_v45 = vmul.f32 0.03125, %v1737_v44 }
 0xbd6   :  { %v1734_v46 = vpop.xlane.xlu1 %1733 }
 0xbd7   :  { %v1741_v47 = vsub.f32 %v1729_v42, %v1739_v45  ;;  %v1738_v48 = vmul.f32 0.03125, %v1734_v46 }
 0xbd9   :  { %v1740_v49 = vsub.f32 %v1728_v36, %v1738_v48  ;;  %v1743_v51 = vmul.f32 %v1741_v47, %v1741_v47 }
 0xbdb   :  { %v1747_v52 = vsel %vm86_vm0, %v1743_v51, 0.0  ;;  %v1742_v53 = vmul.f32 %v1740_v49, %v1740_v49 }
 0xbdc   :  { %1748 = vadd.xlane.f32.xlu0 %v1747_v52 }
 0xbdd   :  { %v1744_v5 = vsel %vm86_vm0, %v1742_v53, 0.0 }
 0xbde   :  { %1745 = vadd.xlane.f32.xlu1 %v1744_v5 }
 0xc65   :  { %v1749_v2 = vpop.xlane.xlu0 %1748 }
 0xc66   :  { %v1751_v54 = vmul.f32 0.03125, %v1749_v2 }
 0xc67   :  { %v1746_v55 = vpop.xlane.xlu1 %1745 }
 0xc68   :  { %v1753_v57 = vadd.f32 1e-05, %v1751_v54  ;;  %v1750_v58 = vmul.f32 0.03125, %v1746_v55 }
 0xc6a   :  { %2110 = vrsqrt.f32 %v1753_v57  ;;  %v1752_v59 = vadd.f32 1e-05, %v1750_v58 }
 0xc6c   :  { %2112 = vrsqrt.f32 %v1752_v59 }
 0xc77   :  { %v2111_v60 = vpop.eup %2110 }
 0xc78   :  { %v1757_v62 = vmul.f32 %v2111_v60, %v1741_v47 }
 0xc79   :  { %v2113_v63 = vpop.eup %2112 }
 0xc7a   :  { %v1765_v1 = vmul.f32 %v1828_v61, %v1757_v62  ;;  %v1756_v3 = vmul.f32 %v2113_v63, %v1740_v49 }
 0xc7c   :  { %v1773_v4 = vadd.f32 %v1829_v0, %v1765_v1  ;;  %v1764_v6 = vmul.f32 %v1828_v61, %v1756_v3 }
 0xc7e   :  { %1775 = vst.msk [vmem:[%s2566_s22 + $0x8] sm:$0xff] %vm86_vm0, %v1773_v4  ;;  %v1772_v7 = vadd.f32 %v1829_v0, %v1764_v6 }
 0xc80   :  { %1774 = vst.msk [vmem:[%s2566_s22] sm:$0xff] %vm86_vm0, %v1772_v7 }

// kernel: gt_tgn_forward.7
= control target key start
LH: loop header
LB: loop body
LE: loop exit
PB: predicated region body
PF: predicated region fallthrough
CT: control target
= control target key end

     0   :  { %v350_v0 = vmov 0.0   ;;  %vm38_vm0 = vcmask 261120   ;;  %vm351_vm1 = vmmov 0   ;;  %vm284_vm2 = vcmask 2048   ;;  %s446_s3 = inlined_call_operand.vmem [shape: f32[32,32], index: 3, kind: input, shape index: {}]   ;;  %s447_s2 = inlined_call_operand.vmem [shape: f32[32,32], index: 2, kind: input, shape index: {}]   ;;  %s448_s1 = inlined_call_operand.vmem [shape: f32[3,32], index: 1, kind: input, shape index: {}]   ;;  %s449_s0 = inlined_call_operand.vmem [shape: f32[3,32], index: 0, kind: input, shape index: {}]   ;;  %s450_s5 = inlined_call_operand.vmem [shape: f32[32,1], index: 5, kind: input, shape index: {}]   ;;  %s451_s6 = inlined_call_operand.<no memory space> [shape: f32[1,1], index: 6, kind: input, shape index: {}]   ;;  %s452_s4 = inlined_call_operand.vmem [shape: f32[1,32], index: 4, kind: input, shape index: {}]   ;;  %s453_s7 = inlined_call_operand.vmem [shape: f32[3,1], index: 7, kind: output, shape index: {}]  }
   0x1   :  { %311 = vmatprep.subr.mxu0 %v350_v0  ;;  %322 = vmatprep.subr.mxu1 %v350_v0  ;;  %v37_v1 = vld [vmem:[%s446_s3 + $0x18] sm:$0xff]  ;;  %v36_v3 = vld [vmem:[%s446_s3 + $0x10] sm:$0xff]  ;;  %v35_v5 = vld [vmem:[%s446_s3 + $0x8] sm:$0xff]  ;;  %v12_v15 = vstv %s451_s6 }
   0x2   :  { %v32_v2 = vld [vmem:[%s447_s2 + $0x18] sm:$0xff]  ;;  %312 = vmatpush3.msra.mxu0 %v37_v1  ;;  %v31_v4 = vld [vmem:[%s447_s2 + $0x10] sm:$0xff]  ;;  %v30_v6 = vld [vmem:[%s447_s2 + $0x8] sm:$0xff]  ;;  %319 = vmatprep.mubr.msk.f32.mxu0 %vm351_vm1, %v350_v0  ;;  %13 = vst [vmem:[#allocation2] sm:$0x1] %v12_v15 }
   0x3   :  { %323 = vmatpush3.msra.mxu1 %v32_v2  ;;  %313 = vmatprep.subr.mxu0 %v350_v0  ;;  %v34_v7 = vld [vmem:[%s446_s3] sm:$0xff]  ;;  %v197_v11 = vld [vmem:[%s450_s5 + $0x18] sm:$0xff]  ;;  %v196_v12 = vld [vmem:[%s450_s5 + $0x10] sm:$0xff] }
   0x4   :  { %324 = vmatprep.subr.mxu1 %v350_v0  ;;  %314 = vmatpush3.msra.mxu0 %v36_v3  ;;  %v29_v8 = vld [vmem:[%s447_s2] sm:$0xff]  ;;  %v195_v13 = vld [vmem:[%s450_s5 + $0x8] sm:$0xff] }
   0x5   :  { %325 = vmatpush3.msra.mxu1 %v31_v4  ;;  %315 = vmatprep.subr.mxu0 %v350_v0  ;;  %v33_v9 = vld [vmem:[%s448_s1] sm:$0x7] }
   0x6   :  { %326 = vmatprep.subr.mxu1 %v350_v0  ;;  %316 = vmatpush3.msra.mxu0 %v35_v5  ;;  %v28_v10 = vld [vmem:[%s449_s0] sm:$0x7] }
   0x7   :  { %327 = vmatpush3.msra.mxu1 %v30_v6  ;;  %317 = vmatprep.subr.mxu0 %v350_v0  ;;  %v194_v14 = vld [vmem:[%s450_s5] sm:$0xff] }
   0x8   :  { %328 = vmatprep.subr.mxu1 %v350_v0  ;;  %318 = vmatpush3.msra.mxu0 %v34_v7  ;;  %v292_v18 = vld [vmem:[%s452_s4] ss:$0 sm:$0xff] }
   0x9   :  { %329 = vmatpush3.msra.mxu1 %v29_v8  ;;  %330 = vmatprep.mubr.msk.f32.mxu1 %vm351_vm1, %v350_v0  ;;  %v293_v24 = vld [vmem:[#allocation2] ss:$0 sm:$0xff] }
   0xa   :  { %320 = vmatmul.mubr.msk.f32.vlgmr.msra.gmra.mxu0 %vm38_vm0, %v33_v9  ;;  %331 = vmatmul.mubr.msk.f32.vlgmr.msra.gmra.mxu1 %vm38_vm0, %v28_v10 }
   0xb   :  { %333 = vmatprep.subr.mxu0 %v350_v0  ;;  %341 = vmatprep.mubr.msk.f32.mxu0 %vm351_vm1, %v350_v0 }
   0xc   :  { %334 = vmatpush3.msra.mxu0 %v197_v11 }
   0xd   :  { %335 = vmatprep.subr.mxu0 %v350_v0 }
   0xe   :  { %336 = vmatpush3.msra.mxu0 %v196_v12 }
   0xf   :  { %337 = vmatprep.subr.mxu0 %v350_v0 }
  0x10   :  { %338 = vmatpush3.msra.mxu0 %v195_v13 }
  0x11   :  { %339 = vmatprep.subr.mxu0 %v350_v0 }
  0x12   :  { %340 = vmatpush3.msra.mxu0 %v194_v14 }
  0xca   :  { %v108_v16 = vpop.f32.mrf.mxu0  ;;  %v181_v17 = vpop.f32.mrf.mxu1 }
  0xcb   :  { %v182_v19 = vadd.f32 %v181_v17, %v108_v16 }
  0xcc   :  { %v321_v20 = vpop.f32.mrf.mxu0  ;;  %v332_v21 = vpop.f32.mrf.mxu1 }
  0xcd   :  { %v192_v22 = vadd.f32 %v292_v18, %v182_v19 }
  0xcf   :  { %v193_v23 = vmax.f32 %v192_v22, 0.0 }
  0xd1   :  { %342 = vmatmul.mubr.msk.f32.vlgmr.msra.gmra.mxu0 %vm38_vm0, %v193_v23 }
 0x191   :  { %v274_v25 = vpop.f32.mrf.mxu0 }
 0x192   :  { %v275_v26 = vadd.f32 %v293_v24, %v274_v25 }
 0x193   :  { %v343_v27 = vpop.f32.mrf.mxu0 }
 0x194   :  { %v295_v28 = vmul.f32 -1.442695, %v275_v26 }
 0x196   :  { %346 = vpow2.f32 %v295_v28 }
 0x1a3   :  { %v347_v29 = vpop.eup %346 }
 0x1a4   :  { %v281_v30 = vadd.f32 1.0, %v347_v29 }
 0x1a6   :  { %348 = vrcp.f32 %v281_v30 }
 0x1b3   :  { %v349_v31 = vpop.eup %348 }
 0x1b4   :  { %285 = vst.msk [vmem:[%s453_s7] sm:$0x7] %vm284_vm2, %v349_v31 }

// kernel: gt_tgn_forward.6
= control target key start
LH: loop header
LB: loop body
LE: loop exit
PB: predicated region body
PF: predicated region fallthrough
CT: control target
= control target key end

     0   :  { %s2878_s0 = inlined_call_operand.vmem [shape: f32[16,32], index: 0, kind: input, shape index: {}, may-alias: {0,1}]   ;;  %s2879_s1 = inlined_call_operand.vmem [shape: f32[16,32], index: 1, kind: input, shape index: {}, may-alias: {0,1}]   ;;  %s2880_s2 = inlined_call_operand.vmem [shape: f32[32,32], index: 2, kind: input, shape index: {}]   ;;  %s2881_s3 = inlined_call_operand.vmem [shape: f32[1,32], index: 3, kind: input, shape index: {}]   ;;  %s2882_s4 = inlined_call_operand.vmem [shape: f32[32,32], index: 4, kind: input, shape index: {}]   ;;  %s2883_s5 = inlined_call_operand.vmem [shape: f32[1,32], index: 5, kind: input, shape index: {}]   ;;  %s2884_s6 = inlined_call_operand.vmem [shape: f32[32,32], index: 6, kind: input, shape index: {}]   ;;  %s2885_s7 = inlined_call_operand.vmem [shape: f32[1,32], index: 7, kind: input, shape index: {}]   ;;  %s2886_s8 = inlined_call_operand.vmem [shape: f32[32,32], index: 8, kind: input, shape index: {}]   ;;  %s2887_s9 = inlined_call_operand.vmem [shape: f32[1,32], index: 9, kind: input, shape index: {}]   ;;  %s2888_s10 = inlined_call_operand.vmem [shape: f32[1,32], index: 10, kind: input, shape index: {}]   ;;  %s2889_s11 = inlined_call_operand.vmem [shape: f32[1,32], index: 11, kind: input, shape index: {}]   ;;  %s2890_s12 = inlined_call_operand.vmem [shape: f32[32,128], index: 12, kind: input, shape index: {}]   ;;  %s2891_s13 = inlined_call_operand.vmem [shape: f32[1,128], index: 13, kind: input, shape index: {}]   ;;  %s2892_s14 = inlined_call_operand.vmem [shape: f32[128,32], index: 14, kind: input, shape index: {}]   ;;  %s2893_s15 = inlined_call_operand.vmem [shape: f32[1,32], index: 15, kind: input, shape index: {}]   ;;  %s2894_s16 = inlined_call_operand.hbm [shape: f32[1,32], index: 16, kind: input, shape index: {}]   ;;  %s2895_s17 = inlined_call_operand.hbm [shape: f32[1,32], index: 17, kind: input, shape index: {}]   ;;  %s2896_s18 = inlined_call_operand.vmem [shape: f32[32,32], index: 18, kind: input, shape index: {}]   ;;  %s2897_s19 = inlined_call_operand.vmem [shape: f32[1,32], index: 19, kind: input, shape index: {}]   ;;  %s2898_s20 = inlined_call_operand.vmem [shape: f32[32,32], index: 20, kind: input, shape index: {}]   ;;  %s2899_s21 = inlined_call_operand.vmem [shape: f32[1,32], index: 21, kind: input, shape index: {}]   ;;  %s2900_s22 = inlined_call_operand.vmem [shape: f32[16,32], index: 22, kind: output, shape index: {}]  }
   0x1   :  { %2906 = sst [smem:[#allocation8_spill]] %s2878_s0 }
   0x2   :  { %2907 = sst [smem:[#allocation9_spill]] %s2879_s1 }
   0x3   :  { %2908 = sst [smem:[#allocation10_spill]] %s2880_s2 }
   0x4   :  { %2909 = sst [smem:[#allocation11_spill]] %s2881_s3 }
   0x5   :  { %2910 = sst [smem:[#allocation12_spill]] %s2882_s4 }
   0x6   :  { %2911 = sst [smem:[#allocation13_spill]] %s2883_s5 }
   0x7   :  { %2912 = sst [smem:[#allocation14_spill]] %s2884_s6 }
   0x8   :  { %27 = vsyncpa [#allocation3], 0 }
   0x9   :  { %28 = vsyncpa [#allocation5], 0  ;;  %s2412_s3 = smov [#allocation2]   ;;  %s2413_s29 = smov [#allocation4]  }
   0xa   :  { %s67_s28 = sshll.u32 %s2412_s3, 4  ;;  %s77_s30 = sshll.u32 %s2413_s29, 4  ;;  %s68_s28 = int_to_ptr.vmem [resolvable:$true] %s67_s28  ;;  %s78_s30 = int_to_ptr.vmem [resolvable:$true] %s77_s30 }
   0xb   :  { %s2376_s4 = scalar_lea.vmem %s68_s28, 16  ;;  %s2380_s0 = scalar_lea.vmem %s68_s28, 32 }
   0xc   :  { %p2377_p0 = scmp.ne.s32.totalorder %s68_s28, %s2376_s4  ;;  %p2381_p1 = scmp.lt.s32.totalorder %s68_s28, %s68_s28 }
   0xd   :  { %p2382_p2 = scmp.lt.s32.totalorder %s2380_s0, %s2376_s4 }
   0xf   :  { %p2383_p3 = por %p2382_p2, %p2381_p1 }
  0x11   :  { %p2384_p4 = pnand %p2383_p3, %p2377_p0 }
  0x13   :  { %2387 = shalt.err (!%p2384_p4)
}
  0x14   :  { %70 = dma.hbm_to_vmem [thread:$0]  %s2894_s16, 16, %s68_s28, [#allocation3]  }
  0x15   :  { %s2396_s5 = scalar_lea.vmem %s78_s30, 16  ;;  %s2400_s24 = scalar_lea.vmem %s78_s30, 32 }
  0x16   :  { %p2397_p5 = scmp.ne.s32.totalorder %s78_s30, %s2396_s5  ;;  %p2401_p6 = scmp.lt.s32.totalorder %s78_s30, %s78_s30 }
  0x17   :  { %p2402_p7 = scmp.lt.s32.totalorder %s2400_s24, %s2396_s5 }
  0x19   :  { %p2403_p8 = por %p2402_p7, %p2401_p6 }
  0x1b   :  { %p2404_p9 = pnand %p2403_p8, %p2397_p5 }
  0x1d   :  { %2407 = shalt.err (!%p2404_p9)
}
  0x1e   :  { %80 = dma.hbm_to_vmem [thread:$0]  %s2895_s17, 16, %s78_s30, [#allocation5]  }
  0x1f   :  { %2408 = dma.done.wait [#allocation3], 16  }
  0x20   :  { %2409 = vsyncadd [#allocation3], 4294967280 }
  0x21   :  { %2410 = dma.done.wait [#allocation5], 16  }
  0x22   :  { %2411 = vsyncadd [#allocation5], 4294967280  ;;  %s2913_s27 = sld [smem:[#allocation10_spill]]  ;;  %vm110_vm0 = vcmask 261120   ;;  %vm374_vm1 = vcmask 64512   ;;  %s2414_s26 = smov 120  }
  0x23   :  { %s2914_s28 = sld [smem:[#allocation12_spill]]  ;;  %vm464_vm2 = vcmask 130048   ;;  %v1998_v49 = vld [vmem:[%s2885_s7] ss:$0 sm:$0xff]  ;;  %s2415_s7 = smov 112  }
  0x24   :  { %s2915_s3 = sld [smem:[#allocation8_spill]]  ;;  %s2416_s1 = smov 104  }
  0x25   :  { %s2916_s0 = sld [smem:[#allocation9_spill]] }
  0x26   :  { %s2917_s5 = sld [smem:[#allocation13_spill]] }
  0x27   :  { %s2918_s25 = sld [smem:[#allocation11_spill]] }
  0x28   :  { %v102_v0 = vld [vmem:[%s2913_s27 + $0x18] sm:$0xff]  ;;  %v101_v2 = vld [vmem:[%s2913_s27 + $0x10] sm:$0xff]  ;;  %v100_v4 = vld [vmem:[%s2913_s27 + $0x8] sm:$0xff] }
  0x29   :  { %v195_v1 = vld [vmem:[%s2914_s28 + $0x18] sm:$0xff]  ;;  %2146 = vmatprep.subr.mxu0 %v102_v0  ;;  %v194_v3 = vld [vmem:[%s2914_s28 + $0x10] sm:$0xff]  ;;  %v193_v5 = vld [vmem:[%s2914_s28 + $0x8] sm:$0xff] }
  0x2a   :  { %2157 = vmatprep.subr.mxu1 %v195_v1  ;;  %2147 = vmatpush3.msra.mxu0 %v102_v0  ;;  %v99_v6 = vld [vmem:[%s2913_s27] sm:$0xff]  ;;  %v2573_v10 = vld [vmem:[%s2915_s3 + $0x8] sm:$0xff] }
  0x2b   :  { %2158 = vmatpush3.msra.mxu1 %v195_v1  ;;  %2148 = vmatprep.subr.mxu0 %v101_v2  ;;  %v192_v7 = vld [vmem:[%s2914_s28] sm:$0xff]  ;;  %v98_v11 = vld [vmem:[%s2916_s0 + $0x8] sm:$0xff] }
  0x2c   :  { %2159 = vmatprep.subr.mxu1 %v194_v3  ;;  %2149 = vmatpush3.msra.mxu0 %v101_v2  ;;  %v2565_v8 = vld [vmem:[%s2915_s3] sm:$0xff]  ;;  %s2919_s3 = sld [smem:[#allocation14_spill]] }
  0x2d   :  { %2160 = vmatpush3.msra.mxu1 %v194_v3  ;;  %2150 = vmatprep.subr.mxu0 %v100_v4  ;;  %v97_v9 = vld [vmem:[%s2916_s0] sm:$0xff] }
  0x2e   :  { %2161 = vmatprep.subr.mxu1 %v193_v5  ;;  %2151 = vmatpush3.msra.mxu0 %v100_v4  ;;  %v1995_v12 = vld [vmem:[%s2917_s5] ss:$0 sm:$0xff] }
  0x2f   :  { %2162 = vmatpush3.msra.mxu1 %v193_v5  ;;  %2152 = vmatprep.subr.mxu0 %v99_v6  ;;  %v1992_v14 = vld [vmem:[%s2918_s25] ss:$0 sm:$0xff] }
  0x30   :  { %2163 = vmatprep.subr.mxu1 %v192_v7  ;;  %2153 = vmatpush3.msra.mxu0 %v99_v6 }
  0x31   :  { %2154 = vmatprep.mubr.msk.f32.mxu0 %vm110_vm0, %v2565_v8  ;;  %2164 = vmatpush3.msra.mxu1 %v192_v7 }
  0x32   :  { %2165 = vmatprep.mubr.msk.f32.mxu1 %vm110_vm0, %v97_v9  ;;  %2155 = vmatmul.mubr.msk.f32.vlgmr.msra.gmra.mxu0 %vm110_vm0, %v2573_v10  ;;  %v287_v22 = vld [vmem:[%s2919_s3 + $0x18] sm:$0xff]  ;;  %v286_v23 = vld [vmem:[%s2919_s3 + $0x10] sm:$0xff]  ;;  %v285_v24 = vld [vmem:[%s2919_s3 + $0x8] sm:$0xff] }
  0x33   :  { %2166 = vmatmul.mubr.msk.f32.vlgmr.msra.gmra.mxu1 %vm110_vm0, %v98_v11  ;;  %2176 = vmatprep.mubr.msk.f32.mxu0 %vm110_vm0, %v97_v9  ;;  %v284_v25 = vld [vmem:[%s2919_s3] sm:$0xff] }
  0x34   :  { %2168 = vmatprep.subr.mxu0 %v287_v22 }
  0x35   :  { %2169 = vmatpush3.msra.mxu0 %v287_v22 }
  0x36   :  { %2170 = vmatprep.subr.mxu0 %v286_v23 }
  0x37   :  { %2171 = vmatpush3.msra.mxu0 %v286_v23 }
  0x38   :  { %2172 = vmatprep.subr.mxu0 %v285_v24 }
  0x39   :  { %2173 = vmatpush3.msra.mxu0 %v285_v24 }
  0x3a   :  { %2174 = vmatprep.subr.mxu0 %v284_v25 }
  0x3b   :  { %2175 = vmatpush3.msra.mxu0 %v284_v25 }
  0x3c   :  { %2177 = vmatmul.mubr.msk.f32.vlgmr.msra.gmra.mxu0 %vm110_vm0, %v98_v11 }
  0xf2   :  { %v2156_v13 = vpop.f32.mrf.mxu0 }
  0xf3   :  { %v2167_v15 = vpop.f32.mrf.mxu1  ;;  %v2609_v21 = vadd.f32 %v2156_v13, %v1992_v14 }
  0xf4   :  { %v2591_v16 = vadd.f32 %v2167_v15, %v1995_v12  ;;  %v183_v17 = vpop.f32.mrf.mxu0  ;;  %v371_v15 = vld [vmem:[%s2886_s8 + $0x8] sm:$0xff] }
  0xf5   :  { %v275_v18 = vpop.f32.mrf.mxu1  ;;  %v2593_v19 = vadd.f32 %v1992_v14, %v183_v17 }
  0xf6   :  { %v2595_v20 = vadd.f32 %v1995_v12, %v275_v18  ;;  %574 = vrot.lane.b32.xlu0 %v2591_v16, %s2414_s26  ;;  %2179 = vmatprep.subr.msk.mxu1 %vm374_vm1, %v2591_v16 }
  0xf7   :  { %2180 = vmatpush3.xpose.msk.msra.mxu1 %vm374_vm1, %v2591_v16  ;;  %568 = vrot.lane.b32.xlu1 %v2593_v19, %s2414_s26 }
  0xf8   :  { %2181 = vmatprep.subr.msk.mxu1 %vm374_vm1, %v2595_v20  ;;  %2183 = vmatprep.mubr.msk.f32.mxu1 %vm374_vm1, %v2593_v19 }
  0xfa   :  { %572 = vrot.lane.b32.xlu0 %v2595_v20, %s2414_s26 }
  0xfb   :  { %2182 = vmatpush3.xpose.msk.msra.mxu1 %vm374_vm1, %v2595_v20  ;;  %570 = vrot.lane.b32.xlu1 %v2609_v21, %s2414_s26 }
  0xfc   :  { %v2178_v48 = vpop.f32.mrf.mxu0 }
  0xfd   :  { %v2645_v50 = vadd.f32 %v2178_v48, %v1998_v49 }
  0xfe   :  { %2184 = vmatmul.mubr.msk.f32.vlgmr.msra.gmra.mxu1 %vm374_vm1, %v2609_v21  ;;  %v361_v55 = vpop.f32.mrf.mxu0 }
  0xff   :  { %2186 = vmatprep.subr.mxu0 %v2645_v50  ;;  %v2651_v56 = vadd.f32 %v1998_v49, %v361_v55 }
 0x100   :  { %2187 = vmatpush3.msra.mxu0 %v2645_v50 }
 0x101   :  { %2188 = vmatprep.subr.mxu0 %v2651_v56 }
 0x102   :  { %2189 = vmatpush3.msra.mxu0 %v2651_v56 }
 0x168   :  { %v575_v26 = vpop.permute.xlu0 %574 }
 0x169   :  { %2193 = vmatprep.subr.msk.mxu1 %vm374_vm1, %v575_v26  ;;  %v569_v27 = vpop.permute.xlu1 %568 }
 0x16a   :  { %2194 = vmatpush3.xpose.msk.msra.mxu1 %vm374_vm1, %v575_v26  ;;  %2197 = vmatprep.mubr.msk.f32.mxu1 %vm374_vm1, %v569_v27 }
 0x16c   :  { %v573_v28 = vpop.permute.xlu0 %572 }
 0x16d   :  { %2195 = vmatprep.subr.msk.mxu1 %vm374_vm1, %v573_v28  ;;  %v571_v29 = vpop.permute.xlu1 %570 }
 0x16e   :  { %2196 = vmatpush3.xpose.msk.msra.mxu1 %vm374_vm1, %v573_v28 }
 0x171   :  { %2198 = vmatmul.mubr.msk.f32.vlgmr.msra.gmra.mxu1 %vm374_vm1, %v571_v29 }
 0x1be   :  { %v2185_v30 = vpop.f32.mrf.mxu1 }
 0x1bf   :  { %v463_v31 = vmul.f32 0.35355338, %v2185_v30 }
 0x1c0   :  { %v453_v32 = vpop.f32.mrf.mxu1 }
 0x1c1   :  { %v462_v33 = vmul.f32 0.35355338, %v453_v32  ;;  %v468_v34 = vsel %vm464_vm2, %v463_v31, -inf }
 0x1c2   :  { %469 = vmax.xlane.f32.xlu1 %v468_v34 }
 0x1c3   :  { %v465_v35 = vsel %vm464_vm2, %v462_v33, -inf }
 0x1c4   :  { %466 = vmax.xlane.f32.xlu0 %v465_v35 }
 0x231   :  { %v2199_v36 = vpop.f32.mrf.mxu1 }
 0x232   :  { %v660_v39 = vmul.f32 0.35355338, %v2199_v36 }
 0x233   :  { %v650_v37 = vpop.f32.mrf.mxu1 }
 0x234   :  { %v659_v38 = vmul.f32 0.35355338, %v650_v37  ;;  %v664_v41 = vsel %vm464_vm2, %v660_v39, -inf }
 0x236   :  { %v661_v40 = vsel %vm464_vm2, %v659_v38, -inf }
 0x237   :  { %662 = vmax.xlane.f32.xlu0 %v661_v40 }
 0x23b   :  { %665 = vmax.xlane.f32.xlu0 %v664_v41 }
 0x24b   :  { %v470_v42 = vpop.xlane.xlu1 %469 }
 0x24c   :  { %v472_v43 = vsub.f32 %v463_v31, %v470_v42 }
 0x24d   :  { %v467_v44 = vpop.xlane.xlu0 %466 }
 0x24e   :  { %v475_v45 = vmul.f32 1.442695, %v472_v43  ;;  %v471_v46 = vsub.f32 %v462_v33, %v467_v44 }
 0x250   :  { %2328 = vpow2.f32 %v475_v45  ;;  %v473_v47 = vmul.f32 1.442695, %v471_v46 }
 0x252   :  { %2330 = vpow2.f32 %v473_v47 }
 0x25d   :  { %v2329_v51 = vpop.eup %2328 }
 0x25e   :  { %v480_v52 = vsel %vm464_vm2, %v2329_v51, 0.0 }
 0x25f   :  { %v2331_v53 = vpop.eup %2330  ;;  %481 = vadd.xlane.f32.xlu0 %v480_v52 }
 0x260   :  { %v477_v54 = vsel %vm464_vm2, %v2331_v53, 0.0 }
 0x261   :  { %478 = vadd.xlane.f32.xlu1 %v477_v54 }
 0x2c0   :  { %v663_v57 = vpop.xlane.xlu0 %662 }
 0x2c1   :  { %v667_v58 = vsub.f32 %v659_v38, %v663_v57 }
 0x2c3   :  { %v669_v59 = vmul.f32 1.442695, %v667_v58 }
 0x2c4   :  { %v666_v60 = vpop.xlane.xlu0 %665 }
 0x2c5   :  { %2332 = vpow2.f32 %v669_v59  ;;  %v668_v61 = vsub.f32 %v660_v39, %v666_v60 }
 0x2c7   :  { %v671_v62 = vmul.f32 1.442695, %v668_v61 }
 0x2c9   :  { %2334 = vpow2.f32 %v671_v62 }
 0x2d2   :  { %v2333_v63 = vpop.eup %2332 }
 0x2d3   :  { %v673_v0 = vsel %vm464_vm2, %v2333_v63, 0.0 }
 0x2d4   :  { %674 = vadd.xlane.f32.xlu1 %v673_v0 }
 0x2d6   :  { %v2335_v1 = vpop.eup %2334 }
 0x2d7   :  { %v676_v2 = vsel %vm464_vm2, %v2335_v1, 0.0 }
 0x2d8   :  { %677 = vadd.xlane.f32.xlu0 %v676_v2 }
 0x2e5   :  { %687 = vrot.lane.b32.xlu1 %v2645_v50, %s2414_s26 }
 0x2e8   :  { %v482_v3 = vpop.xlane.xlu0 %481 }
 0x2e9   :  { %940 = vrot.lane.b32.xlu1 %v2591_v16, %s2415_s7  ;;  %2336 = vrcp.f32 %v482_v3 }
 0x2ea   :  { %v479_v4 = vpop.xlane.xlu1 %478 }
 0x2eb   :  { %2338 = vrcp.f32 %v479_v4 }
 0x2ed   :  { %938 = vrot.lane.b32.xlu1 %v2595_v20, %s2415_s7 }
 0x2ee   :  { %685 = vrot.lane.b32.xlu0 %v2651_v56, %s2414_s26 }
 0x2f1   :  { %936 = vrot.lane.b32.xlu1 %v2609_v21, %s2415_s7 }
 0x2f2   :  { %934 = vrot.lane.b32.xlu0 %v2593_v19, %s2415_s7 }
 0x2f5   :  { %1223 = vrot.lane.b32.xlu1 %v2595_v20, %s2416_s1  ;;  %v370_v20 = vld [vmem:[%s2886_s8] sm:$0xff] }
 0x2f6   :  { %1225 = vrot.lane.b32.xlu0 %v2591_v16, %s2416_s1  ;;  %v2337_v5 = vpop.eup %2336 }
 0x2f7   :  { %v486_v9 = vmul.f32 %v2337_v5, %v2329_v51 }
 0x2f8   :  { %v2339_v6 = vpop.eup %2338 }
 0x2f9   :  { %1221 = vrot.lane.b32.xlu1 %v2609_v21, %s2416_s1  ;;  %v485_v7 = vmul.f32 %v2339_v6, %v2331_v53 }
 0x2fa   :  { %1219 = vrot.lane.b32.xlu0 %v2593_v19, %s2416_s1 }
 0x2fb   :  { %2190 = vmatprep.mubr.msk.f32.mxu0 %vm464_vm2, %v485_v7 }
 0x2fc   :  { %2191 = vmatmul.mubr.msk.f32.vlgmr.msra.gmra.mxu0 %vm464_vm2, %v486_v9  ;;  %v372_v9 = vld [vmem:[%s2886_s8 + $0x10] sm:$0xff] }
 0x35d   :  { %v675_v11 = vpop.xlane.xlu1 %674 }
 0x35e   :  { %2340 = vrcp.f32 %v675_v11 }
 0x361   :  { %v688_v12 = vpop.permute.xlu1 %687  ;;  %v678_v13 = vpop.xlane.xlu0 %677 }
 0x362   :  { %2342 = vrcp.f32 %v678_v13  ;;  %2200 = vmatprep.subr.mxu0 %v688_v12 }
 0x363   :  { %2201 = vmatpush3.msra.mxu0 %v688_v12 }
 0x365   :  { %v686_v14 = vpop.permute.xlu0 %685  ;;  %v941_v23 = vpop.permute.xlu1 %940 }
 0x366   :  { %2202 = vmatprep.subr.mxu0 %v686_v14 }
 0x367   :  { %2203 = vmatpush3.msra.mxu0 %v686_v14 }
 0x368   :  { %2207 = vmatprep.subr.mxu0 %v371_v15 }
 0x369   :  { %v935_v26 = vpop.permute.xlu0 %934  ;;  %v939_v27 = vpop.permute.xlu1 %938 }
 0x36b   :  { %v2341_v16 = vpop.eup %2340 }
 0x36c   :  { %v681_v17 = vmul.f32 %v2341_v16, %v2333_v63 }
 0x36d   :  { %v1226_v28 = vpop.permute.xlu0 %1225  ;;  %v937_v29 = vpop.permute.xlu1 %936 }
 0x36e   :  { %2204 = vmatprep.mubr.msk.f32.mxu0 %vm464_vm2, %v681_v17 }
 0x36f   :  { %v2343_v18 = vpop.eup %2342 }
 0x370   :  { %v682_v19 = vmul.f32 %v2343_v18, %v2335_v1 }
 0x371   :  { %v1220_v30 = vpop.permute.xlu0 %1219  ;;  %v1224_v31 = vpop.permute.xlu1 %1223 }
 0x372   :  { %2205 = vmatmul.mubr.msk.f32.vlgmr.msra.gmra.mxu0 %vm464_vm2, %v682_v19 }
 0x373   :  { %2208 = vmatpush3.msra.mxu0 %v371_v15 }
 0x374   :  { %2212 = vmatprep.subr.mxu0 %v370_v20 }
 0x375   :  { %v1222_v32 = vpop.permute.xlu1 %1221 }
 0x3bc   :  { %v2192_v21 = vpop.f32.mrf.mxu0 }
 0x3be   :  { %v559_v22 = vpop.f32.mrf.mxu0 }
 0x432   :  { %v2206_v24 = vpop.f32.mrf.mxu0 }
 0x434   :  { %v763_v25 = vpop.f32.mrf.mxu0 }
 0x435   :  { %2209 = vmatprep.mubr.msk.f32.mxu0 %vm374_vm1, %v763_v25 }
 0x436   :  { %2210 = vmatmul.mubr.msk.f32.vlgmr.msra.gmra.mxu0 %vm374_vm1, %v2206_v24 }
 0x437   :  { %2213 = vmatpush3.msra.mxu0 %v370_v20  ;;  %2214 = vmatprep.mubr.msk.f32.mxu0 %vm374_vm1, %v559_v22 }
 0x438   :  { %2217 = vmatprep.subr.msk.mxu0 %vm374_vm1, %v941_v23 }
 0x43a   :  { %2215 = vmatmul.mubr.msk.f32.vlgmr.msra.gmra.mxu0 %vm374_vm1, %v2192_v21 }
 0x43b   :  { %2218 = vmatpush3.xpose.msk.msra.mxu0 %vm374_vm1, %v941_v23  ;;  %2221 = vmatprep.mubr.msk.f32.mxu0 %vm374_vm1, %v935_v26 }
 0x43c   :  { %2219 = vmatprep.subr.msk.mxu0 %vm374_vm1, %v939_v27 }
 0x43f   :  { %2220 = vmatpush3.xpose.msk.msra.mxu0 %vm374_vm1, %v939_v27 }
 0x440   :  { %2236 = vmatprep.subr.msk.mxu0 %vm374_vm1, %v1226_v28 }
 0x442   :  { %2222 = vmatmul.mubr.msk.f32.vlgmr.msra.gmra.mxu0 %vm374_vm1, %v937_v29 }
 0x443   :  { %2237 = vmatpush3.xpose.msk.msra.mxu0 %vm374_vm1, %v1226_v28  ;;  %2240 = vmatprep.mubr.msk.f32.mxu0 %vm374_vm1, %v1220_v30 }
 0x444   :  { %2238 = vmatprep.subr.msk.mxu0 %vm374_vm1, %v1224_v31 }
 0x447   :  { %2239 = vmatpush3.xpose.msk.msra.mxu0 %vm374_vm1, %v1224_v31 }
 0x44a   :  { %2241 = vmatmul.mubr.msk.f32.vlgmr.msra.gmra.mxu0 %vm374_vm1, %v1222_v32 }
 0x4f6   :  { %v2211_v33 = vpop.f32.mrf.mxu0 }
 0x4f8   :  { %v844_v34 = vpop.f32.mrf.mxu0 }
 0x4fa   :  { %v2216_v35 = vpop.f32.mrf.mxu0 }
 0x4fb   :  { %v2703_v36 = vadd.f32 %v2216_v35, %v2211_v33 }
 0x4fc   :  { %v925_v37 = vpop.f32.mrf.mxu0 }
 0x4fd   :  { %v2705_v38 = vadd.f32 %v925_v37, %v844_v34  ;;  %v2033_v37 = vld [vmem:[%s2887_s9] ss:$0 sm:$0xff] }
 0x502   :  { %v2223_v39 = vpop.f32.mrf.mxu0 }
 0x503   :  { %v1026_v40 = vmul.f32 0.35355338, %v2223_v39 }
 0x504   :  { %v1016_v41 = vpop.f32.mrf.mxu0 }
 0x505   :  { %v1025_v42 = vmul.f32 0.35355338, %v1016_v41  ;;  %v1030_v43 = vsel %vm464_vm2, %v1026_v40, -inf }
 0x506   :  { %1031 = vmax.xlane.f32.xlu1 %v1030_v43 }
 0x507   :  { %v1027_v44 = vsel %vm464_vm2, %v1025_v42, -inf }
 0x508   :  { %1028 = vmax.xlane.f32.xlu0 %v1027_v44 }
 0x50a   :  { %v2242_v45 = vpop.f32.mrf.mxu0 }
 0x50b   :  { %v1311_v2 = vmul.f32 0.35355338, %v2242_v45 }
 0x50c   :  { %v1301_v46 = vpop.f32.mrf.mxu0 }
 0x50d   :  { %v1310_v47 = vmul.f32 0.35355338, %v1301_v46  ;;  %v1315_v4 = vsel %vm464_vm2, %v1311_v2, -inf }
 0x50f   :  { %v1312_v48 = vsel %vm464_vm2, %v1310_v47, -inf }
 0x517   :  { %1051 = vrot.lane.b32.xlu1 %v2645_v50, %s2415_s7 }
 0x53b   :  { %1313 = vmax.xlane.f32.xlu1 %v1312_v48 }
 0x58f   :  { %v1032_v49 = vpop.xlane.xlu1 %1031 }
 0x590   :  { %v1034_v51 = vsub.f32 %v1026_v40, %v1032_v49 }
 0x591   :  { %v1029_v52 = vpop.xlane.xlu0 %1028 }
 0x592   :  { %v1037_v53 = vmul.f32 1.442695, %v1034_v51  ;;  %v1033_v54 = vsub.f32 %v1025_v42, %v1029_v52 }
 0x593   :  { %v1052_v55 = vpop.permute.xlu1 %1051 }
 0x594   :  { %2344 = vpow2.f32 %v1037_v53  ;;  %v1035_v57 = vmul.f32 1.442695, %v1033_v54  ;;  %2224 = vmatprep.subr.mxu1 %v1052_v55 }
 0x595   :  { %2225 = vmatpush3.msra.mxu1 %v1052_v55  ;;  %v1563_v55 = vld [vmem:[%s2890_s12 + $0x18] sm:$0xff] }
 0x596   :  { %2346 = vpow2.f32 %v1035_v57  ;;  %v1562_v57 = vld [vmem:[%s2890_s12 + $0x10] sm:$0xff]  ;;  %2255 = vmatprep.subr.mxu0 %v1563_v55 }
 0x597   :  { %2256 = vmatpush3.msra.mxu0 %v1563_v55  ;;  %v1799_v55 = vld [vmem:[%s2896_s18 + $0x8] sm:$0xff] }
 0x598   :  { %2257 = vmatprep.subr.mxu0 %v1562_v57 }
 0x599   :  { %2258 = vmatpush3.msra.mxu0 %v1562_v57  ;;  %v1798_v57 = vld [vmem:[%s2896_s18] sm:$0xff] }
 0x5a1   :  { %v2345_v58 = vpop.eup %2344 }
 0x5a2   :  { %v1042_v59 = vsel %vm464_vm2, %v2345_v58, 0.0 }
 0x5a3   :  { %v2347_v60 = vpop.eup %2346  ;;  %1043 = vadd.xlane.f32.xlu0 %v1042_v59  ;;  %v1560_v59 = vld [vmem:[%s2890_s12] sm:$0xff] }
 0x5a4   :  { %v1039_v61 = vsel %vm464_vm2, %v2347_v60, 0.0 }
 0x5a7   :  { %1040 = vadd.xlane.f32.xlu0 %v1039_v61  ;;  %v1668_v61 = vld [vmem:[%s2892_s14 + $0x70] sm:$0xff] }
 0x5bd   :  { %1049 = vrot.lane.b32.xlu0 %v2651_v56, %s2415_s7 }
 0x5c4   :  { %v1314_v62 = vpop.xlane.xlu1 %1313 }
 0x5c5   :  { %v1318_v63 = vsub.f32 %v1310_v47, %v1314_v62  ;;  %v1667_v62 = vld [vmem:[%s2892_s14 + $0x68] sm:$0xff] }
 0x5c7   :  { %v1320_v0 = vmul.f32 1.442695, %v1318_v63  ;;  %v1666_v63 = vld [vmem:[%s2892_s14 + $0x60] sm:$0xff] }
 0x5c9   :  { %2348 = vpow2.f32 %v1320_v0  ;;  %v1665_v0 = vld [vmem:[%s2892_s14 + $0x58] sm:$0xff] }
 0x5d6   :  { %v2349_v1 = vpop.eup %2348 }
 0x5d7   :  { %v1324_v3 = vsel %vm464_vm2, %v2349_v1, 0.0 }
 0x5d8   :  { %1325 = vadd.xlane.f32.xlu1 %v1324_v3  ;;  %v1662_v3 = vld [vmem:[%s2892_s14 + $0x40] sm:$0xff] }
 0x5dc   :  { %1316 = vmax.xlane.f32.xlu0 %v1315_v4  ;;  %v1661_v4 = vld [vmem:[%s2892_s14 + $0x38] sm:$0xff] }
 0x5e9   :  { %1336 = vrot.lane.b32.xlu1 %v2645_v50, %s2416_s1 }
 0x62c   :  { %v1044_v5 = vpop.xlane.xlu0 %1043 }
 0x62d   :  { %2350 = vrcp.f32 %v1044_v5  ;;  %v1660_v5 = vld [vmem:[%s2892_s14 + $0x30] sm:$0xff] }
 0x630   :  { %v1041_v6 = vpop.xlane.xlu0 %1040 }
 0x631   :  { %2352 = vrcp.f32 %v1041_v6  ;;  %v1659_v6 = vld [vmem:[%s2892_s14 + $0x28] sm:$0xff] }
 0x634   :  { %v1050_v7 = vpop.permute.xlu0 %1049 }
 0x635   :  { %2226 = vmatprep.subr.mxu1 %v1050_v7 }
 0x636   :  { %2227 = vmatpush3.msra.mxu1 %v1050_v7  ;;  %v1658_v7 = vld [vmem:[%s2892_s14 + $0x20] sm:$0xff] }
 0x637   :  { %2231 = vmatprep.subr.mxu1 %v372_v9 }
 0x63a   :  { %v2351_v11 = vpop.eup %2350 }
 0x63b   :  { %v1048_v14 = vmul.f32 %v2351_v11, %v2345_v58  ;;  %v1561_v58 = vld [vmem:[%s2890_s12 + $0x8] sm:$0xff] }
 0x63c   :  { %2259 = vmatprep.subr.mxu0 %v1561_v58 }
 0x63d   :  { %2260 = vmatpush3.msra.mxu0 %v1561_v58 }
 0x63e   :  { %v2353_v12 = vpop.eup %2352  ;;  %2261 = vmatprep.subr.mxu0 %v1560_v59 }
 0x63f   :  { %v1047_v13 = vmul.f32 %v2353_v12, %v2347_v60  ;;  %2262 = vmatpush3.msra.mxu0 %v1560_v59  ;;  %v1669_v60 = vld [vmem:[%s2892_s14 + $0x78] sm:$0xff] }
 0x641   :  { %2228 = vmatprep.mubr.msk.f32.mxu1 %vm464_vm2, %v1047_v13 }
 0x642   :  { %2229 = vmatmul.mubr.msk.f32.vlgmr.msra.gmra.mxu1 %vm464_vm2, %v1048_v14 }
 0x643   :  { %2232 = vmatpush3.msra.mxu1 %v372_v9 }
 0x661   :  { %v1326_v50 = vpop.xlane.xlu1 %1325 }
 0x665   :  { %v1337_v15 = vpop.permute.xlu1 %1336  ;;  %v1317_v16 = vpop.xlane.xlu0 %1316 }
 0x666   :  { %v1319_v17 = vsub.f32 %v1311_v2, %v1317_v16  ;;  %2243 = vmatprep.subr.mxu1 %v1337_v15  ;;  %v1663_v2 = vld [vmem:[%s2892_s14 + $0x48] sm:$0xff]  ;;  %v2034_v16 = vld [vmem:[%s2888_s10] ss:$0 sm:$0xff] }
 0x668   :  { %v1322_v18 = vmul.f32 1.442695, %v1319_v17 }
 0x66a   :  { %2354 = vpow2.f32 %v1322_v18 }
 0x66b   :  { %2356 = vrcp.f32 %v1326_v50 }
 0x677   :  { %v2355_v19 = vpop.eup %2354 }
 0x678   :  { %v1327_v20 = vsel %vm464_vm2, %v2355_v19, 0.0  ;;  %v2357_v21 = vpop.eup %2356 }
 0x679   :  { %1328 = vadd.xlane.f32.xlu0 %v1327_v20  ;;  %v1332_v25 = vmul.f32 %v2357_v21, %v2349_v1  ;;  %v1664_v1 = vld [vmem:[%s2892_s14 + $0x50] sm:$0xff]  ;;  %v2035_v21 = vld [vmem:[%s2889_s11] ss:$0 sm:$0xff] }
 0x68f   :  { %1334 = vrot.lane.b32.xlu0 %v2651_v56, %s2416_s1  ;;  %v373_v56 = vld [vmem:[%s2886_s8 + $0x18] sm:$0xff] }
 0x702   :  { %v2230_v22 = vpop.f32.mrf.mxu1  ;;  %v1329_v23 = vpop.xlane.xlu0 %1328 }
 0x703   :  { %2358 = vrcp.f32 %v1329_v23 }
 0x704   :  { %v1127_v24 = vpop.f32.mrf.mxu1 }
 0x705   :  { %2233 = vmatprep.mubr.msk.f32.mxu1 %vm374_vm1, %v1127_v24 }
 0x706   :  { %2234 = vmatmul.mubr.msk.f32.vlgmr.msra.gmra.mxu1 %vm374_vm1, %v2230_v22  ;;  %v1335_v26 = vpop.permute.xlu0 %1334 }
 0x707   :  { %2244 = vmatpush3.msra.mxu1 %v1337_v15  ;;  %2247 = vmatprep.mubr.msk.f32.mxu1 %vm464_vm2, %v1332_v25  ;;  %v1657_v25 = vld [vmem:[%s2892_s14 + $0x18] sm:$0xff] }
 0x708   :  { %2245 = vmatprep.subr.mxu1 %v1335_v26 }
 0x709   :  { %2246 = vmatpush3.msra.mxu1 %v1335_v26  ;;  %v1656_v26 = vld [vmem:[%s2892_s14 + $0x10] sm:$0xff] }
 0x70a   :  { %2250 = vmatprep.subr.mxu1 %v373_v56 }
 0x710   :  { %v2359_v27 = vpop.eup %2358 }
 0x711   :  { %v1333_v28 = vmul.f32 %v2359_v27, %v2355_v19  ;;  %v1655_v27 = vld [vmem:[%s2892_s14 + $0x8] sm:$0xff] }
 0x713   :  { %2248 = vmatmul.mubr.msk.f32.vlgmr.msra.gmra.mxu1 %vm464_vm2, %v1333_v28  ;;  %v1654_v28 = vld [vmem:[%s2892_s14] sm:$0xff] }
 0x714   :  { %2251 = vmatpush3.msra.mxu1 %v373_v56  ;;  %v2036_v56 = vld [vmem:[%s2891_s13] ss:$0 sm:$0xff] }
 0x715   :  { %2266 = vmatprep.subr.mxu1 %v1669_v60 }
 0x7c6   :  { %v2235_v29 = vpop.f32.mrf.mxu1 }
 0x7c7   :  { %v1218_v30 = vadd.f32 %v2235_v29, %v2703_v36 }
 0x7c8   :  { %v1208_v31 = vpop.f32.mrf.mxu1 }
 0x7c9   :  { %v1217_v32 = vadd.f32 %v1208_v31, %v2705_v38 }
 0x7d3   :  { %v2249_v33 = vpop.f32.mrf.mxu1 }
 0x7d5   :  { %v1412_v34 = vpop.f32.mrf.mxu1 }
 0x7d6   :  { %2252 = vmatprep.mubr.msk.f32.mxu1 %vm374_vm1, %v1412_v34 }
 0x7d7   :  { %2253 = vmatmul.mubr.msk.f32.vlgmr.msra.gmra.mxu1 %vm374_vm1, %v2249_v33 }
 0x7d8   :  { %2267 = vmatpush3.msra.mxu1 %v1669_v60 }
 0x7d9   :  { %2268 = vmatprep.subr.mxu1 %v1668_v61 }
 0x7da   :  { %2269 = vmatpush3.msra.mxu1 %v1668_v61 }
 0x7db   :  { %2270 = vmatprep.subr.mxu1 %v1667_v62 }
 0x7dc   :  { %2271 = vmatpush3.msra.mxu1 %v1667_v62 }
 0x7dd   :  { %2272 = vmatprep.subr.mxu1 %v1666_v63 }
 0x7de   :  { %2273 = vmatpush3.msra.mxu1 %v1666_v63 }
 0x7df   :  { %2274 = vmatprep.subr.mxu1 %v1665_v0 }
 0x7e0   :  { %2275 = vmatpush3.msra.mxu1 %v1665_v0 }
 0x7e1   :  { %2276 = vmatprep.subr.mxu1 %v1664_v1 }
 0x7e2   :  { %2277 = vmatpush3.msra.mxu1 %v1664_v1  ;;  %v2040_v1 = vld [vmem:[#allocation2] ss:$0 sm:$0xff] }
 0x7e3   :  { %2278 = vmatprep.subr.mxu1 %v1663_v2 }
 0x7e4   :  { %2279 = vmatpush3.msra.mxu1 %v1663_v2 }
 0x7e5   :  { %2280 = vmatprep.subr.mxu1 %v1662_v3 }
 0x7e6   :  { %2281 = vmatpush3.msra.mxu1 %v1662_v3 }
 0x7e7   :  { %2282 = vmatprep.subr.mxu1 %v1661_v4 }
 0x7e8   :  { %2283 = vmatpush3.msra.mxu1 %v1661_v4 }
 0x7e9   :  { %2284 = vmatprep.subr.mxu1 %v1660_v5 }
 0x7ea   :  { %2285 = vmatpush3.msra.mxu1 %v1660_v5 }
 0x7eb   :  { %2286 = vmatprep.subr.mxu1 %v1659_v6 }
 0x7ec   :  { %2287 = vmatpush3.msra.mxu1 %v1659_v6  ;;  %v2041_v6 = vld [vmem:[#allocation4] ss:$0 sm:$0xff] }
 0x7ed   :  { %2288 = vmatprep.subr.mxu1 %v1658_v7 }
 0x7ee   :  { %2289 = vmatpush3.msra.mxu1 %v1658_v7 }
 0x7ef   :  { %2290 = vmatprep.subr.mxu1 %v1657_v25 }
 0x7f0   :  { %2291 = vmatpush3.msra.mxu1 %v1657_v25 }
 0x7f1   :  { %2292 = vmatprep.subr.mxu1 %v1656_v26 }
 0x7f2   :  { %2293 = vmatpush3.msra.mxu1 %v1656_v26 }
 0x7f3   :  { %2294 = vmatprep.subr.mxu1 %v1655_v27 }
 0x7f4   :  { %2295 = vmatpush3.msra.mxu1 %v1655_v27 }
 0x7f5   :  { %2296 = vmatprep.subr.mxu1 %v1654_v28 }
 0x7f6   :  { %2297 = vmatpush3.msra.mxu1 %v1654_v28 }
 0x897   :  { %v2254_v35 = vpop.f32.mrf.mxu1 }
 0x898   :  { %v1503_v39 = vadd.f32 %v2254_v35, %v1218_v30  ;;  %v2039_v35 = vld [vmem:[%s2893_s15] ss:$0 sm:$0xff] }
 0x899   :  { %v1493_v40 = vpop.f32.mrf.mxu1 }
 0x89a   :  { %v1512_v41 = vadd.f32 %v2033_v37, %v1503_v39  ;;  %v1502_v42 = vadd.f32 %v1493_v40, %v1217_v32 }
 0x89c   :  { %v1511_v43 = vadd.f32 %v2033_v37, %v1502_v42  ;;  %v1514_v36 = vadd.f32 %v1512_v41, %v2573_v10 }
 0x89e   :  { %v1520_v38 = vsel %vm110_vm0, %v1514_v36, 0.0  ;;  %v1513_v44 = vadd.f32 %v1511_v43, %v2565_v8 }
 0x89f   :  { %1521 = vadd.xlane.f32.xlu0 %v1520_v38 }
 0x8a0   :  { %v1517_v45 = vsel %vm110_vm0, %v1513_v44, 0.0 }
 0x8a1   :  { %1518 = vadd.xlane.f32.xlu1 %v1517_v45 }
 0x928   :  { %v1522_v46 = vpop.xlane.xlu0 %1521 }
 0x929   :  { %v1525_v47 = vmul.f32 0.03125, %v1522_v46 }
 0x92a   :  { %v1519_v48 = vpop.xlane.xlu1 %1518 }
 0x92b   :  { %v2746_v49 = vsub.f32 %v1514_v36, %v1525_v47  ;;  %v1524_v51 = vmul.f32 0.03125, %v1519_v48 }
 0x92d   :  { %v2748_v52 = vsub.f32 %v1513_v44, %v1524_v51  ;;  %v1529_v53 = vmul.f32 %v2746_v49, %v2746_v49 }
 0x92f   :  { %v1533_v10 = vsel %vm110_vm0, %v1529_v53, 0.0  ;;  %v1528_v8 = vmul.f32 %v2748_v52, %v2748_v52 }
 0x930   :  { %1534 = vadd.xlane.f32.xlu0 %v1533_v10 }
 0x931   :  { %v1530_v54 = vsel %vm110_vm0, %v1528_v8, 0.0  ;;  %v1801_v8 = vld [vmem:[%s2896_s18 + $0x18] sm:$0xff] }
 0x932   :  { %1531 = vadd.xlane.f32.xlu1 %v1530_v54  ;;  %v1800_v54 = vld [vmem:[%s2896_s18 + $0x10] sm:$0xff]  ;;  %2301 = vmatprep.subr.mxu0 %v1801_v8 }
 0x9b9   :  { %v1535_v9 = vpop.xlane.xlu0 %1534 }
 0x9ba   :  { %v1537_v11 = vmul.f32 0.03125, %v1535_v9 }
 0x9bb   :  { %v1532_v12 = vpop.xlane.xlu1 %1531 }
 0x9bc   :  { %v1539_v13 = vadd.f32 1e-05, %v1537_v11  ;;  %v1536_v14 = vmul.f32 0.03125, %v1532_v12  ;;  %v1895_v12 = vld [vmem:[%s2898_s20 + $0x18] sm:$0xff] }
 0x9be   :  { %2360 = vrsqrt.f32 %v1539_v13  ;;  %v1538_v50 = vadd.f32 1e-05, %v1536_v14  ;;  %v1894_v13 = vld [vmem:[%s2898_s20 + $0x10] sm:$0xff]  ;;  %v1893_v14 = vld [vmem:[%s2898_s20 + $0x8] sm:$0xff] }
 0x9c0   :  { %2362 = vrsqrt.f32 %v1538_v50  ;;  %v1892_v50 = vld [vmem:[%s2898_s20] sm:$0xff] }
 0x9cb   :  { %v2361_v15 = vpop.eup %2360 }
 0x9cc   :  { %v1543_v17 = vmul.f32 %v2361_v15, %v2746_v49  ;;  %v2042_v15 = vld [vmem:[%s2897_s19] ss:$0 sm:$0xff] }
 0x9cd   :  { %v2363_v18 = vpop.eup %2362 }
 0x9ce   :  { %v1542_v19 = vmul.f32 %v2363_v18, %v2748_v52  ;;  %v1551_v20 = vmul.f32 %v2034_v16, %v1543_v17 }
 0x9d0   :  { %v1550_v22 = vmul.f32 %v2034_v16, %v1542_v19  ;;  %v1559_v24 = vadd.f32 %v2035_v21, %v1551_v20 }
 0x9d2   :  { %v1558_v23 = vadd.f32 %v2035_v21, %v1550_v22  ;;  %v2045_v22 = vld [vmem:[%s2899_s21] ss:$0 sm:$0xff] }
 0x9d4   :  { %2263 = vmatprep.mubr.msk.f32.mxu0 %vm110_vm0, %v1558_v23 }
 0x9d5   :  { %2264 = vmatmul.mubr.msk.f32.vlgmr.msra.gmra.mxu0 %vm110_vm0, %v1559_v24 }
 0x9d6   :  { %2302 = vmatpush3.msra.mxu0 %v1801_v8 }
 0x9d7   :  { %2303 = vmatprep.subr.mxu0 %v1800_v54 }
 0x9d8   :  { %2304 = vmatpush3.msra.mxu0 %v1800_v54 }
 0x9d9   :  { %2305 = vmatprep.subr.mxu0 %v1799_v55 }
 0x9da   :  { %2306 = vmatpush3.msra.mxu0 %v1799_v55 }
 0x9db   :  { %2307 = vmatprep.subr.mxu0 %v1798_v57 }
 0x9dc   :  { %2308 = vmatpush3.msra.mxu0 %v1798_v57 }
 0x9dd   :  { %2312 = vmatprep.subr.mxu0 %v1895_v12 }
 0xa95   :  { %v2265_v29 = vpop.f32.mrf.mxu0 }
 0xa96   :  { %v1649_v30 = vadd.f32 %v2265_v29, %v2036_v56 }
 0xa97   :  { %v1643_v31 = vpop.f32.mrf.mxu0 }
 0xa98   :  { %v1644_v32 = vadd.f32 %v2036_v56, %v1643_v31  ;;  %v1653_v34 = vmax.f32 %v1649_v30, 0.0 }
 0xa9a   :  { %v1652_v33 = vmax.f32 %v1644_v32, 0.0 }
 0xa9c   :  { %2298 = vmatprep.mubr.f32.mxu1 %v1652_v33 }
 0xa9d   :  { %2299 = vmatmul.mubr.f32.vlgmr.msra.gmra.mxu1 %v1653_v34 }
 0xb5d   :  { %v2300_v37 = vpop.f32.mrf.mxu1 }
 0xb5e   :  { %v1749_v39 = vadd.f32 %v2300_v37, %v2039_v35 }
 0xb5f   :  { %v1743_v40 = vpop.f32.mrf.mxu1 }
 0xb60   :  { %v1744_v41 = vadd.f32 %v2039_v35, %v1743_v40  ;;  %v1753_v42 = vadd.f32 %v1749_v39, %v1559_v24 }
 0xb62   :  { %v1759_v43 = vsel %vm110_vm0, %v1753_v42, 0.0  ;;  %v1752_v36 = vadd.f32 %v1744_v41, %v1558_v23 }
 0xb63   :  { %1760 = vadd.xlane.f32.xlu0 %v1759_v43 }
 0xb64   :  { %v1756_v38 = vsel %vm110_vm0, %v1752_v36, 0.0 }
 0xb65   :  { %1757 = vadd.xlane.f32.xlu1 %v1756_v38 }
 0xbec   :  { %v1761_v44 = vpop.xlane.xlu0 %1760 }
 0xbed   :  { %v1763_v45 = vmul.f32 0.03125, %v1761_v44 }
 0xbee   :  { %v1758_v46 = vpop.xlane.xlu1 %1757 }
 0xbef   :  { %v1765_v47 = vsub.f32 %v1753_v42, %v1763_v45  ;;  %v1762_v48 = vmul.f32 0.03125, %v1758_v46 }
 0xbf1   :  { %v1764_v49 = vsub.f32 %v1752_v36, %v1762_v48  ;;  %v1767_v51 = vmul.f32 %v1765_v47, %v1765_v47 }
 0xbf3   :  { %v1771_v52 = vsel %vm110_vm0, %v1767_v51, 0.0  ;;  %v1766_v53 = vmul.f32 %v1764_v49, %v1764_v49 }
 0xbf4   :  { %1772 = vadd.xlane.f32.xlu0 %v1771_v52 }
 0xbf5   :  { %v1768_v10 = vsel %vm110_vm0, %v1766_v53, 0.0 }
 0xbf6   :  { %1769 = vadd.xlane.f32.xlu1 %v1768_v10 }
 0xc7d   :  { %v1773_v58 = vpop.xlane.xlu0 %1772 }
 0xc7e   :  { %v1775_v59 = vmul.f32 0.03125, %v1773_v58 }
 0xc7f   :  { %v1770_v60 = vpop.xlane.xlu1 %1769 }
 0xc80   :  { %v1777_v61 = vadd.f32 1e-05, %v1775_v59  ;;  %v1774_v62 = vmul.f32 0.03125, %v1770_v60 }
 0xc82   :  { %2364 = vrsqrt.f32 %v1777_v61  ;;  %v1776_v63 = vadd.f32 1e-05, %v1774_v62 }
 0xc84   :  { %2366 = vrsqrt.f32 %v1776_v63 }
 0xc8f   :  { %v2365_v0 = vpop.eup %2364 }
 0xc90   :  { %v1781_v2 = vmul.f32 %v2365_v0, %v1765_v47 }
 0xc91   :  { %v2367_v3 = vpop.eup %2366 }
 0xc92   :  { %v1780_v4 = vmul.f32 %v2367_v3, %v1764_v49  ;;  %v1789_v5 = vmul.f32 %v2040_v1, %v1781_v2 }
 0xc94   :  { %v1788_v7 = vmul.f32 %v2040_v1, %v1780_v4  ;;  %v1797_v11 = vadd.f32 %v2041_v6, %v1789_v5 }
 0xc96   :  { %v1796_v9 = vadd.f32 %v2041_v6, %v1788_v7 }
 0xc98   :  { %2309 = vmatprep.mubr.msk.f32.mxu0 %vm110_vm0, %v1796_v9 }
 0xc99   :  { %2310 = vmatmul.mubr.msk.f32.vlgmr.msra.gmra.mxu0 %vm110_vm0, %v1797_v11 }
 0xc9a   :  { %2313 = vmatpush3.msra.mxu0 %v1895_v12 }
 0xc9b   :  { %2314 = vmatprep.subr.mxu0 %v1894_v13 }
 0xc9c   :  { %2315 = vmatpush3.msra.mxu0 %v1894_v13 }
 0xc9d   :  { %2316 = vmatprep.subr.mxu0 %v1893_v14 }
 0xc9e   :  { %2317 = vmatpush3.msra.mxu0 %v1893_v14 }
 0xc9f   :  { %2318 = vmatprep.subr.mxu0 %v1892_v50 }
 0xca0   :  { %2319 = vmatpush3.msra.mxu0 %v1892_v50 }
 0xd59   :  { %v2311_v16 = vpop.f32.mrf.mxu0 }
 0xd5a   :  { %v1887_v17 = vadd.f32 %v2311_v16, %v2042_v15 }
 0xd5b   :  { %v1881_v18 = vpop.f32.mrf.mxu0 }
 0xd5c   :  { %v1882_v19 = vadd.f32 %v2042_v15, %v1881_v18  ;;  %v1891_v21 = vmax.f32 %v1887_v17, 0.0 }
 0xd5e   :  { %v1890_v20 = vmax.f32 %v1882_v19, 0.0 }
 0xd60   :  { %2320 = vmatprep.mubr.msk.f32.mxu0 %vm110_vm0, %v1890_v20 }
 0xd61   :  { %2321 = vmatmul.mubr.msk.f32.vlgmr.msra.gmra.mxu0 %vm110_vm0, %v1891_v21 }
 0xe21   :  { %v2322_v23 = vpop.f32.mrf.mxu0 }
 0xe22   :  { %v1981_v24 = vadd.f32 %v2322_v23, %v2045_v22 }
 0xe23   :  { %v1975_v25 = vpop.f32.mrf.mxu0 }
 0xe24   :  { %1985 = vst.msk [vmem:[%s2900_s22 + $0x8] sm:$0xff] %vm110_vm0, %v1981_v24  ;;  %v1976_v26 = vadd.f32 %v2045_v22, %v1975_v25 }
 0xe26   :  { %1984 = vst.msk [vmem:[%s2900_s22] sm:$0xff] %vm110_vm0, %v1976_v26 }
 0xe27   :  { %1990 = vsyncpa [#allocation3], 1 }
 0xe28   :  { %1991 = vsyncpa [#allocation5], 1 }

</bundles_post_ra>
